<compile_context>
chip_gen: v7x
topology: tpu7x:2x2x1
jax: 0.10.0
libtpu: 0.0.40
codegen_flags: <defaults>
</compile_context>

<pallas_src>
import functools

import jax
import jax.numpy as jnp
import numpy as np
from jax import lax
from jax.experimental import pallas as pl
from jax.experimental.pallas import tpu as pltpu


# ---------------------------------------------------------------------------
# Small helpers (padding / tiling / budgets).
# ---------------------------------------------------------------------------
def _round_up(x, m):
    return ((x + m - 1) // m) * m


def _vmem_limit_bytes():
    # Per-generation scoped-VMEM budget: ~75% of physical VMEM
    # (96 MiB on 128-MiB v5e/v6e, 48 MiB on 64-MiB v7x); conservative fallback.
    try:
        cap = int(pltpu.get_tpu_info().vmem_capacity_bytes)
    except Exception:  # pragma: no cover - defensive, keeps the script running
        cap = 64 * 1024 * 1024
    return min((cap // 4) * 3, 112 * 1024 * 1024)


def _pad_axis(x, axis, target):
    pad = target - x.shape[axis]
    if pad == 0:
        return x
    widths = [(0, 0)] * x.ndim
    widths[axis] = (0, pad)
    return jnp.pad(x, widths)


def _pad_gates(w, H, Hp):
    # (..., 4H) -> (..., 4Hp): zero-pad each gate block [i|f|g|o] separately so
    # every per-gate slice stays 128-lane aligned.
    lead = w.shape[:-1]
    w4 = w.reshape(lead + (4, H))
    w4 = jnp.pad(w4, [(0, 0)] * len(lead) + [(0, 0), (0, Hp - H)])
    return w4.reshape(lead + (4 * Hp,))


def _pick_time_chunk(seq_len, max_chunk=16):
    # Largest divisor of seq_len <= max_chunk (keeps the chunked grid exact).
    for c in range(min(seq_len, max_chunk), 0, -1):
        if seq_len % c == 0:
            return c
    return seq_len


# ---------------------------------------------------------------------------
# Pallas kernel #1: serial LSTM recurrence, streamed over time chunks.
# ---------------------------------------------------------------------------
def _lstm_recurrence_kernel(xg_ref, h0_ref, c0_ref, whh_ref, hall_ref,
                            h_sc, c_sc, *, hidden_p, chunk):
    Hp = hidden_p

    # Seed the (scratch-resident) recurrent state on the first chunk only.
    @pl.when(pl.program_id(0) == 0)
    def _():
        h_sc[...] = h0_ref[...]
        c_sc[...] = c0_ref[...]

    whh = whh_ref[...]                                   # hoisted: loaded once per chunk

    def step(tt, _):
        h = h_sc[...]
        c = c_sc[...]
        # x_gates already contains encoder term + embedding term + biases.
        gates = xg_ref[tt] + jnp.dot(
            h, whh,
            precision=lax.Precision.HIGHEST,             # only place 'highest' is kept
            preferred_element_type=jnp.float32)          # (B, 4Hp)
        # Hp is a multiple of 128 -> each gate slice is lane-aligned.
        i_g = jax.nn.sigmoid(gates[:, 0 * Hp:1 * Hp])
        f_g = jax.nn.sigmoid(gates[:, 1 * Hp:2 * Hp])
        g_g = jnp.tanh(gates[:, 2 * Hp:3 * Hp])
        o_g = jax.nn.sigmoid(gates[:, 3 * Hp:4 * Hp])
        c_new = f_g * c + i_g * g_g
        h_new = o_g * jnp.tanh(c_new)
        hall_ref[tt] = h_new
        h_sc[...] = h_new
        c_sc[...] = c_new
        return 0

    # Short chunks fully unrolled (LLO scheduler visibility); partial otherwise.
    lax.fori_loop(0, chunk, step, 0, unroll=(chunk if chunk <= 32 else 4))


# ---------------------------------------------------------------------------
# Pallas kernel #2: parallel output projection + length mask.
#   - consumes h_all in (T, B, Hp) layout, reorders the batch tile to
#     (b*T + t) row order in VMEM (no HBM transpose round-trip),
#   - hand-rolled bf16_3x matmul (3 MXU passes, ~f32 accuracy),
#   - skips fully-padded row tiles via a scalar-prefetched flag.
# ---------------------------------------------------------------------------
def _output_projection_kernel(flags_ref, h_ref, w_ref, b_ref, mask_ref, out_ref,
                              *, batch_tile, pad_fill):
    fill = jnp.float32(pad_fill)
    tile_has_active = flags_ref[pl.program_id(0)]

    @pl.when(tile_has_active == 0)
    def _():
        out_ref[...] = jnp.full(out_ref.shape, fill, jnp.float32)

    @pl.when(tile_has_active != 0)
    def _():
        # (T, tB, Hp) -> (tB*T, Hp) rows in b-major (b*T + t) order.
        h_bt = jnp.concatenate(
            [h_ref[:, b, :] for b in range(batch_tile)], axis=0)
        w = w_ref[...]
        # bf16_3x ("HIGH") matmul: split operands into hi/lo bf16 halves.
        h_hi = h_bt.astype(jnp.bfloat16)
        h_lo = (h_bt - h_hi.astype(jnp.float32)).astype(jnp.bfloat16)
        w_hi = w.astype(jnp.bfloat16)
        w_lo = (w - w_hi.astype(jnp.float32)).astype(jnp.bfloat16)
        logits = (jnp.dot(h_hi, w_hi, preferred_element_type=jnp.float32)
                  + jnp.dot(h_hi, w_lo, preferred_element_type=jnp.float32)
                  + jnp.dot(h_lo, w_hi, preferred_element_type=jnp.float32))
        logits = logits + b_ref[...]
        out_ref[...] = jnp.where(mask_ref[...] > 0, logits, fill)


# ---------------------------------------------------------------------------
# Wrapper: sorting, embedding gather, hoisted GEMMs, two pallas_calls.
# ---------------------------------------------------------------------------
def lstm_cell_decoder_forward(params, encoder_out, padded_target, target_lengths,
                              pad_token_id=0, time_chunk=None):
    B, E = encoder_out.shape
    V, Demb = params["embed"].shape
    H = params["w_hh"].shape[1]               # w_hh: (4H, H)
    Hp = _round_up(H, 128)
    Vp = _round_up(V, 128)
    vmem_limit = _vmem_limit_bytes()

    # Sort batch by target length (descending), as in the PyTorch forward.
    order = jnp.argsort(-target_lengths)      # stable
    enc = encoder_out[order].astype(jnp.float32)               # (B, E)
    tgt = padded_target[order]                                 # (B, L)
    fixed_len = (target_lengths[order] - 1).astype(jnp.int32)  # (B,)

    # Static time extent (requires concrete lengths; fine for this driver).
    T = int(np.max(np.asarray(target_lengths))) - 1
    Tc = _pick_time_chunk(T) if time_chunk is None else _pick_time_chunk(T, time_chunk)
    n_chunks = T // Tc

    # Projection tiling: large, lane-dense tiles; pad B so no tiny fallback tiles.
    tV = 512 if Vp % 512 == 0 else (256 if Vp % 256 == 0 else 128)
    tB = min(_round_up(max(1, (256 + T - 1) // T), 8), _round_up(B, 8), 64)
    Bp = _round_up(B, tB)
    n_btiles = Bp // tB

    # Pad batch-dependent inputs to Bp (padded rows are masked later).
    enc_p = _pad_axis(enc, 0, Bp)
    tgt_p = _pad_axis(tgt, 0, Bp)
    fixed_len_p = _pad_axis(fixed_len, 0, Bp)

    # Embedding lookup directly in time-major layout (transpose the small int
    # token matrix rather than the float embedding tensor).
    tgt_tm = jnp.transpose(tgt_p[:, :T])                        # (T, Bp)
    emb_tm = params["embed"][tgt_tm].astype(jnp.float32)        # (T, Bp, Demb)

    # Weight prep: transpose to (in, out); pad H->Hp (per gate) and V->Vp.
    w_ih = params["w_ih"].astype(jnp.float32)                   # (4H, E+Demb)
    w_ih_enc_T = _pad_gates(jnp.transpose(w_ih[:, :E]), H, Hp)      # (E,    4Hp)
    w_ih_emb_T = _pad_gates(jnp.transpose(w_ih[:, E:]), H, Hp)      # (Demb, 4Hp)
    w_hh_T = _pad_gates(
        _pad_axis(jnp.transpose(params["w_hh"].astype(jnp.float32)), 0, Hp),
        H, Hp)                                                      # (Hp, 4Hp)
    b_gates = _pad_gates(
        (params["b_ih"] + params["b_hh"]).astype(jnp.float32), H, Hp)  # (4Hp,)

    w_e2h_T = _pad_axis(jnp.transpose(params["w_e2h"].astype(jnp.float32)), 1, Hp)
    w_e2c_T = _pad_axis(jnp.transpose(params["w_e2c"].astype(jnp.float32)), 1, Hp)
    b_e2h = _pad_axis(params["b_e2h"].astype(jnp.float32), 0, Hp)
    b_e2c = _pad_axis(params["b_e2c"].astype(jnp.float32), 0, Hp)

    w_out_T = _pad_axis(
        _pad_axis(jnp.transpose(params["w_out"].astype(jnp.float32)), 0, Hp), 1, Vp)
    b_out = _pad_axis(params["b_out"].astype(jnp.float32), 0, Vp).reshape(1, Vp)

    # ---- (1) Hoisted, time-parallel GEMMs (precision=HIGH, bf16_3x). --------
    enc_gates = jnp.dot(enc_p, w_ih_enc_T, precision=lax.Precision.HIGH,
                        preferred_element_type=jnp.float32) + b_gates          # (Bp, 4Hp)
    emb_gates = jnp.dot(emb_tm.reshape(T * Bp, Demb), w_ih_emb_T,
                        precision=lax.Precision.HIGH,
                        preferred_element_type=jnp.float32).reshape(T, Bp, 4 * Hp)
    x_gates = emb_gates + enc_gates[None]                                       # (T, Bp, 4Hp)

    # Fused initial-state projection: one enc @ [W_e2h | W_e2c] GEMM.
    w_init = jnp.concatenate([w_e2h_T, w_e2c_T], axis=1)                        # (E, 2Hp)
    b_init = jnp.concatenate([b_e2h, b_e2c], axis=0)                            # (2Hp,)
    hc0 = jnp.dot(enc_p, w_init, precision=lax.Precision.HIGH,
                  preferred_element_type=jnp.float32) + b_init                  # (Bp, 2Hp)
    h0, c0 = hc0[:, :Hp], hc0[:, Hp:]

    # ---- (2) Serial recurrence kernel (time-chunk streamed, state in scratch).
    h_all = pl.pallas_call(
        functools.partial(_lstm_recurrence_kernel, hidden_p=Hp, chunk=Tc),
        out_shape=jax.ShapeDtypeStruct((T, Bp, Hp), jnp.float32),
        grid=(n_chunks,),
        in_specs=[
            pl.BlockSpec((Tc, Bp, 4 * Hp), lambda c: (c, 0, 0)),   # x_gates chunk (streamed)
            pl.BlockSpec((Bp, Hp), lambda c: (0, 0)),              # h0 (invariant)
            pl.BlockSpec((Bp, Hp), lambda c: (0, 0)),              # c0 (invariant)
            pl.BlockSpec((Hp, 4 * Hp), lambda c: (0, 0)),          # W_hh (invariant)
        ],
        out_specs=pl.BlockSpec((Tc, Bp, Hp), lambda c: (c, 0, 0)), # h chunk writeback
        scratch_shapes=[pltpu.VMEM((Bp, Hp), jnp.float32),          # h state
                        pltpu.VMEM((Bp, Hp), jnp.float32)],         # c state
        compiler_params=pltpu.CompilerParams(
            # Chunks are sequentially dependent through scratch -> "arbitrary".
            dimension_semantics=("arbitrary",),
            vmem_limit_bytes=vmem_limit),
    )(x_gates, h0, c0, w_hh_T)

    # ---- (3) Parallel output projection + length mask (no h_all transpose). -
    t_idx = jnp.arange(T, dtype=jnp.int32)
    active = fixed_len_p[:, None] > t_idx[None, :]                              # (Bp, T)
    mask_rows = active.reshape(Bp * T, 1).astype(jnp.int32)                     # (Bp*T, 1)
    tile_flags = jnp.any(active.reshape(n_btiles, tB * T), axis=1).astype(jnp.int32)

    grid_spec = pltpu.PrefetchScalarGridSpec(
        num_scalar_prefetch=1,
        grid=(n_btiles, Vp // tV),
        in_specs=[
            pl.BlockSpec((T, tB, Hp), lambda bi, vi, flags: (0, bi, 0)),   # hidden states
            pl.BlockSpec((Hp, tV), lambda bi, vi, flags: (0, vi)),         # W_out (V-tiled)
            pl.BlockSpec((1, tV), lambda bi, vi, flags: (0, vi)),          # b_out
            pl.BlockSpec((tB * T, 1), lambda bi, vi, flags: (bi, 0)),      # active-row mask
        ],
        out_specs=pl.BlockSpec((tB * T, tV), lambda bi, vi, flags: (bi, vi)),
    )
    pred = pl.pallas_call(
        functools.partial(_output_projection_kernel,
                          batch_tile=tB, pad_fill=float(pad_token_id)),
        out_shape=jax.ShapeDtypeStruct((Bp * T, Vp), jnp.float32),
        grid_spec=grid_spec,
        compiler_params=pltpu.CompilerParams(
            dimension_semantics=("parallel", "parallel"),
            vmem_limit_bytes=vmem_limit),
    )(tile_flags, h_all, w_out_T, b_out, mask_rows)

    output_predictions = pred[:B * T, :V]              # drop batch / vocab padding
    target_predictions = tgt[:, 1:].reshape(-1)
    return output_predictions, target_predictions


# ---------------------------------------------------------------------------
# Pure numpy reference mirroring the PyTorch forward (for verification).
# ---------------------------------------------------------------------------
def reference_forward(params, encoder_out, padded_target, target_lengths,
                      pad_token_id=0):
    def sig(x):
        return 1.0 / (1.0 + np.exp(-x))

    p = {k: np.asarray(v, np.float32) if np.asarray(v).dtype.kind == "f"
         else np.asarray(v) for k, v in params.items()}
    enc0 = np.asarray(encoder_out, np.float32)
    tgt0 = np.asarray(padded_target)
    lens = np.asarray(target_lengths)

    order = np.argsort(-lens, kind="stable")
    enc = enc0[order]
    tgt = tgt0[order]
    emb = p["embed"][tgt]                                # (B, L, Demb)

    h = enc @ p["w_e2h"].T + p["b_e2h"]
    c = enc @ p["w_e2c"].T + p["b_e2c"]

    fixed = lens - 1
    T = int(fixed.max())
    B = enc.shape[0]
    V = p["w_out"].shape[0]
    H = p["w_hh"].shape[1]
    pred = np.full((B, T, V), float(pad_token_id), np.float32)

    for t in range(T):
        sb = int((fixed > t).sum())                      # sorted desc -> prefix
        x = np.concatenate([enc[:sb], emb[:sb, t]], axis=1)
        hh, cc = h[:sb], c[:sb]
        g = x @ p["w_ih"].T + p["b_ih"] + hh @ p["w_hh"].T + p["b_hh"]
        i = sig(g[:, :H]); f = sig(g[:, H:2 * H])
        gg = np.tanh(g[:, 2 * H:3 * H]); o = sig(g[:, 3 * H:4 * H])
        cc = f * cc + i * gg
        hh = o * np.tanh(cc)
        h = h.copy(); c = c.copy()
        h[:sb] = hh; c[:sb] = cc
        pred[:sb, t] = hh @ p["w_out"].T + p["b_out"]

    return pred.reshape(-1, V), tgt[:, 1:].reshape(-1)


# ---------------------------------------------------------------------------
# Deterministic parameter / input construction and test driver.
# ---------------------------------------------------------------------------
def make_params(key, encoder_dim, embedding_dim, hidden_dim, vocab_size):
    ks = jax.random.split(key, 12)
    s = 0.1
    return {
        "embed": s * jax.random.normal(ks[0], (vocab_size, embedding_dim), jnp.float32),
        "w_e2h": s * jax.random.normal(ks[1], (hidden_dim, encoder_dim), jnp.float32),
        "b_e2h": s * jax.random.normal(ks[2], (hidden_dim,), jnp.float32),
        "w_e2c": s * jax.random.normal(ks[3], (hidden_dim, encoder_dim), jnp.float32),
        "b_e2c": s * jax.random.normal(ks[4], (hidden_dim,), jnp.float32),
        "w_ih": s * jax.random.normal(ks[5], (4 * hidden_dim, encoder_dim + embedding_dim), jnp.float32),
        "w_hh": s * jax.random.normal(ks[6], (4 * hidden_dim, hidden_dim), jnp.float32),
        "b_ih": s * jax.random.normal(ks[7], (4 * hidden_dim,), jnp.float32),
        "b_hh": s * jax.random.normal(ks[8], (4 * hidden_dim,), jnp.float32),
        "w_out": s * jax.random.normal(ks[9], (vocab_size, hidden_dim), jnp.float32),
        "b_out": s * jax.random.normal(ks[10], (vocab_size,), jnp.float32),
    }


if __name__ == "__main__":
    B, E, DEMB, H, V, L = 8, 16, 16, 32, 32, 9

    key = jax.random.PRNGKey(0)
    k_par, k_enc, k_tgt = jax.random.split(key, 3)

    params = make_params(k_par, E, DEMB, H, V)
    encoder_out = jax.random.normal(k_enc, (B, E), jnp.float32)
    padded_target = jax.random.randint(k_tgt, (B, L), 0, V, dtype=jnp.int32)
    target_lengths = jnp.array([9, 7, 5, 9, 3, 2, 6, 4], dtype=jnp.int32)

    # time_chunk=4 -> T=8 runs as 2 streamed chunks, exercising the chunked
    # recurrence grid and the scratch-resident state carry.
    preds, targets = lstm_cell_decoder_forward(
        params, encoder_out, padded_target, target_lengths,
        pad_token_id=0, time_chunk=4)
    preds = jax.block_until_ready(preds)
    targets = jax.block_until_ready(targets)

    ref_preds, ref_targets = reference_forward(
        params, encoder_out, padded_target, target_lengths, pad_token_id=0)

    assert preds.shape == ref_preds.shape and targets.shape == ref_targets.shape
    np.testing.assert_allclose(np.asarray(preds), ref_preds, rtol=2e-3, atol=2e-3)
    np.testing.assert_array_equal(np.asarray(targets), ref_targets)

    print("KERNEL_OK")
</pallas_src>

<mosaic_0001>
module attributes {stable_mosaic.version = 11 : i64} {
  func.func @_lstm_recurrence_kernel(%arg0: i32, %arg1: memref<4x8x512xf32, #tpu.memory_space<vmem>>, %arg2: memref<8x128xf32, #tpu.memory_space<vmem>>, %arg3: memref<8x128xf32, #tpu.memory_space<vmem>>, %arg4: memref<128x512xf32, #tpu.memory_space<vmem>>, %arg5: memref<4x8x128xf32, #tpu.memory_space<vmem>>, %arg6: memref<8x128xf32, #tpu.memory_space<vmem>>, %arg7: memref<8x128xf32, #tpu.memory_space<vmem>>) attributes {dimension_semantics = [#tpu.dimension_semantics<arbitrary>], iteration_bounds = array<i64: 2>, scalar_prefetch = 0 : i64, scratch_operands = 2 : i64, tpu.core_type = #tpu.core_type<tc>, window_params = [{transform_indices = @transform_0, window_bounds = array<i64: 4, 8, 512>}, {pipeline_mode = #tpu.pipeline_mode<synchronous>, transform_indices = @transform_1, window_bounds = array<i64: 8, 128>}, {pipeline_mode = #tpu.pipeline_mode<synchronous>, transform_indices = @transform_2, window_bounds = array<i64: 8, 128>}, {pipeline_mode = #tpu.pipeline_mode<synchronous>, transform_indices = @transform_3, window_bounds = array<i64: 128, 512>}, {transform_indices = @transform_4, window_bounds = array<i64: 4, 8, 128>}]} {
    %c0_i32 = arith.constant 0 : i32
    %0 = arith.cmpi eq, %arg0, %c0_i32 : i32
    %1 = arith.extui %0 : i1 to i32
    %c0_i32_0 = arith.constant 0 : i32
    %2 = arith.cmpi ne, %1, %c0_i32_0 : i32
    scf.if %2 {
      %c0_66 = arith.constant 0 : index
      %c0_67 = arith.constant 0 : index
      %156 = vector.load %arg2[%c0_66, %c0_67] : memref<8x128xf32, #tpu.memory_space<vmem>>, vector<8x128xf32>
      %c0_68 = arith.constant 0 : index
      %c0_69 = arith.constant 0 : index
      %157 = vector.load %arg6[%c0_68, %c0_69] : memref<8x128xf32, #tpu.memory_space<vmem>>, vector<8x128xf32>
      tpu.vector_store %arg6[%c0_68, %c0_69], %156 {strides = array<i32>} : memref<8x128xf32, #tpu.memory_space<vmem>>, vector<8x128xf32>,
      %c0_70 = arith.constant 0 : index
      %c0_71 = arith.constant 0 : index
      %158 = vector.load %arg3[%c0_70, %c0_71] : memref<8x128xf32, #tpu.memory_space<vmem>>, vector<8x128xf32>
      %c0_72 = arith.constant 0 : index
      %c0_73 = arith.constant 0 : index
      %159 = vector.load %arg7[%c0_72, %c0_73] : memref<8x128xf32, #tpu.memory_space<vmem>>, vector<8x128xf32>
      tpu.vector_store %arg7[%c0_72, %c0_73], %158 {strides = array<i32>} : memref<8x128xf32, #tpu.memory_space<vmem>>, vector<8x128xf32>,
    } else {
    }
    %c0 = arith.constant 0 : index
    %c0_1 = arith.constant 0 : index
    %3 = vector.load %arg4[%c0, %c0_1] : memref<128x512xf32, #tpu.memory_space<vmem>>, vector<128x512xf32>
    %c0_i32_2 = arith.constant 0 : i32
    %c0_3 = arith.constant 0 : index
    %c0_4 = arith.constant 0 : index
    %4 = vector.load %arg6[%c0_3, %c0_4] : memref<8x128xf32, #tpu.memory_space<vmem>>, vector<8x128xf32>
    %c0_5 = arith.constant 0 : index
    %c0_6 = arith.constant 0 : index
    %5 = vector.load %arg7[%c0_5, %c0_6] : memref<8x128xf32, #tpu.memory_space<vmem>>, vector<8x128xf32>
    %6 = arith.index_cast %c0_i32_2 : i32 to index
    %c0_7 = arith.constant 0 : index
    %c0_8 = arith.constant 0 : index
    %7 = vector.load %arg1[%6, %c0_7, %c0_8] : memref<4x8x512xf32, #tpu.memory_space<vmem>>, vector<1x8x512xf32>
    %8 = vector.shape_cast %7 : vector<1x8x512xf32> to vector<8x512xf32>
    %cst = arith.constant dense<0.000000e+00> : vector<8x512xf32>
    %9 = tpu.matmul %4, %3, %cst {dimension_numbers = #tpu.dot_dimension_numbers<[1], [0], [0], [1], [0, 0, 1, 1], [], []>, precision = #tpu.contract_precision<fp32>} : vector<8x128xf32>, vector<128x512xf32>, vector<8x512xf32> -> vector<8x512xf32>
    %10 = arith.addf %8, %9 : vector<8x512xf32>
    %11 = vector.extract_strided_slice %10 {offsets = [0, 0], sizes = [8, 128], strides = [1, 1]} : vector<8x512xf32> to vector<8x128xf32>
    %12 = arith.negf %11 : vector<8x128xf32>
    %13 = math.exp %12 : vector<8x128xf32>
    %cst_9 = arith.constant 1.000000e+00 : f32
    %14 = vector.broadcast %cst_9 : f32 to vector<8x128xf32>
    %15 = arith.addf %14, %13 : vector<8x128xf32>
    %16 = arith.divf %14, %15 : vector<8x128xf32>
    %17 = vector.extract_strided_slice %10 {offsets = [0, 128], sizes = [8, 128], strides = [1, 1]} : vector<8x512xf32> to vector<8x128xf32>
    %18 = arith.negf %17 : vector<8x128xf32>
    %19 = math.exp %18 : vector<8x128xf32>
    %cst_10 = arith.constant 1.000000e+00 : f32
    %20 = vector.broadcast %cst_10 : f32 to vector<8x128xf32>
    %21 = arith.addf %20, %19 : vector<8x128xf32>
    %22 = arith.divf %20, %21 : vector<8x128xf32>
    %23 = vector.extract_strided_slice %10 {offsets = [0, 256], sizes = [8, 128], strides = [1, 1]} : vector<8x512xf32> to vector<8x128xf32>
    %24 = math.tanh %23 : vector<8x128xf32>
    %25 = vector.extract_strided_slice %10 {offsets = [0, 384], sizes = [8, 128], strides = [1, 1]} : vector<8x512xf32> to vector<8x128xf32>
    %26 = arith.negf %25 : vector<8x128xf32>
    %27 = math.exp %26 : vector<8x128xf32>
    %cst_11 = arith.constant 1.000000e+00 : f32
    %28 = vector.broadcast %cst_11 : f32 to vector<8x128xf32>
    %29 = arith.addf %28, %27 : vector<8x128xf32>
    %30 = arith.divf %28, %29 : vector<8x128xf32>
    %31 = arith.mulf %22, %5 : vector<8x128xf32>
    %32 = arith.mulf %16, %24 : vector<8x128xf32>
    %33 = arith.addf %31, %32 : vector<8x128xf32>
    %34 = math.tanh %33 : vector<8x128xf32>
    %35 = arith.mulf %30, %34 : vector<8x128xf32>
    %36 = arith.index_cast %c0_i32_2 : i32 to index
    %c0_12 = arith.constant 0 : index
    %c0_13 = arith.constant 0 : index
    %37 = vector.load %arg5[%36, %c0_12, %c0_13] : memref<4x8x128xf32, #tpu.memory_space<vmem>>, vector<1x8x128xf32>
    %38 = vector.shape_cast %37 : vector<1x8x128xf32> to vector<8x128xf32>
    %39 = vector.shape_cast %35 : vector<8x128xf32> to vector<1x8x128xf32>
    tpu.vector_store %arg5[%36, %c0_12, %c0_13], %39 {strides = array<i32>} : memref<4x8x128xf32, #tpu.memory_space<vmem>>, vector<1x8x128xf32>,
    %c0_14 = arith.constant 0 : index
    %c0_15 = arith.constant 0 : index
    %40 = vector.load %arg6[%c0_14, %c0_15] : memref<8x128xf32, #tpu.memory_space<vmem>>, vector<8x128xf32>
    tpu.vector_store %arg6[%c0_14, %c0_15], %35 {strides = array<i32>} : memref<8x128xf32, #tpu.memory_space<vmem>>, vector<8x128xf32>,
    %c0_16 = arith.constant 0 : index
    %c0_17 = arith.constant 0 : index
    %41 = vector.load %arg7[%c0_16, %c0_17] : memref<8x128xf32, #tpu.memory_space<vmem>>, vector<8x128xf32>
    tpu.vector_store %arg7[%c0_16, %c0_17], %33 {strides = array<i32>} : memref<8x128xf32, #tpu.memory_space<vmem>>, vector<8x128xf32>,
    %c1_i32 = arith.constant 1 : i32
    %c0_18 = arith.constant 0 : index
    %c0_19 = arith.constant 0 : index
    %42 = vector.load %arg6[%c0_18, %c0_19] : memref<8x128xf32, #tpu.memory_space<vmem>>, vector<8x128xf32>
    %c0_20 = arith.constant 0 : index
    %c0_21 = arith.constant 0 : index
    %43 = vector.load %arg7[%c0_20, %c0_21] : memref<8x128xf32, #tpu.memory_space<vmem>>, vector<8x128xf32>
    %44 = arith.index_cast %c1_i32 : i32 to index
    %c0_22 = arith.constant 0 : index
    %c0_23 = arith.constant 0 : index
    %45 = vector.load %arg1[%44, %c0_22, %c0_23] : memref<4x8x512xf32, #tpu.memory_space<vmem>>, vector<1x8x512xf32>
    %46 = vector.shape_cast %45 : vector<1x8x512xf32> to vector<8x512xf32>
    %cst_24 = arith.constant dense<0.000000e+00> : vector<8x512xf32>
    %47 = tpu.matmul %42, %3, %cst_24 {dimension_numbers = #tpu.dot_dimension_numbers<[1], [0], [0], [1], [0, 0, 1, 1], [], []>, precision = #tpu.contract_precision<fp32>} : vector<8x128xf32>, vector<128x512xf32>, vector<8x512xf32> -> vector<8x512xf32>
    %48 = arith.addf %46, %47 : vector<8x512xf32>
    %49 = vector.extract_strided_slice %48 {offsets = [0, 0], sizes = [8, 128], strides = [1, 1]} : vector<8x512xf32> to vector<8x128xf32>
    %50 = arith.negf %49 : vector<8x128xf32>
    %51 = math.exp %50 : vector<8x128xf32>
    %cst_25 = arith.constant 1.000000e+00 : f32
    %52 = vector.broadcast %cst_25 : f32 to vector<8x128xf32>
    %53 = arith.addf %52, %51 : vector<8x128xf32>
    %54 = arith.divf %52, %53 : vector<8x128xf32>
    %55 = vector.extract_strided_slice %48 {offsets = [0, 128], sizes = [8, 128], strides = [1, 1]} : vector<8x512xf32> to vector<8x128xf32>
    %56 = arith.negf %55 : vector<8x128xf32>
    %57 = math.exp %56 : vector<8x128xf32>
    %cst_26 = arith.constant 1.000000e+00 : f32
    %58 = vector.broadcast %cst_26 : f32 to vector<8x128xf32>
    %59 = arith.addf %58, %57 : vector<8x128xf32>
    %60 = arith.divf %58, %59 : vector<8x128xf32>
    %61 = vector.extract_strided_slice %48 {offsets = [0, 256], sizes = [8, 128], strides = [1, 1]} : vector<8x512xf32> to vector<8x128xf32>
    %62 = math.tanh %61 : vector<8x128xf32>
    %63 = vector.extract_strided_slice %48 {offsets = [0, 384], sizes = [8, 128], strides = [1, 1]} : vector<8x512xf32> to vector<8x128xf32>
    %64 = arith.negf %63 : vector<8x128xf32>
    %65 = math.exp %64 : vector<8x128xf32>
    %cst_27 = arith.constant 1.000000e+00 : f32
    %66 = vector.broadcast %cst_27 : f32 to vector<8x128xf32>
    %67 = arith.addf %66, %65 : vector<8x128xf32>
    %68 = arith.divf %66, %67 : vector<8x128xf32>
    %69 = arith.mulf %60, %43 : vector<8x128xf32>
    %70 = arith.mulf %54, %62 : vector<8x128xf32>
    %71 = arith.addf %69, %70 : vector<8x128xf32>
    %72 = math.tanh %71 : vector<8x128xf32>
    %73 = arith.mulf %68, %72 : vector<8x128xf32>
    %74 = arith.index_cast %c1_i32 : i32 to index
    %c0_28 = arith.constant 0 : index
    %c0_29 = arith.constant 0 : index
    %75 = vector.load %arg5[%74, %c0_28, %c0_29] : memref<4x8x128xf32, #tpu.memory_space<vmem>>, vector<1x8x128xf32>
    %76 = vector.shape_cast %75 : vector<1x8x128xf32> to vector<8x128xf32>
    %77 = vector.shape_cast %73 : vector<8x128xf32> to vector<1x8x128xf32>
    tpu.vector_store %arg5[%74, %c0_28, %c0_29], %77 {strides = array<i32>} : memref<4x8x128xf32, #tpu.memory_space<vmem>>, vector<1x8x128xf32>,
    %c0_30 = arith.constant 0 : index
    %c0_31 = arith.constant 0 : index
    %78 = vector.load %arg6[%c0_30, %c0_31] : memref<8x128xf32, #tpu.memory_space<vmem>>, vector<8x128xf32>
    tpu.vector_store %arg6[%c0_30, %c0_31], %73 {strides = array<i32>} : memref<8x128xf32, #tpu.memory_space<vmem>>, vector<8x128xf32>,
    %c0_32 = arith.constant 0 : index
    %c0_33 = arith.constant 0 : index
    %79 = vector.load %arg7[%c0_32, %c0_33] : memref<8x128xf32, #tpu.memory_space<vmem>>, vector<8x128xf32>
    tpu.vector_store %arg7[%c0_32, %c0_33], %71 {strides = array<i32>} : memref<8x128xf32, #tpu.memory_space<vmem>>, vector<8x128xf32>,
    %c2_i32 = arith.constant 2 : i32
    %c0_34 = arith.constant 0 : index
    %c0_35 = arith.constant 0 : index
    %80 = vector.load %arg6[%c0_34, %c0_35] : memref<8x128xf32, #tpu.memory_space<vmem>>, vector<8x128xf32>
    %c0_36 = arith.constant 0 : index
    %c0_37 = arith.constant 0 : index
    %81 = vector.load %arg7[%c0_36, %c0_37] : memref<8x128xf32, #tpu.memory_space<vmem>>, vector<8x128xf32>
    %82 = arith.index_cast %c2_i32 : i32 to index
    %c0_38 = arith.constant 0 : index
    %c0_39 = arith.constant 0 : index
    %83 = vector.load %arg1[%82, %c0_38, %c0_39] : memref<4x8x512xf32, #tpu.memory_space<vmem>>, vector<1x8x512xf32>
    %84 = vector.shape_cast %83 : vector<1x8x512xf32> to vector<8x512xf32>
    %cst_40 = arith.constant dense<0.000000e+00> : vector<8x512xf32>
    %85 = tpu.matmul %80, %3, %cst_40 {dimension_numbers = #tpu.dot_dimension_numbers<[1], [0], [0], [1], [0, 0, 1, 1], [], []>, precision = #tpu.contract_precision<fp32>} : vector<8x128xf32>, vector<128x512xf32>, vector<8x512xf32> -> vector<8x512xf32>
    %86 = arith.addf %84, %85 : vector<8x512xf32>
    %87 = vector.extract_strided_slice %86 {offsets = [0, 0], sizes = [8, 128], strides = [1, 1]} : vector<8x512xf32> to vector<8x128xf32>
    %88 = arith.negf %87 : vector<8x128xf32>
    %89 = math.exp %88 : vector<8x128xf32>
    %cst_41 = arith.constant 1.000000e+00 : f32
    %90 = vector.broadcast %cst_41 : f32 to vector<8x128xf32>
    %91 = arith.addf %90, %89 : vector<8x128xf32>
    %92 = arith.divf %90, %91 : vector<8x128xf32>
    %93 = vector.extract_strided_slice %86 {offsets = [0, 128], sizes = [8, 128], strides = [1, 1]} : vector<8x512xf32> to vector<8x128xf32>
    %94 = arith.negf %93 : vector<8x128xf32>
    %95 = math.exp %94 : vector<8x128xf32>
    %cst_42 = arith.constant 1.000000e+00 : f32
    %96 = vector.broadcast %cst_42 : f32 to vector<8x128xf32>
    %97 = arith.addf %96, %95 : vector<8x128xf32>
    %98 = arith.divf %96, %97 : vector<8x128xf32>
    %99 = vector.extract_strided_slice %86 {offsets = [0, 256], sizes = [8, 128], strides = [1, 1]} : vector<8x512xf32> to vector<8x128xf32>
    %100 = math.tanh %99 : vector<8x128xf32>
    %101 = vector.extract_strided_slice %86 {offsets = [0, 384], sizes = [8, 128], strides = [1, 1]} : vector<8x512xf32> to vector<8x128xf32>
    %102 = arith.negf %101 : vector<8x128xf32>
    %103 = math.exp %102 : vector<8x128xf32>
    %cst_43 = arith.constant 1.000000e+00 : f32
    %104 = vector.broadcast %cst_43 : f32 to vector<8x128xf32>
    %105 = arith.addf %104, %103 : vector<8x128xf32>
    %106 = arith.divf %104, %105 : vector<8x128xf32>
    %107 = arith.mulf %98, %81 : vector<8x128xf32>
    %108 = arith.mulf %92, %100 : vector<8x128xf32>
    %109 = arith.addf %107, %108 : vector<8x128xf32>
    %110 = math.tanh %109 : vector<8x128xf32>
    %111 = arith.mulf %106, %110 : vector<8x128xf32>
    %112 = arith.index_cast %c2_i32 : i32 to index
    %c0_44 = arith.constant 0 : index
    %c0_45 = arith.constant 0 : index
    %113 = vector.load %arg5[%112, %c0_44, %c0_45] : memref<4x8x128xf32, #tpu.memory_space<vmem>>, vector<1x8x128xf32>
    %114 = vector.shape_cast %113 : vector<1x8x128xf32> to vector<8x128xf32>
    %115 = vector.shape_cast %111 : vector<8x128xf32> to vector<1x8x128xf32>
    tpu.vector_store %arg5[%112, %c0_44, %c0_45], %115 {strides = array<i32>} : memref<4x8x128xf32, #tpu.memory_space<vmem>>, vector<1x8x128xf32>,
    %c0_46 = arith.constant 0 : index
    %c0_47 = arith.constant 0 : index
    %116 = vector.load %arg6[%c0_46, %c0_47] : memref<8x128xf32, #tpu.memory_space<vmem>>, vector<8x128xf32>
    tpu.vector_store %arg6[%c0_46, %c0_47], %111 {strides = array<i32>} : memref<8x128xf32, #tpu.memory_space<vmem>>, vector<8x128xf32>,
    %c0_48 = arith.constant 0 : index
    %c0_49 = arith.constant 0 : index
    %117 = vector.load %arg7[%c0_48, %c0_49] : memref<8x128xf32, #tpu.memory_space<vmem>>, vector<8x128xf32>
    tpu.vector_store %arg7[%c0_48, %c0_49], %109 {strides = array<i32>} : memref<8x128xf32, #tpu.memory_space<vmem>>, vector<8x128xf32>,
    %c3_i32 = arith.constant 3 : i32
    %c0_50 = arith.constant 0 : index
    %c0_51 = arith.constant 0 : index
    %118 = vector.load %arg6[%c0_50, %c0_51] : memref<8x128xf32, #tpu.memory_space<vmem>>, vector<8x128xf32>
    %c0_52 = arith.constant 0 : index
    %c0_53 = arith.constant 0 : index
    %119 = vector.load %arg7[%c0_52, %c0_53] : memref<8x128xf32, #tpu.memory_space<vmem>>, vector<8x128xf32>
    %120 = arith.index_cast %c3_i32 : i32 to index
    %c0_54 = arith.constant 0 : index
    %c0_55 = arith.constant 0 : index
    %121 = vector.load %arg1[%120, %c0_54, %c0_55] : memref<4x8x512xf32, #tpu.memory_space<vmem>>, vector<1x8x512xf32>
    %122 = vector.shape_cast %121 : vector<1x8x512xf32> to vector<8x512xf32>
    %cst_56 = arith.constant dense<0.000000e+00> : vector<8x512xf32>
    %123 = tpu.matmul %118, %3, %cst_56 {dimension_numbers = #tpu.dot_dimension_numbers<[1], [0], [0], [1], [0, 0, 1, 1], [], []>, precision = #tpu.contract_precision<fp32>} : vector<8x128xf32>, vector<128x512xf32>, vector<8x512xf32> -> vector<8x512xf32>
    %124 = arith.addf %122, %123 : vector<8x512xf32>
    %125 = vector.extract_strided_slice %124 {offsets = [0, 0], sizes = [8, 128], strides = [1, 1]} : vector<8x512xf32> to vector<8x128xf32>
    %126 = arith.negf %125 : vector<8x128xf32>
    %127 = math.exp %126 : vector<8x128xf32>
    %cst_57 = arith.constant 1.000000e+00 : f32
    %128 = vector.broadcast %cst_57 : f32 to vector<8x128xf32>
    %129 = arith.addf %128, %127 : vector<8x128xf32>
    %130 = arith.divf %128, %129 : vector<8x128xf32>
    %131 = vector.extract_strided_slice %124 {offsets = [0, 128], sizes = [8, 128], strides = [1, 1]} : vector<8x512xf32> to vector<8x128xf32>
    %132 = arith.negf %131 : vector<8x128xf32>
    %133 = math.exp %132 : vector<8x128xf32>
    %cst_58 = arith.constant 1.000000e+00 : f32
    %134 = vector.broadcast %cst_58 : f32 to vector<8x128xf32>
    %135 = arith.addf %134, %133 : vector<8x128xf32>
    %136 = arith.divf %134, %135 : vector<8x128xf32>
    %137 = vector.extract_strided_slice %124 {offsets = [0, 256], sizes = [8, 128], strides = [1, 1]} : vector<8x512xf32> to vector<8x128xf32>
    %138 = math.tanh %137 : vector<8x128xf32>
    %139 = vector.extract_strided_slice %124 {offsets = [0, 384], sizes = [8, 128], strides = [1, 1]} : vector<8x512xf32> to vector<8x128xf32>
    %140 = arith.negf %139 : vector<8x128xf32>
    %141 = math.exp %140 : vector<8x128xf32>
    %cst_59 = arith.constant 1.000000e+00 : f32
    %142 = vector.broadcast %cst_59 : f32 to vector<8x128xf32>
    %143 = arith.addf %142, %141 : vector<8x128xf32>
    %144 = arith.divf %142, %143 : vector<8x128xf32>
    %145 = arith.mulf %136, %119 : vector<8x128xf32>
    %146 = arith.mulf %130, %138 : vector<8x128xf32>
    %147 = arith.addf %145, %146 : vector<8x128xf32>
    %148 = math.tanh %147 : vector<8x128xf32>
    %149 = arith.mulf %144, %148 : vector<8x128xf32>
    %150 = arith.index_cast %c3_i32 : i32 to index
    %c0_60 = arith.constant 0 : index
    %c0_61 = arith.constant 0 : index
    %151 = vector.load %arg5[%150, %c0_60, %c0_61] : memref<4x8x128xf32, #tpu.memory_space<vmem>>, vector<1x8x128xf32>
    %152 = vector.shape_cast %151 : vector<1x8x128xf32> to vector<8x128xf32>
    %153 = vector.shape_cast %149 : vector<8x128xf32> to vector<1x8x128xf32>
    tpu.vector_store %arg5[%150, %c0_60, %c0_61], %153 {strides = array<i32>} : memref<4x8x128xf32, #tpu.memory_space<vmem>>, vector<1x8x128xf32>,
    %c0_62 = arith.constant 0 : index
    %c0_63 = arith.constant 0 : index
    %154 = vector.load %arg6[%c0_62, %c0_63] : memref<8x128xf32, #tpu.memory_space<vmem>>, vector<8x128xf32>
    tpu.vector_store %arg6[%c0_62, %c0_63], %149 {strides = array<i32>} : memref<8x128xf32, #tpu.memory_space<vmem>>, vector<8x128xf32>,
    %c0_64 = arith.constant 0 : index
    %c0_65 = arith.constant 0 : index
    %155 = vector.load %arg7[%c0_64, %c0_65] : memref<8x128xf32, #tpu.memory_space<vmem>>, vector<8x128xf32>
    tpu.vector_store %arg7[%c0_64, %c0_65], %147 {strides = array<i32>} : memref<8x128xf32, #tpu.memory_space<vmem>>, vector<8x128xf32>,
    %c4_i32 = arith.constant 4 : i32
    return
  }
  func.func @transform_0(%arg0: i32) -> (i32, i32, i32) {
    %c0_i32 = arith.constant 0 : i32
    %c0_i32_0 = arith.constant 0 : i32
    %c0_i32_1 = arith.constant 0 : i32
    return %arg0, %c0_i32, %c0_i32_0 : i32, i32, i32
  }
  func.func @transform_1(%arg0: i32) -> (i32, i32) {
    %c0_i32 = arith.constant 0 : i32
    %c0_i32_0 = arith.constant 0 : i32
    %c0_i32_1 = arith.constant 0 : i32
    return %c0_i32, %c0_i32_0 : i32, i32
  }
  func.func @transform_2(%arg0: i32) -> (i32, i32) {
    %c0_i32 = arith.constant 0 : i32
    %c0_i32_0 = arith.constant 0 : i32
    %c0_i32_1 = arith.constant 0 : i32
    return %c0_i32, %c0_i32_0 : i32, i32
  }
  func.func @transform_3(%arg0: i32) -> (i32, i32) {
    %c0_i32 = arith.constant 0 : i32
    %c0_i32_0 = arith.constant 0 : i32
    %c0_i32_1 = arith.constant 0 : i32
    return %c0_i32, %c0_i32_0 : i32, i32
  }
  func.func @transform_4(%arg0: i32) -> (i32, i32, i32) {
    %c0_i32 = arith.constant 0 : i32
    %c0_i32_0 = arith.constant 0 : i32
    %c0_i32_1 = arith.constant 0 : i32
    return %arg0, %c0_i32, %c0_i32_0 : i32, i32, i32
  }
}

</mosaic_0001>

<bundles_post_ra>
// kernel: tpu_custom_call.1
= control target key start
LH: loop header
LB: loop body
LE: loop exit
PB: predicated region body
PF: predicated region fallthrough
CT: control target
= control target key end

     0   :  { %9 = vsyncpa [#allocation5], 0  ;;  %s12023_s0 = inlined_call_operand.hbm [shape: f32[8,8,512], index: 0, kind: input, shape index: {}]   ;;  %s12024_s1 = inlined_call_operand.hbm [shape: f32[8,128], index: 1, kind: input, shape index: {}]   ;;  %s12025_s2 = inlined_call_operand.hbm [shape: f32[8,128], index: 2, kind: input, shape index: {}]   ;;  %s12026_s3 = inlined_call_operand.hbm [shape: f32[128,512], index: 3, kind: input, shape index: {}]   ;;  %s12027_s4 = inlined_call_operand.hbm [shape: f32[8,8,128], index: 4, kind: output, shape index: {}]  }
   0x1   :  { %11 = vsyncpa [#allocation5 + $0x1], 0 }
   0x2   :  { %12 = vsyncpa [#allocation8], 0 }
   0x3   :  { %13 = vsyncpa [#allocation11], 0 }
   0x4   :  { %14 = vsyncpa [#allocation6], 0 }
   0x5   :  { %16 = vsyncpa [#allocation6 + $0x1], 0  ;;  %s9480_s15 = smov 0   ;;  %s9482_s16 = smov 0  }
   0x6   :  { %s9484_s17 = smov 0   ;;  %s9486_s18 = smov 0  }
   0x7 LB: > { %s9501_s19 = sadd.s32 4294967295, %s9443_s18   ;;  %s7441_s20 = sadd.s32 4294967294, %s9443_s18   ;;  %s9443_s18 = sphi %s9486_s18, %s13183_s18   ;;  %s9439_s17 = sphi %s9484_s17, %s13182_s17   ;;  %s9435_s16 = sphi %s9482_s16, %s13181_s16   ;;  %s9431_s15 = sphi %s9480_s15, %s13180_s15  }
   0x8   : > { %p42_p0 = scmp.ne.s32.totalorder %s9435_s16, %s9431_s15  ;;  %p12028_p1 = scmp.eq.s32.totalorder %s9501_s19, 0 }
   0x9   : > { %p135_p3 = scmp.eq.s32.totalorder %s7441_s20, 1  ;;  %p7442_p5 = scmp.ge.s32.totalorder %s9443_s18, 1 }
   0xa   : > { %p9510_p4 = por %p12028_p1, %p42_p0  ;;  %p142_p7 = scmp.lt.s32.totalorder %s9443_s18, 3 }
   0xb   : > { %p9515_p6 = por %p135_p3, %p42_p0  ;;  %s9445_s24 = smov [#allocation7]  }
   0xc   : > { %s12463_s21 = scalar_select %p9510_p4, 1, 0 }
   0xd   : > { %s12464_s22 = scalar_select %p9515_p6, 1, 0 }
   0xe   : > { %p9521_p9 = pnand %p7442_p5, %p142_p7  ;;  %s155_s25 = sshll.u32 %s9445_s24, 4  ;;  %s156_s25 = int_to_ptr.vmem [resolvable:$true] %s155_s25 }
   0xf   : > { %s9446_s26 = smov [#allocation9]   ;;  %s9447_s29 = smov [#allocation10]  }
  0x10   : > { %s12465_s23 = scalar_select %p9521_p9, 1, 0 }
  0x11   : > { %p9125_p11 = pneg %p9521_p9  ;;  %s166_s27 = sshll.u32 %s9446_s26, 4  ;;  %s9534_s27 = int_to_ptr.vmem [resolvable:$true] %s166_s27 }
  0x12   : > { %s176_s30 = sshll.u32 %s9447_s29, 4  ;;  %s9255_s7 = scalar_lea.hbm %s12024_s1, 128  ;;  %s9536_s30 = int_to_ptr.vmem [resolvable:$true] %s176_s30 }
  0x13   : > { %p9530_p12 = pnand %p9125_p11, %p12028_p1  ;;  %p9256_p13 = scmp.ne.s32.totalorder %s12024_s1, %s9255_s7 }
  0x14   : > { %p9262_p7 = scmp.lt.u32.totalorder %s9255_s7, %s12024_s1 }
  0x15   : > { %p9546_p0 = pneg %p9530_p12 }
  0x17   : > { %p9258_p3 = pnand %p9546_p0, %p9256_p13 }
  0x19   : > { %p9259_p5 = pneg %p9258_p3 }
  0x1b   : > { %p9264_p11 = pnand %p9262_p7, %p9259_p5 }
  0x1d   : > { %9267 = shalt.err (!%p9264_p11)
}
  0x1e   : > { %s9268_s13 = scalar_lea.vmem %s156_s25, 128  ;;  %p9276_p2 = scmp.lt.s32.totalorder %s156_s25, %s156_s25 }
  0x1f   : > { %p9269_p10 = scmp.ne.s32.totalorder %s156_s25, %s9268_s13  ;;  %p9277_p6 = scmp.lt.s32.totalorder %s9268_s13, %s9268_s13 }
  0x21   : > { %p9271_p8 = pnand %p9269_p10, %p9546_p0  ;;  %p9278_p4 = por %p9277_p6, %p9276_p2 }
  0x23   : > { %p9272_p1 = pneg %p9271_p8 }
  0x25   : > { %p9279_p9 = pnand %p9278_p4, %p9272_p1 }
  0x27   : > { %9282 = shalt.err (!%p9279_p9)
}
  0x28   : > { %9128 = dma.hbm_to_vmem [thread:$0]  (!%p9530_p12), %s12024_s1, 128, %s156_s25, [#allocation8]  }
  0x29   : > { %s9283_s29 = scalar_lea.hbm %s12025_s2, 128 }
  0x2a   : > { %p9284_p8 = scmp.ne.s32.totalorder %s12025_s2, %s9283_s29  ;;  %p9290_p1 = scmp.lt.u32.totalorder %s9283_s29, %s12025_s2 }
  0x2c   : > { %p9286_p10 = pnand %p9284_p8, %p9546_p0 }
  0x2e   : > { %p9287_p2 = pneg %p9286_p10 }
  0x30   : > { %p9292_p4 = pnand %p9290_p1, %p9287_p2 }
  0x32   : > { %9295 = shalt.err (!%p9292_p4)
}
  0x33   : > { %s9296_s25 = scalar_lea.vmem %s9534_s27, 128  ;;  %p9304_p3 = scmp.lt.s32.totalorder %s9534_s27, %s9534_s27 }
  0x34   : > { %p9297_p6 = scmp.ne.s32.totalorder %s9534_s27, %s9296_s25  ;;  %p9305_p5 = scmp.lt.s32.totalorder %s9296_s25, %s9296_s25 }
  0x36   : > { %p9299_p9 = pnand %p9297_p6, %p9546_p0  ;;  %p9306_p7 = por %p9305_p5, %p9304_p3 }
  0x38   : > { %p9300_p13 = pneg %p9299_p9 }
  0x3a   : > { %p9307_p11 = pnand %p9306_p7, %p9300_p13 }
  0x3c   : > { %9310 = shalt.err (!%p9307_p11)
}
  0x3d   : > { %9131 = dma.hbm_to_vmem [thread:$0]  (!%p9530_p12), %s12025_s2, 128, %s9534_s27, [#allocation8]  }
  0x3e   : > { %s9311_s14 = scalar_lea.hbm %s12026_s3, 8192 }
  0x3f   : > { %p9312_p8 = scmp.ne.s32.totalorder %s12026_s3, %s9311_s14  ;;  %p9318_p1 = scmp.lt.u32.totalorder %s9311_s14, %s12026_s3 }
  0x41   : > { %p9314_p10 = pnand %p9312_p8, %p9546_p0 }
  0x43   : > { %p9315_p2 = pneg %p9314_p10 }
  0x45   : > { %p9320_p4 = pnand %p9318_p1, %p9315_p2 }
  0x47   : > { %9323 = shalt.err (!%p9320_p4)
}
  0x48   : > { %s9324_s27 = scalar_lea.vmem %s9536_s30, 8192  ;;  %p9332_p3 = scmp.lt.s32.totalorder %s9536_s30, %s9536_s30 }
  0x49   : > { %p9325_p6 = scmp.ne.s32.totalorder %s9536_s30, %s9324_s27  ;;  %p9333_p5 = scmp.lt.s32.totalorder %s9324_s27, %s9324_s27 }
  0x4b   : > { %p9327_p9 = pnand %p9325_p6, %p9546_p0  ;;  %p9334_p7 = por %p9333_p5, %p9332_p3 }
  0x4d   : > { %p9328_p13 = pneg %p9327_p9 }
  0x4f   : > { %p9335_p11 = pnand %p9334_p7, %p9328_p13 }
  0x51   : > { %9338 = shalt.err (!%p9335_p11)
}
  0x52   : > { %s9448_s5 = smov 512   ;;  %s9449_s10 = smov 32  }
  0x53   : > { %9134 = dma.hbm_to_vmem [thread:$0]  (!%p9530_p12), %s12026_s3, 8192, %s9536_s30, [#allocation11], %s9448_s5, %s9448_s5, %s9449_s10  }
  0x54   : > { %s9612_s8 = sadd.s32 1, %s9443_s18   ;;  %s29_s9 = sadd.s32 1, %s9439_s17 }
  0x55   : > { %s26_s25 = ssub.s32 %s9443_s18, %s9612_s8  ;;  %p36_p8 = scmp.ne.s32.totalorder %s9439_s17, %s9435_s16 }
  0x56   : > { %p27_p0 = scmp.eq.s32.totalorder %s26_s25, 0  ;;  %p37_p10 = scmp.eq.s32.totalorder %s9443_s18, 0 }
  0x57   : > { %p9146_p2 = scmp.lt.s32.totalorder %s9443_s18, 2  ;;  %p12468_p4 = scmp.eq.s32.totalorder %s9501_s19, 1 }
  0x58   : > { %s9622_s11 = scalar_select %p27_p0, %s9439_s17, %s29_s9  }
  0x59   : > { %p38_p1 = por %p37_p10, %p36_p8  ;;  %p9626_p6 = por %p12468_p4, %p36_p8 }
  0x5a   : > { %s190_s12 = sand.u32 1, %s9439_s17   ;;  %s7491_s13 = sshll.u32 %s9443_s18, 11 }
  0x5b   : > { %s7447_s30 = sshll.u32 %s190_s12, 7  ;;  %s9635_s24 = scalar_lea.hbm %s12023_s0, %s7491_s13 }
  0x5c   : > { %s194_s26 = scalar_lea.vmem [#allocation4], %s7447_s30  ;;  %p9637_p12 = pnand %p9146_p2, %p38_p1 }
  0x5d   : > { %s202_s29 = sshll.u32 %s194_s26, 4  ;;  %s9643_s6 = scalar_lea.sflag [#allocation5], %s190_s12  ;;  %s9641_s29 = int_to_ptr.vmem [resolvable:$true] %s202_s29 }
  0x5e   : > { %s9339_s7 = scalar_lea.hbm %s9635_s24, 2048  ;;  %p9341_p13 = pneg %p9637_p12 }
  0x5f   : > { %p9340_p9 = scmp.ne.s32.totalorder %s9635_s24, %s9339_s7  ;;  %s9344_s13 = scalar_lea.hbm %s12023_s0, 4096 }
  0x60   : > { %p9345_p7 = scmp.lt.u32.totalorder %s9635_s24, %s12023_s0  ;;  %p9346_p11 = scmp.lt.u32.totalorder %s9344_s13, %s9339_s7 }
  0x61   : > { %p9342_p3 = pnand %p9341_p13, %p9340_p9  ;;  %p9348_p8 = scmp.lt.u32.totalorder %s9339_s7, %s9635_s24 }
  0x62   : > { %p9347_p0 = por %p9346_p11, %p9345_p7 }
  0x63   : > { %p9343_p5 = pneg %p9342_p3 }
  0x64   : > { %p9349_p10 = por %p9348_p8, %p9347_p0 }
  0x66   : > { %p9350_p2 = pnand %p9349_p10, %p9343_p5 }
  0x68   : > { %9353 = shalt.err (!%p9350_p2)
}
  0x69   : > { %s9354_s12 = scalar_lea.vmem %s9641_s29, 2048  ;;  %s9450_s20 = smov [#allocation4]  }
  0x6a   : > { %p9355_p1 = scmp.ne.s32.totalorder %s9641_s29, %s9354_s12  ;;  %s9359_s26 = sshll.u32 %s9450_s20, 4  ;;  %s9360_s26 = int_to_ptr.vmem [resolvable:$false] %s9359_s26 }
  0x6b   : > { %s9361_s25 = scalar_lea.vmem %s9360_s26, 4096  ;;  %p9362_p3 = scmp.lt.s32.totalorder %s9641_s29, %s9360_s26 }
  0x6c   : > { %p9357_p4 = pnand %p9355_p1, %p9341_p13  ;;  %p9363_p7 = scmp.lt.s32.totalorder %s9361_s25, %s9354_s12 }
  0x6e   : > { %p9358_p9 = pneg %p9357_p4  ;;  %p9364_p11 = por %p9363_p7, %p9362_p3 }
  0x70   : > { %p9365_p0 = pnand %p9364_p11, %p9358_p9 }
  0x72   : > { %9368 = shalt.err (!%p9365_p0)
}
  0x73   : > { %9138 = dma.hbm_to_vmem [thread:$0]  (!%p9637_p12), %s9635_s24, 2048, %s9641_s29, %s9643_s6, %s9448_s5, %s9448_s5, %s9449_s10  }
  0x74   : > { %p12471_p13 = scmp.ne.s32.totalorder %s12465_s23, 0 }
  0x76   : > { %214 = sbr.rel (%p12471_p13) target bundleno = 1966 (0x7ae), region = 36 }
  0x7d   : > { %s9677_s7 = sand.u32 1, %s9435_s16   ;;  %p12472_p5 = scmp.ne.s32.totalorder %s12463_s21, 0 }
  0x7e   : > { %s7452_s9 = sshll.u32 %s9677_s7, 7  ;;  %s217_s13 = scalar_lea.sflag [#allocation5], %s9677_s7 }
  0x7f   : > { %s9681_s30 = scalar_lea.vmem [#allocation4], %s7452_s9 }
  0x80   : > { %9414 = dma.done.wait (%p12472_p5), %s217_s13, 2048  }
  0x81   : > { %9416 = vsyncadd (%p12472_p5), %s217_s13, 4294965248  ;;  %p12473_p12 = scmp.eq.s32.totalorder %s9501_s19, 0 }
  0x83   : > { %9418 = dma.done.wait (%p12473_p12), [#allocation8], 256   ;;  %p12474_p8 = pmov %p12473_p12 }
  0x85   : > { %9420 = vsyncadd (%p12474_p8), [#allocation8], 4294967040  ;;  %p12475_p10 = pmov %p12474_p8 }
  0x86   : > { %p12476_p2 = pmov %p12474_p8 }
  0x87   : > { %9422 = dma.done.wait (%p12475_p10), [#allocation11], 8192  }
  0x88   : > { %9424 = vsyncadd (%p12476_p2), [#allocation11], 4294959104  ;;  %s7456_s23 = sshll.u32 %s9677_s7, 5  ;;  %p12477_p1 = scmp.ne.s32.totalorder %s9501_s19, 0 }
  0x89   : > { %s9696_s5 = scalar_lea.vmem [#allocation12], %s7456_s23  ;;  %v263_v0 = vld [vmem:[#allocation7] sm:$0xff] (!%p12477_p1)  ;;  %v265_v1 = vld [vmem:[#allocation9] sm:$0xff] (!%p12477_p1) }
  0x8a   : > { %262 = sbr.rel (%p12477_p1) target bundleno = 145 (0x91), region = 56  ;;  %264 = vst [vmem:[#allocation2] sm:$0xff] (!%p12477_p1), %v263_v0  ;;  %266 = vst [vmem:[#allocation3] sm:$0xff] (!%p12477_p1), %v265_v1 }
  0x91 PF: > { %v9700_v2 = vld [vmem:[#allocation10 + $0x8] sm:$0xff]  ;;  %v9704_v4 = vld [vmem:[#allocation10 + $0x18] sm:$0xff]  ;;  %v9711_v9 = vld [vmem:[#allocation10] sm:$0xff]  ;;  %v12034_v11 = vmov 0.0   ;;  %s7492_s21 = sshll.u32 %s9501_s19, 9  ;;  %s7339_s10 = sshll.u32 %s9696_s5, 4  ;;  %s11978_s10 = int_to_ptr.vmem [resolvable:$true] %s7339_s10 }
  0x92   : > { %v9702_v3 = vld [vmem:[#allocation10 + $0x28] sm:$0xff]  ;;  %v12058_v5 = vand.u32 4294901760, %v9700_v2  ;;  %v9708_v7 = vld [vmem:[#allocation10 + $0x38] sm:$0xff]  ;;  %v12054_v8 = vand.u32 4294901760, %v9704_v4  ;;  %v9713_v10 = vld [vmem:[#allocation10 + $0x20] sm:$0xff]  ;;  %433 = vmatprep.mubr.f32.mxu0 %v12034_v11  ;;  %1288 = vmatprep.mubr.f32.mxu1 %v12034_v11  ;;  %v12052_v13 = vand.u32 4294901760, %v9711_v9  ;;  %s11976_s27 = scalar_lea.hbm %s12027_s4, %s7492_s21 }
  0x93   : > { %v12057_v6 = vand.u32 4294901760, %v9702_v3  ;;  %v12053_v12 = vand.u32 4294901760, %v9708_v7  ;;  %v12051_v14 = vand.u32 4294901760, %v9713_v10  ;;  %v9720_v15 = vld [vmem:[#allocation10 + $0x10] sm:$0xff]  ;;  %v9724_v17 = vld [vmem:[#allocation10 + $0x48] sm:$0xff]  ;;  %v9737_v23 = vld [vmem:[#allocation10 + $0x58] sm:$0xff] }
  0x94   : > { %v9722_v16 = vld [vmem:[#allocation10 + $0x30] sm:$0xff]  ;;  %v12050_v19 = vand.u32 4294901760, %v9720_v15  ;;  %v9734_v21 = vld [vmem:[#allocation10 + $0x68] sm:$0xff]  ;;  %v12046_v22 = vand.u32 4294901760, %v9724_v17  ;;  %v9739_v24 = vld [vmem:[#allocation10 + $0x78] sm:$0xff]  ;;  %v12044_v28 = vand.u32 4294901760, %v9737_v23 }
  0x95   : > { %v9730_v18 = vpack.c.bf16 %v12057_v6, %v12058_v5  ;;  %v12049_v20 = vand.u32 4294901760, %v9722_v16  ;;  %v9745_v25 = vpack.c.bf16 %v12053_v12, %v12054_v8  ;;  %v9751_v26 = vpack.c.bf16 %v12051_v14, %v12052_v13  ;;  %v9755_v29 = vld [vmem:[#allocation10 + $0x40] sm:$0xff]  ;;  %v9759_v31 = vld [vmem:[#allocation10 + $0x50] sm:$0xff]  ;;  %v9773_v37 = vld [vmem:[#allocation10 + $0x88] sm:$0xff]  ;;  %s7326_s6 = scalar_lea.sflag [#allocation6], %s9677_s7  ;;  %s9369_s14 = scalar_lea.vmem %s11978_s10, 512 }
  0x96   : > { %v12045_v27 = vand.u32 4294901760, %v9734_v21  ;;  %v9757_v30 = vld [vmem:[#allocation10 + $0x60] sm:$0xff]  ;;  %v12039_v33 = vand.u32 4294901760, %v9739_v24  ;;  %v12038_v34 = vand.u32 4294901760, %v9755_v29  ;;  %v9771_v36 = vld [vmem:[#allocation10 + $0x70] sm:$0xff]  ;;  %v9775_v38 = vld [vmem:[#allocation10 + $0xa8] sm:$0xff]  ;;  %p9370_p4 = scmp.ne.s32.totalorder %s11978_s10, %s9369_s14 }
  0x97   : > { %12478 = vst [vmem:[#allocation17_spill] sm:$0xff] %v9730_v18  ;;  %12479 = vst [vmem:[#allocation18_spill] sm:$0xff] %v9745_v25  ;;  %7494 = vmatprep.subr.bf16.mxu0 %v9730_v18  ;;  %v9766_v32 = vpack.c.bf16 %v12049_v20, %v12050_v19  ;;  %v12037_v35 = vand.u32 4294901760, %v9757_v30  ;;  %7686 = vmatprep.subr.bf16.mxu1 %v9745_v25  ;;  %v12036_v40 = vand.u32 4294901760, %v9759_v31  ;;  %v12031_v41 = vand.u32 4294901760, %v9771_v36  ;;  %v9788_v43 = vld [vmem:[#allocation10 + $0x98] sm:$0xff] }
  0x98   : > { %12480 = vst [vmem:[#allocation19_spill] sm:$0xff] %v9751_v26  ;;  %7496 = vmatpush1.bf16.msra.mxu0 %v9751_v26  ;;  %v9783_v39 = vpack.c.bf16 %v12045_v27, %v12046_v22  ;;  %v12033_v42 = vand.u32 4294901760, %v9773_v37  ;;  %v9790_v44 = vld [vmem:[#allocation10 + $0xb8] sm:$0xff]  ;;  %v9792_v45 = vld [vmem:[#allocation10 + $0x80] sm:$0xff]  ;;  %v9799_v46 = vpack.c.bf16 %v12039_v33, %v12044_v28  ;;  %v12032_v48 = vand.u32 4294901760, %v9775_v38  ;;  %v9811_v51 = vld [vmem:[#allocation10 + $0x90] sm:$0xff]  ;;  %p9371_p9 = pnand %p9370_p4, %p9626_p6 }
  0x99   : > { %12481 = vst [vmem:[#allocation20_spill] sm:$0xff] %v9766_v32  ;;  %7688 = vmatpush1.bf16.msra.mxu1 %v9766_v32  ;;  %v9805_v47 = vpack.c.bf16 %v12037_v35, %v12038_v34  ;;  %v12043_v49 = vand.u32 4294901760, %v9788_v43  ;;  %v9809_v50 = vld [vmem:[#allocation10 + $0xa0] sm:$0xff]  ;;  %v9813_v52 = vld [vmem:[#allocation10 + $0xb0] sm:$0xff]  ;;  %v9820_v53 = vpack.c.bf16 %v12031_v41, %v12036_v40  ;;  %v12042_v54 = vand.u32 4294901760, %v9790_v44  ;;  %v9825_v57 = vld [vmem:[#allocation10 + $0xc8] sm:$0xff] }
  0x9a   : > { %12482 = vst [vmem:[#allocation21_spill] sm:$0xff] %v9783_v39  ;;  %12483 = vst [vmem:[#allocation22_spill] sm:$0xff] %v9799_v46  ;;  %7498 = vmatprep.subr.bf16.mxu0 %v9783_v39  ;;  %v12041_v55 = vand.u32 4294901760, %v9792_v45  ;;  %v12040_v56 = vand.u32 4294901760, %v9809_v50  ;;  %v9827_v58 = vld [vmem:[#allocation10 + $0xe8] sm:$0xff]  ;;  %v9829_v59 = vld [vmem:[#allocation10 + $0xd8] sm:$0xff]  ;;  %7690 = vmatprep.subr.bf16.mxu1 %v9799_v46  ;;  %v9836_v60 = vpack.c.bf16 %v12032_v48, %v12033_v42  ;;  %p9372_p3 = pneg %p9371_p9 }
  0x9b   : > { %12484 = vst [vmem:[#allocation23_spill] sm:$0xff] %v9805_v47  ;;  %12485 = vst [vmem:[#allocation24_spill] sm:$0xff] %v9820_v53  ;;  %v12048_v61 = vand.u32 4294901760, %v9811_v51  ;;  %v12047_v62 = vand.u32 4294901760, %v9813_v52  ;;  %v12056_v63 = vand.u32 4294901760, %v9825_v57  ;;  %v9841_v0 = vld [vmem:[#allocation10 + $0xf8] sm:$0xff]  ;;  %v9852_v48 = vpack.c.bf16 %v12042_v54, %v12043_v49 }
  0x9c   : > { %12486 = vst [vmem:[#allocation25_spill] sm:$0xff] %v9836_v60  ;;  %v9843_v1 = vld [vmem:[#allocation10 + $0xc0] sm:$0xff]  ;;  %7500 = vmatpush1.bf16.msra.mxu0 %v9805_v47  ;;  %v9858_v42 = vpack.c.bf16 %v12040_v56, %v12041_v55  ;;  %v12055_v11 = vand.u32 4294901760, %v9827_v58  ;;  %v12060_v40 = vand.u32 4294901760, %v9829_v59  ;;  %v9862_v35 = vld [vmem:[#allocation10 + $0xd0] sm:$0xff]  ;;  %v9866_v33 = vld [vmem:[#allocation10 + $0x108] sm:$0xff] }
  0x9d   : > { %v9845_v41 = vld [vmem:[#allocation10 + $0xe0] sm:$0xff]  ;;  %12487 = vst [vmem:[#allocation26_spill] sm:$0xff] %v9852_v48  ;;  %v9864_v34 = vld [vmem:[#allocation10 + $0xf0] sm:$0xff]  ;;  %7692 = vmatpush1.bf16.msra.mxu1 %v9820_v53  ;;  %7502 = vmatprep.subr.bf16.mxu0 %v9836_v60  ;;  %v9874_v56 = vpack.c.bf16 %v12047_v62, %v12048_v61  ;;  %v12059_v55 = vand.u32 4294901760, %v9841_v0  ;;  %v12062_v54 = vand.u32 4294901760, %v9843_v1  ;;  %v9879_v28 = vld [vmem:[#allocation10 + $0x128] sm:$0xff] }
  0x9e   : > { %12488 = vst [vmem:[#allocation27_spill] sm:$0xff] %v9858_v42  ;;  %v12061_v49 = vand.u32 4294901760, %v9845_v41  ;;  %v9881_v27 = vld [vmem:[#allocation10 + $0x118] sm:$0xff]  ;;  %7694 = vmatprep.subr.bf16.mxu1 %v9852_v48  ;;  %v9890_v62 = vpack.c.bf16 %v12055_v11, %v12056_v63  ;;  %v12069_v61 = vand.u32 4294901760, %v9862_v35  ;;  %v9895_v14 = vld [vmem:[#allocation10 + $0x100] sm:$0xff]  ;;  %v9899_v12 = vld [vmem:[#allocation10 + $0x110] sm:$0xff] }
  0x9f   : > { %12489 = vst [vmem:[#allocation28_spill] sm:$0xff] %v9874_v56  ;;  %12490 = vst [vmem:[#allocation29_spill] sm:$0xff] %v9881_v27  ;;  %v9883_v22 = vld [vmem:[#allocation10 + $0x138] sm:$0xff]  ;;  %v9897_v13 = vld [vmem:[#allocation10 + $0x120] sm:$0xff]  ;;  %v9905_v8 = vpack.c.bf16 %v12059_v55, %v12060_v40  ;;  %v12501_v55 = vand.u32 4294901760, %v9864_v34  ;;  %v12519_v26 = vand.u32 4294901760, %v9899_v12 }
  0xa0   : > { %12491 = vst [vmem:[#allocation30_spill] sm:$0xff] %v9883_v22  ;;  %12492 = vst [vmem:[#allocation31_spill] sm:$0xff] %v9890_v62  ;;  %v9911_v11 = vpack.c.bf16 %v12061_v49, %v12062_v54  ;;  %v9915_v5 = vld [vmem:[#allocation10 + $0x130] sm:$0xff]  ;;  %v9917_v19 = vld [vmem:[#allocation10 + $0x148] sm:$0xff]  ;;  %7504 = vmatpush1.bf16.msra.mxu0 %v9858_v42  ;;  %v12506_v42 = vand.u32 4294901760, %v9866_v33  ;;  %v12516_v6 = vand.u32 4294901760, %v9897_v13 }
  0xa1   : > { %12493 = vst [vmem:[#allocation32_spill] sm:$0xff] %v9895_v14  ;;  %12494 = vst [vmem:[#allocation33_spill] sm:$0xff] %v9897_v13  ;;  %v9919_v20 = vld [vmem:[#allocation10 + $0x168] sm:$0xff]  ;;  %v9926_v40 = vpack.c.bf16 %v12501_v55, %v12069_v61  ;;  %v9931_v63 = vld [vmem:[#allocation10 + $0x158] sm:$0xff]  ;;  %7696 = vmatpush1.bf16.msra.mxu1 %v9874_v56  ;;  %7506 = vmatprep.subr.bf16.mxu0 %v9890_v62  ;;  %v12507_v55 = vand.u32 4294901760, %v9879_v28  ;;  %v12512_v56 = vand.u32 4294901760, %v9881_v27 }
  0xa2   : > { %12495 = vst [vmem:[#allocation34_spill] sm:$0xff] %v9899_v12  ;;  %12496 = vst [vmem:[#allocation35_spill] sm:$0xff] %v9905_v8  ;;  %v9933_v48 = vld [vmem:[#allocation10 + $0x178] sm:$0xff]  ;;  %v9935_v53 = vld [vmem:[#allocation10 + $0x140] sm:$0xff]  ;;  %7698 = vmatprep.subr.bf16.mxu1 %v9905_v8  ;;  %v12513_v62 = vand.u32 4294901760, %v9883_v22  ;;  %v12524_v12 = vand.u32 4294901760, %v9917_v19 }
  0xa3   : > { %12497 = vst [vmem:[#allocation36_spill] sm:$0xff] %v9911_v11  ;;  %12498 = vst [vmem:[#allocation37_spill] sm:$0xff] %v9915_v5  ;;  %v9943_v61 = vpack.c.bf16 %v12507_v55, %v12506_v42  ;;  %v9948_v60 = vld [vmem:[#allocation10 + $0x160] sm:$0xff]  ;;  %v9950_v46 = vld [vmem:[#allocation10 + $0x150] sm:$0xff]  ;;  %v12515_v55 = vand.u32 4294901760, %v9895_v14  ;;  %s9452_s19 = smov [#allocation12]  }
  0xa4   : > { %12499 = vst [vmem:[#allocation38_spill] sm:$0xff] %v9917_v19  ;;  %12500 = vst [vmem:[#allocation39_spill] sm:$0xff] %v9919_v20  ;;  %v9952_v47 = vld [vmem:[#allocation10 + $0x170] sm:$0xff]  ;;  %v9959_v42 = vpack.c.bf16 %v12513_v62, %v12512_v56  ;;  %v9969_v39 = vld [vmem:[#allocation10 + $0x188] sm:$0xff]  ;;  %v12520_v56 = vand.u32 4294901760, %v9915_v5  ;;  %7508 = vmatpush1.bf16.msra.mxu0 %v9911_v11  ;;  %v12525_v5 = vand.u32 4294901760, %v9919_v20 }
  0xa5   : > { %12502 = vst [vmem:[#allocation40_spill] sm:$0xff] %v9926_v40  ;;  %12503 = vst [vmem:[#allocation41_spill] sm:$0xff] %v9931_v63  ;;  %v9965_v54 = vpack.c.bf16 %v12516_v6, %v12515_v55  ;;  %v9971_v25 = vld [vmem:[#allocation10 + $0x1a8] sm:$0xff]  ;;  %v9973_v8 = vld [vmem:[#allocation10 + $0x198] sm:$0xff]  ;;  %7700 = vmatpush1.bf16.msra.mxu1 %v9926_v40  ;;  %7510 = vmatprep.subr.bf16.mxu0 %v9943_v61  ;;  %v12528_v11 = vand.u32 4294901760, %v9931_v63  ;;  %v12531_v6 = vand.u32 4294901760, %v9935_v53 }
  0xa6   : > { %12504 = vst [vmem:[#allocation42_spill] sm:$0xff] %v9933_v48  ;;  %12505 = vst [vmem:[#allocation43_spill] sm:$0xff] %v9935_v53  ;;  %v9979_v62 = vpack.c.bf16 %v12520_v56, %v12519_v26  ;;  %v9984_v49 = vld [vmem:[#allocation10 + $0x1b8] sm:$0xff]  ;;  %v9986_v32 = vld [vmem:[#allocation10 + $0x180] sm:$0xff]  ;;  %v9995_v26 = vpack.c.bf16 %v12525_v5, %v12524_v12  ;;  %v12529_v5 = vand.u32 4294901760, %v9933_v48  ;;  %v12532_v55 = vand.u32 4294901760, %v9948_v60  ;;  %7702 = vmatprep.subr.bf16.mxu1 %v9959_v42 }
  0xa7   : > { %12508 = vst [vmem:[#allocation44_spill] sm:$0xff] %v9943_v61  ;;  %12509 = vst [vmem:[#allocation45_spill] sm:$0xff] %v9948_v60  ;;  %v9988_v13 = vld [vmem:[#allocation10 + $0x1a0] sm:$0xff]  ;;  %v10000_v18 = vld [vmem:[#allocation10 + $0x190] sm:$0xff]  ;;  %v12534_v61 = vand.u32 4294901760, %v9950_v46  ;;  %s9373_s12 = sshll.u32 %s9452_s19, 4  ;;  %s9374_s12 = int_to_ptr.vmem [resolvable:$false] %s9373_s12 }
  0xa8   : > { %12510 = vst [vmem:[#allocation46_spill] sm:$0xff] %v9950_v46  ;;  %12511 = vst [vmem:[#allocation47_spill] sm:$0xff] %v9952_v47  ;;  %v10002_v14 = vld [vmem:[#allocation10 + $0x1b0] sm:$0xff]  ;;  %v10004_v22 = vld [vmem:[#allocation10 + $0x1c8] sm:$0xff]  ;;  %v10012_v12 = vpack.c.bf16 %v12529_v5, %v12528_v11  ;;  %v10018_v56 = vpack.c.bf16 %v12532_v55, %v12531_v6  ;;  %v12535_v11 = vand.u32 4294901760, %v9952_v47  ;;  %v12539_v46 = vand.u32 4294901760, %v9971_v25  ;;  %7512 = vmatpush1.bf16.msra.mxu0 %v9965_v54  ;;  %p9376_p7 = scmp.lt.s32.totalorder %s11978_s10, %s9374_s12 }
  0xa9   : > { %12514 = vst [vmem:[#allocation48_spill] sm:$0xff] %v9959_v42  ;;  %12517 = vst [vmem:[#allocation49_spill] sm:$0xff] %v9965_v54  ;;  %v10022_v27 = vld [vmem:[#allocation10 + $0x1e8] sm:$0xff]  ;;  %v10024_v40 = vld [vmem:[#allocation10 + $0x1d8] sm:$0xff]  ;;  %v12538_v42 = vand.u32 4294901760, %v9969_v39  ;;  %v12541_v47 = vand.u32 4294901760, %v9973_v8  ;;  %7704 = vmatpush1.bf16.msra.mxu1 %v9979_v62  ;;  %7514 = vmatprep.subr.bf16.mxu0 %v9995_v26 }
  0xaa   : > { %12518 = vst [vmem:[#allocation50_spill] sm:$0xff] %v9969_v39  ;;  %12521 = vst [vmem:[#allocation51_spill] sm:$0xff] %v9979_v62  ;;  %v10031_v5 = vpack.c.bf16 %v12535_v11, %v12534_v61  ;;  %v10036_v20 = vld [vmem:[#allocation10 + $0x1f8] sm:$0xff]  ;;  %v10038_v19 = vld [vmem:[#allocation10 + $0x1c0] sm:$0xff]  ;;  %v12542_v39 = vand.u32 4294901760, %v9984_v49  ;;  %v12144_v6 = vand.u32 4294901760, %v10022_v27  ;;  %7706 = vmatprep.subr.bf16.mxu1 %v10012_v12 }
  0xab   : > { %12522 = vst [vmem:[#allocation52_spill] sm:$0xff] %v9984_v49  ;;  %12523 = vst [vmem:[#allocation53_spill] sm:$0xff] %v9988_v13  ;;  %v10040_v53 = vld [vmem:[#allocation10 + $0x1e0] sm:$0xff]  ;;  %v10046_v48 = vpack.c.bf16 %v12539_v46, %v12538_v42  ;;  %v10051_v60 = vld [vmem:[#allocation10 + $0x1d0] sm:$0xff]  ;;  %v12544_v46 = vand.u32 4294901760, %v9986_v32  ;;  %v12545_v42 = vand.u32 4294901760, %v9988_v13 }
  0xac   : > { %12526 = vst [vmem:[#allocation54_spill] sm:$0xff] %v9995_v26  ;;  %12527 = vst [vmem:[#allocation55_spill] sm:$0xff] %v10004_v22  ;;  %v10053_v55 = vld [vmem:[#allocation10 + $0x1f0] sm:$0xff]  ;;  %v10060_v63 = vpack.c.bf16 %v12542_v39, %v12541_v47  ;;  %v12547_v54 = vand.u32 4294901760, %v10000_v18  ;;  %v12548_v49 = vand.u32 4294901760, %v10002_v14  ;;  %v12550_v11 = vand.u32 4294901760, %v10004_v22  ;;  %7516 = vmatpush1.bf16.msra.mxu0 %v10018_v56 }
  0xad   : > { %12530 = vst [vmem:[#allocation56_spill] sm:$0xff] %v10012_v12  ;;  %12533 = vst [vmem:[#allocation57_spill] sm:$0xff] %v10018_v56  ;;  %v10066_v61 = vpack.c.bf16 %v12545_v42, %v12544_v46  ;;  %v331_v42 = vld [vmem:[#allocation2] sm:$0xff]  ;;  %v12553_v46 = vand.u32 4294901760, %v10024_v40  ;;  %v12554_v13 = vand.u32 4294901760, %v10036_v20  ;;  %v12556_v22 = vand.u32 4294901760, %v10038_v19  ;;  %7708 = vmatpush1.bf16.msra.mxu1 %v10031_v5  ;;  %7518 = vmatprep.subr.bf16.mxu0 %v10046_v48 }
  0xae   : > { %12536 = vst [vmem:[#allocation58_spill] sm:$0xff] %v10031_v5  ;;  %12537 = vst [vmem:[#allocation59_spill] sm:$0xff] %v10038_v19  ;;  %v10076_v39 = vpack.c.bf16 %v12548_v49, %v12547_v54  ;;  %v10086_v62 = vpack.c.bf16 %v12144_v6, %v12550_v11  ;;  %v12552_v54 = vand.u32 4294901760, %v9700_v2  ;;  %v12557_v11 = vand.u32 4294901760, %v10040_v53  ;;  %7710 = vmatprep.subr.bf16.mxu1 %v10060_v63  ;;  %s9375_s20 = scalar_lea.vmem %s9374_s12, 1024 }
  0xaf   : > { %12540 = vst [vmem:[#allocation60_spill] sm:$0xff] %v10046_v48  ;;  %12543 = vst [vmem:[#allocation61_spill] sm:$0xff] %v10060_v63  ;;  %v10099_v12 = vpack.c.bf16 %v12554_v13, %v12553_v46  ;;  %v12559_v26 = vand.u32 4294901760, %v9702_v3  ;;  %v12562_v13 = vand.u32 4294901760, %v10051_v60  ;;  %v12563_v46 = vand.u32 4294901760, %v10053_v55  ;;  %p9377_p11 = scmp.lt.s32.totalorder %s9375_s20, %s9369_s14 }
  0xb0   : > { %12546 = vst [vmem:[#allocation62_spill] sm:$0xff] %v10066_v61  ;;  %12549 = vst [vmem:[#allocation63_spill] sm:$0xff] %v10076_v39  ;;  %v10093_v47 = vsub.f32 %v9700_v2, %v12552_v54  ;;  %v10105_v6 = vpack.c.bf16 %v12557_v11, %v12556_v22  ;;  %v12560_v2 = vand.u32 4294901760, %v9704_v4  ;;  %v12565_v11 = vand.u32 4294901760, %v9708_v7  ;;  %7520 = vmatpush1.bf16.msra.mxu0 %v10066_v61 }
  0xb1   : > { %12551 = vst [vmem:[#allocation64_spill] sm:$0xff] %v10086_v62  ;;  %12555 = vst [vmem:[#allocation65_spill] sm:$0xff] %v10099_v12  ;;  %v10110_v49 = vsub.f32 %v9702_v3, %v12559_v26  ;;  %v10122_v19 = vpack.c.bf16 %v12563_v46, %v12562_v13  ;;  %v10130_v26 = vand.u32 4294901760, %v331_v42  ;;  %v12568_v13 = vand.u32 4294901760, %v9711_v9  ;;  %7712 = vmatpush1.bf16.msra.mxu1 %v10076_v39  ;;  %p9378_p0 = por %p9377_p11, %p9376_p7 }
  0xb2   : > { %12558 = vst [vmem:[#allocation66_spill] sm:$0xff] %v10105_v6  ;;  %v10115_v54 = vsub.f32 %v9704_v4, %v12560_v2  ;;  %v10128_v3 = vsub.f32 %v9708_v7, %v12565_v11  ;;  %v12569_v22 = vand.u32 4294901760, %v9713_v10  ;;  %v12570_v11 = vand.u32 4294901760, %v10093_v47  ;;  %7522 = vmatprep.subr.bf16.mxu0 %v10086_v62  ;;  %7714 = vmatprep.subr.bf16.mxu1 %v10099_v12 }
  0xb3   : > { %12564 = vst [vmem:[#allocation68_spill] sm:$0xff] %v10122_v19  ;;  %12567 = vst [vmem:[#allocation70_spill] sm:$0xff] %v10130_v26  ;;  %v10139_v46 = vsub.f32 %v9711_v9, %v12568_v13  ;;  %v10152_v2 = vsub.f32 %v331_v42, %v10130_v26  ;;  %v12572_v48 = vand.u32 4294901760, %v9720_v15  ;;  %v12573_v13 = vand.u32 4294901760, %v10110_v49  ;;  %p9379_p13 = pnand %p9378_p0, %p9372_p3 }
  0xb4   : > { %12561 = vst [vmem:[#allocation67_spill] sm:$0xff] %v10115_v54  ;;  %12566 = vst [vmem:[#allocation69_spill] sm:$0xff] %v10128_v3  ;;  %v10144_v7 = vsub.f32 %v9713_v10, %v12569_v22  ;;  %v448_v5 = vsub.f32 %v10093_v47, %v12570_v11  ;;  %v12574_v22 = vand.u32 4294901760, %v10115_v54  ;;  %v12575_v56 = vand.u32 4294901760, %v10128_v3  ;;  %7524 = vmatpush1.bf16.msra.mxu0 %v10105_v6 }
  0xb5   : > { %12571 = vst [vmem:[#allocation71_spill] sm:$0xff] %v10152_v2  ;;  %v10157_v9 = vsub.f32 %v9720_v15, %v12572_v48  ;;  %v460_v10 = vsub.f32 %v10110_v49, %v12573_v13  ;;  %v10172_v48 = vand.u32 4294901760, %v10152_v2  ;;  %v12577_v4 = vand.u32 4294901760, %v10139_v46  ;;  %7716 = vmatpush1.bf16.msra.mxu1 %v10122_v19 }
  0xb6   : > { %v1303_v63 = vsub.f32 %v10115_v54, %v12574_v22  ;;  %v449_v42 = vand.u32 4294901760, %v448_v5  ;;  %v1315_v15 = vsub.f32 %v10128_v3, %v12575_v56  ;;  %v12578_v5 = vand.u32 4294901760, %v10144_v7 }
  0xb7   : > { %12576 = vst [vmem:[#allocation72_spill] sm:$0xff] %v10172_v48  ;;  %v461_v22 = vand.u32 4294901760, %v460_v10  ;;  %v454_v61 = vsub.f32 %v10139_v46, %v12577_v4  ;;  %v437_v13 = vsub.f32 %v10152_v2, %v10172_v48  ;;  %v12579_v39 = vand.u32 4294901760, %v10157_v9 }
  0xb8   : > { %v1304_v11 = vand.u32 4294901760, %v1303_v63  ;;  %v466_v26 = vsub.f32 %v10144_v7, %v12578_v5  ;;  %v1316_v56 = vand.u32 4294901760, %v1315_v15  ;;  %v12580_v63 = vand.u32 4294901760, %v9722_v16 }
  0xb9   : > { %v1309_v62 = vsub.f32 %v10157_v9, %v12579_v39  ;;  %v10194_v4 = vpack.c.bf16 %v461_v22, %v449_v42  ;;  %v455_v3 = vand.u32 4294901760, %v454_v61  ;;  %v12582_v5 = vand.u32 4294901760, %v9724_v17 }
  0xba   : > { %v10192_v10 = vsub.f32 %v9722_v16, %v12580_v63  ;;  %v467_v54 = vand.u32 4294901760, %v466_v26  ;;  %v10202_v48 = vpack.c.bf16 %v1316_v56, %v1304_v11  ;;  %v438_v12 = vand.u32 4294901760, %v437_v13 }
  0xbb   : > { %12581 = vst [vmem:[#allocation73_spill] sm:$0xff] %v10194_v4  ;;  %v10199_v15 = vsub.f32 %v9724_v17, %v12582_v5  ;;  %v1310_v39 = vand.u32 4294901760, %v1309_v62  ;;  %7526 = vmatprep.subr.bf16.mxu0 %v10194_v4  ;;  %v12585_v26 = vand.u32 4294901760, %v9734_v21  ;;  %v12586_v11 = vand.u32 4294901760, %v9737_v23 }
  0xbc   : > { %12583 = vst [vmem:[#allocation74_spill] sm:$0xff] %v10202_v48  ;;  %v12173_v2 = vand.u32 4294901760, %v10192_v10  ;;  %v10207_v16 = vpack.c.bf16 %v467_v54, %v455_v3  ;;  %7718 = vmatprep.subr.bf16.mxu1 %v10202_v48  ;;  %v12588_v54 = vand.u32 4294901760, %v9739_v24  ;;  %v12590_v13 = vand.u32 4294901760, %v9755_v29  ;;  %439 = vmatmul.mubr.f32.vlgmr.msra.gmra.mrb[0].mxu0 %v438_v12 }
  0xbd   : > { %v12176_v61 = vand.u32 4294901760, %v10199_v15  ;;  %v10213_v17 = vsub.f32 %v9734_v21, %v12585_v26  ;;  %v10218_v42 = vsub.f32 %v9737_v23, %v12586_v11  ;;  %v12591_v22 = vand.u32 4294901760, %v9757_v30  ;;  %1294 = vmatmul.mubr.f32.vlgmr.msra.gmra.mrb[0].mxu1 %v438_v12 }
  0xbe   : > { %12584 = vst [vmem:[#allocation75_spill] sm:$0xff] %v10207_v16  ;;  %v1321_v62 = vsub.f32 %v10192_v10, %v12173_v2  ;;  %v10227_v3 = vsub.f32 %v9739_v24, %v12588_v54  ;;  %v10232_v21 = vsub.f32 %v9755_v29, %v12590_v13  ;;  %v12593_v5 = vand.u32 4294901760, %v9759_v31  ;;  %7528 = vmatpush1.bf16.msra.mxu0 %v10207_v16 }
  0xbf   : > { %12587 = vst [vmem:[#allocation76_spill] sm:$0xff] %v10218_v42  ;;  %v10237_v23 = vsub.f32 %v9757_v30, %v12591_v22  ;;  %v472_v56 = vsub.f32 %v10199_v15, %v12176_v61  ;;  %v12175_v63 = vand.u32 4294901760, %v10213_v17  ;;  %v12174_v24 = vand.u32 4294901760, %v10218_v42 }
  0xc0   : > { %12589 = vst [vmem:[#allocation77_spill] sm:$0xff] %v10227_v3  ;;  %v10247_v26 = vsub.f32 %v9759_v31, %v12593_v5  ;;  %v1322_v29 = vand.u32 4294901760, %v1321_v62  ;;  %v12179_v30 = vand.u32 4294901760, %v10227_v3  ;;  %v12182_v11 = vand.u32 4294901760, %v10232_v21 }
  0xc1   : > { %12592 = vst [vmem:[#allocation78_spill] sm:$0xff] %v10237_v23  ;;  %v12185_v54 = vand.u32 4294901760, %v10237_v23  ;;  %v473_v13 = vand.u32 4294901760, %v472_v56  ;;  %v484_v22 = vsub.f32 %v10213_v17, %v12175_v63  ;;  %v1327_v31 = vsub.f32 %v10218_v42, %v12174_v24 }
  0xc2   : > { %12594 = vst [vmem:[#allocation79_spill] sm:$0xff] %v10247_v26  ;;  %v12186_v5 = vand.u32 4294901760, %v10247_v26  ;;  %v12595_v2 = vmov 0.0   ;;  %v10262_v12 = vpack.c.bf16 %v1322_v29, %v1310_v39  ;;  %v1339_v62 = vsub.f32 %v10227_v3, %v12179_v30 }
  0xc3   : > { %669 = vmatprep.mubr.f32.mxu0 %v12595_v2  ;;  %1524 = vmatprep.mubr.f32.mxu1 %v12595_v2  ;;  %v478_v56 = vsub.f32 %v10232_v21, %v12182_v11  ;;  %v490_v24 = vsub.f32 %v10237_v23, %v12185_v54  ;;  %v485_v63 = vand.u32 4294901760, %v484_v22  ;;  %v1328_v61 = vand.u32 4294901760, %v1327_v31 }
  0xc4   : > { %12596 = vst [vmem:[#allocation80_spill] sm:$0xff] %v10262_v12  ;;  %v1333_v16 = vsub.f32 %v10247_v26, %v12186_v5  ;;  %v12597_v39 = vand.u32 4294901760, %v9771_v36  ;;  %7720 = vmatpush1.bf16.msra.mxu1 %v10262_v12  ;;  %v1340_v30 = vand.u32 4294901760, %v1339_v62  ;;  %v12599_v4 = vand.u32 4294901760, %v9773_v37 }
  0xc5   : > { %v479_v48 = vand.u32 4294901760, %v478_v56  ;;  %v491_v11 = vand.u32 4294901760, %v490_v24  ;;  %v10287_v22 = vpack.c.bf16 %v485_v63, %v473_v13  ;;  %v12601_v19 = vand.u32 4294901760, %v9775_v38 }
  0xc6   : > { %v10279_v29 = vsub.f32 %v9771_v36, %v12597_v39  ;;  %v10285_v54 = vsub.f32 %v9773_v37, %v12599_v4  ;;  %v1334_v31 = vand.u32 4294901760, %v1333_v16  ;;  %v10295_v39 = vpack.c.bf16 %v1340_v30, %v1328_v61 }
  0xc7   : > { %12600 = vst [vmem:[#allocation82_spill] sm:$0xff] %v10287_v22  ;;  %v10293_v36 = vsub.f32 %v9775_v38, %v12601_v19  ;;  %v10297_v62 = vpack.c.bf16 %v491_v11, %v479_v48  ;;  %v12604_v56 = vand.u32 4294901760, %v9788_v43  ;;  %7530 = vmatprep.subr.bf16.mxu0 %v10287_v22  ;;  %v12605_v38 = vand.u32 4294901760, %v9790_v44 }
  0xc8   : > { %12598 = vst [vmem:[#allocation81_spill] sm:$0xff] %v10279_v29  ;;  %v12189_v5 = vand.u32 4294901760, %v10279_v29  ;;  %12602 = vst [vmem:[#allocation83_spill] sm:$0xff] %v10295_v39  ;;  %v12190_v24 = vand.u32 4294901760, %v10285_v54  ;;  %v12606_v16 = vand.u32 4294901760, %v9792_v45  ;;  %7722 = vmatprep.subr.bf16.mxu1 %v10295_v39  ;;  %v12607_v30 = vand.u32 4294901760, %v9809_v50 }
  0xc9   : > { %12603 = vst [vmem:[#allocation84_spill] sm:$0xff] %v10297_v62  ;;  %v10303_v37 = vsub.f32 %v9788_v43, %v12604_v56  ;;  %v12191_v19 = vand.u32 4294901760, %v10293_v36  ;;  %v10313_v48 = vsub.f32 %v9790_v44, %v12605_v38  ;;  %7532 = vmatpush1.bf16.msra.mxu0 %v10297_v62  ;;  %v12608_v11 = vand.u32 4294901760, %v9811_v51 }
  0xca   : > { %v1345_v4 = vsub.f32 %v10279_v29, %v12189_v5  ;;  %v10318_v61 = vsub.f32 %v9792_v45, %v12606_v16  ;;  %v496_v43 = vsub.f32 %v10285_v54, %v12190_v24  ;;  %v10329_v44 = vsub.f32 %v9809_v50, %v12607_v30 }
  0xcb   : > { %v12192_v63 = vand.u32 4294901760, %v10303_v37  ;;  %v10334_v45 = vsub.f32 %v9811_v51, %v12608_v11  ;;  %v508_v56 = vsub.f32 %v10293_v36, %v12191_v19  ;;  %v12195_v38 = vand.u32 4294901760, %v10313_v48 }
  0xcc   : > { %v1346_v13 = vand.u32 4294901760, %v1345_v4  ;;  %v12196_v16 = vand.u32 4294901760, %v10318_v61  ;;  %v497_v5 = vand.u32 4294901760, %v496_v43  ;;  %v12199_v30 = vand.u32 4294901760, %v10329_v44 }
  0xcd   : > { %v1351_v50 = vsub.f32 %v10303_v37, %v12192_v63  ;;  %v12202_v24 = vand.u32 4294901760, %v10334_v45  ;;  %v509_v4 = vand.u32 4294901760, %v508_v56  ;;  %v1363_v11 = vsub.f32 %v10313_v48, %v12195_v38 }
  0xce   : > { %v10346_v51 = vpack.c.bf16 %v1346_v13, %v1334_v31  ;;  %v502_v19 = vsub.f32 %v10318_v61, %v12196_v16  ;;  %v514_v63 = vsub.f32 %v10329_v44, %v12199_v30  ;;  %v12610_v31 = vand.u32 4294901760, %v9813_v52 }
  0xcf   : > { %v1352_v43 = vand.u32 4294901760, %v1351_v50  ;;  %v1357_v62 = vsub.f32 %v10334_v45, %v12202_v24  ;;  %v10366_v56 = vpack.c.bf16 %v509_v4, %v497_v5  ;;  %v1364_v38 = vand.u32 4294901760, %v1363_v11 }
  0xd0   : > { %12609 = vst [vmem:[#allocation85_spill] sm:$0xff] %v10346_v51  ;;  %v10363_v13 = vsub.f32 %v9813_v52, %v12610_v31  ;;  %7724 = vmatpush1.bf16.msra.mxu1 %v10346_v51  ;;  %v503_v16 = vand.u32 4294901760, %v502_v19  ;;  %v12612_v50 = vand.u32 4294901760, %v9825_v57  ;;  %v515_v30 = vand.u32 4294901760, %v514_v63 }
  0xd1   : > { %12611 = vst [vmem:[#allocation86_spill] sm:$0xff] %v10366_v56  ;;  %v1358_v22 = vand.u32 4294901760, %v1357_v62  ;;  %v12613_v12 = vand.u32 4294901760, %v9827_v58  ;;  %7534 = vmatprep.subr.bf16.mxu0 %v10366_v56  ;;  %v10380_v5 = vpack.c.bf16 %v1364_v38, %v1352_v43  ;;  %v12615_v4 = vand.u32 4294901760, %v9829_v59  ;;  %v12643_v56 = vld [vmem:[#allocation34_spill] sm:$0xff] }
  0xd2   : > { %v10371_v39 = vsub.f32 %v9825_v57, %v12612_v50  ;;  %v12206_v24 = vand.u32 4294901760, %v10363_v13  ;;  %v12616_v62 = vand.u32 4294901760, %v9841_v0  ;;  %v10393_v11 = vpack.c.bf16 %v515_v30, %v503_v16 }
  0xd3   : > { %v10377_v52 = vsub.f32 %v9827_v58, %v12613_v12  ;;  %12614 = vst [vmem:[#allocation87_spill] sm:$0xff] %v10380_v5  ;;  %v10386_v57 = vsub.f32 %v9829_v59, %v12615_v4  ;;  %v12618_v38 = vand.u32 4294901760, %v9843_v1  ;;  %7726 = vmatprep.subr.bf16.mxu1 %v10380_v5  ;;  %v12619_v30 = vand.u32 4294901760, %v9845_v41 }
  0xd4   : > { %v12205_v19 = vand.u32 4294901760, %v10371_v39  ;;  %v10391_v63 = vsub.f32 %v9841_v0, %v12616_v62  ;;  %12617 = vst [vmem:[#allocation88_spill] sm:$0xff] %v10393_v11  ;;  %v1369_v58 = vsub.f32 %v10363_v13, %v12206_v24  ;;  %7536 = vmatpush1.bf16.msra.mxu0 %v10393_v11  ;;  %v12620_v62 = vand.u32 4294901760, %v9862_v35 }
  0xd5   : > { %v12207_v12 = vand.u32 4294901760, %v10377_v52  ;;  %v10402_v43 = vsub.f32 %v9843_v1, %v12618_v38  ;;  %v12210_v0 = vand.u32 4294901760, %v10386_v57  ;;  %v10413_v31 = vsub.f32 %v9845_v41, %v12619_v30 }
  0xd6   : > { %v520_v59 = vsub.f32 %v10371_v39, %v12205_v19  ;;  %v12213_v16 = vand.u32 4294901760, %v10391_v63  ;;  %v1370_v50 = vand.u32 4294901760, %v1369_v58  ;;  %v10423_v38 = vsub.f32 %v9862_v35, %v12620_v62 }
  0xd7   : > { %v532_v1 = vsub.f32 %v10377_v52, %v12207_v12  ;;  %v12215_v4 = vand.u32 4294901760, %v10402_v43  ;;  %v1375_v41 = vsub.f32 %v10386_v57, %v12210_v0  ;;  %v12214_v30 = vand.u32 4294901760, %v10413_v31 }
  0xd8   : > { %12621 = vst [vmem:[#allocation89_spill] sm:$0xff] %v10423_v38  ;;  %v521_v19 = vand.u32 4294901760, %v520_v59  ;;  %v1387_v58 = vsub.f32 %v10391_v63, %v12213_v16  ;;  %v10432_v24 = vpack.c.bf16 %v1370_v50, %v1358_v22  ;;  %v12216_v35 = vand.u32 4294901760, %v10423_v38 }
  0xd9   : > { %v533_v12 = vand.u32 4294901760, %v532_v1  ;;  %v526_v11 = vsub.f32 %v10402_v43, %v12215_v4  ;;  %v1376_v59 = vand.u32 4294901760, %v1375_v41  ;;  %v538_v0 = vsub.f32 %v10413_v31, %v12214_v30 }
  0xda   : > { %12622 = vst [vmem:[#allocation90_spill] sm:$0xff] %v10432_v24  ;;  %v1388_v62 = vand.u32 4294901760, %v1387_v58  ;;  %v12623_v5 = vand.u32 4294901760, %v9864_v34  ;;  %7728 = vmatpush1.bf16.msra.mxu1 %v10432_v24  ;;  %v1381_v1 = vsub.f32 %v10423_v38, %v12216_v35  ;;  %v12626_v41 = vand.u32 4294901760, %v9866_v33  ;;  %v12629_v35 = vld [vmem:[#allocation29_spill] sm:$0xff] }
  0xdb   : > { %v10447_v22 = vpack.c.bf16 %v533_v12, %v521_v19  ;;  %v527_v50 = vand.u32 4294901760, %v526_v11  ;;  %v539_v4 = vand.u32 4294901760, %v538_v0  ;;  %v12630_v24 = vand.u32 4294901760, %v12629_v35 }
  0xdc   : > { %v10444_v16 = vsub.f32 %v9864_v34, %v12623_v5  ;;  %v10455_v58 = vsub.f32 %v9866_v33, %v12626_v41  ;;  %v10457_v30 = vpack.c.bf16 %v1388_v62, %v1376_v59  ;;  %v12628_v5 = vand.u32 4294901760, %v9879_v28  ;;  %v12632_v59 = vld [vmem:[#allocation30_spill] sm:$0xff] }
  0xdd   : > { %12625 = vst [vmem:[#allocation92_spill] sm:$0xff] %v10447_v22  ;;  %7538 = vmatprep.subr.bf16.mxu0 %v10447_v22  ;;  %v1382_v11 = vand.u32 4294901760, %v1381_v1  ;;  %v10470_v33 = vsub.f32 %v12629_v35, %v12630_v24  ;;  %v12633_v62 = vand.u32 4294901760, %v12632_v59  ;;  %v10478_v41 = vpack.c.bf16 %v539_v4, %v527_v50  ;;  %v12640_v50 = vld [vmem:[#allocation33_spill] sm:$0xff] }
  0xde   : > { %12624 = vst [vmem:[#allocation91_spill] sm:$0xff] %v10444_v16  ;;  %12627 = vst [vmem:[#allocation93_spill] sm:$0xff] %v10457_v30  ;;  %v12223_v34 = vand.u32 4294901760, %v10444_v16  ;;  %v10463_v19 = vsub.f32 %v9879_v28, %v12628_v5  ;;  %7730 = vmatprep.subr.bf16.mxu1 %v10457_v30  ;;  %v12636_v5 = vld [vmem:[#allocation32_spill] sm:$0xff]  ;;  %v12639_v35 = vand.u32 4294901760, %v10455_v58  ;;  %v12641_v30 = vand.u32 4294901760, %v12640_v50 }
  0xdf   : > { %12631 = vst [vmem:[#allocation29_spill] sm:$0xff] %v10470_v33  ;;  %v10475_v0 = vsub.f32 %v12632_v59, %v12633_v62  ;;  %12635 = vst [vmem:[#allocation94_spill] sm:$0xff] %v10478_v41  ;;  %v12637_v12 = vand.u32 4294901760, %v12636_v5  ;;  %7540 = vmatpush1.bf16.msra.mxu0 %v10478_v41  ;;  %v12646_v51 = vand.u32 4294901760, %v10470_v33 }
  0xe0   : > { %v1393_v28 = vsub.f32 %v10444_v16, %v12223_v34  ;;  %v12232_v1 = vand.u32 4294901760, %v10463_v19  ;;  %v544_v59 = vsub.f32 %v10455_v58, %v12639_v35  ;;  %v10497_v22 = vsub.f32 %v12640_v50, %v12641_v30 }
  0xe1   : > { %12634 = vst [vmem:[#allocation30_spill] sm:$0xff] %v10475_v0  ;;  %v10487_v24 = vsub.f32 %v12636_v5, %v12637_v12  ;;  %v12644_v35 = vand.u32 4294901760, %v12643_v56  ;;  %v1399_v30 = vsub.f32 %v10470_v33, %v12646_v51  ;;  %v12647_v50 = vand.u32 4294901760, %v10475_v0  ;;  %v12649_v33 = vld [vmem:[#allocation37_spill] sm:$0xff] }
  0xe2   : > { %12642 = vst [vmem:[#allocation33_spill] sm:$0xff] %v10497_v22  ;;  %v1394_v34 = vand.u32 4294901760, %v1393_v28  ;;  %v556_v12 = vsub.f32 %v10463_v19, %v12232_v1  ;;  %v545_v4 = vand.u32 4294901760, %v544_v59  ;;  %v12240_v41 = vand.u32 4294901760, %v10497_v22 }
  0xe3   : > { %12638 = vst [vmem:[#allocation32_spill] sm:$0xff] %v10487_v24  ;;  %v12239_v5 = vand.u32 4294901760, %v10487_v24  ;;  %v10507_v62 = vsub.f32 %v12643_v56, %v12644_v35  ;;  %v1411_v28 = vsub.f32 %v10475_v0, %v12647_v50  ;;  %v1400_v59 = vand.u32 4294901760, %v1399_v30  ;;  %v12653_v30 = vld [vmem:[#allocation38_spill] sm:$0xff] }
  0xe4   : > { %v10516_v6 = vpack.c.bf16 %v1394_v34, %v1382_v11  ;;  %v557_v1 = vand.u32 4294901760, %v556_v12  ;;  %v562_v51 = vsub.f32 %v10497_v22, %v12240_v41  ;;  %v12650_v38 = vand.u32 4294901760, %v12649_v33 }
  0xe5   : > { %12645 = vst [vmem:[#allocation34_spill] sm:$0xff] %v10507_v62  ;;  %v550_v16 = vsub.f32 %v10487_v24, %v12239_v5  ;;  %v12245_v56 = vand.u32 4294901760, %v10507_v62  ;;  %v1412_v35 = vand.u32 4294901760, %v1411_v28  ;;  %v12654_v28 = vand.u32 4294901760, %v12653_v30 }
  0xe6   : > { %12648 = vst [vmem:[#allocation95_spill] sm:$0xff] %v10516_v6  ;;  %v10528_v50 = vsub.f32 %v12649_v33, %v12650_v38  ;;  %7732 = vmatpush1.bf16.msra.mxu1 %v10516_v6  ;;  %v10531_v34 = vpack.c.bf16 %v557_v1, %v545_v4  ;;  %v563_v22 = vand.u32 4294901760, %v562_v51  ;;  %v12657_v33 = vld [vmem:[#allocation39_spill] sm:$0xff] }
  0xe7   : > { %v551_v11 = vand.u32 4294901760, %v550_v16  ;;  %v1405_v12 = vsub.f32 %v10507_v62, %v12245_v56  ;;  %v10539_v5 = vsub.f32 %v12653_v30, %v12654_v28  ;;  %v10541_v41 = vpack.c.bf16 %v1412_v35, %v1400_v59  ;;  %v12660_v56 = vld [vmem:[#allocation41_spill] sm:$0xff]  ;;  %v12663_v59 = vld [vmem:[#allocation42_spill] sm:$0xff] }
  0xe8   : > { %12651 = vst [vmem:[#allocation37_spill] sm:$0xff] %v10528_v50  ;;  %12652 = vst [vmem:[#allocation96_spill] sm:$0xff] %v10531_v34  ;;  %v12252_v38 = vand.u32 4294901760, %v10528_v50  ;;  %v12658_v24 = vand.u32 4294901760, %v12657_v33  ;;  %7542 = vmatprep.subr.bf16.mxu0 %v10531_v34  ;;  %v12661_v6 = vand.u32 4294901760, %v12660_v56  ;;  %v12664_v35 = vand.u32 4294901760, %v12663_v59 }
  0xe9   : > { %12655 = vst [vmem:[#allocation38_spill] sm:$0xff] %v10539_v5  ;;  %12656 = vst [vmem:[#allocation97_spill] sm:$0xff] %v10541_v41  ;;  %v1406_v16 = vand.u32 4294901760, %v1405_v12  ;;  %7734 = vmatprep.subr.bf16.mxu1 %v10541_v41  ;;  %v10562_v28 = vpack.c.bf16 %v563_v22, %v551_v11  ;;  %v12669_v11 = vld [vmem:[#allocation45_spill] sm:$0xff] }
  0xea   : > { %v10547_v1 = vsub.f32 %v12657_v33, %v12658_v24  ;;  %v10554_v30 = vsub.f32 %v12660_v56, %v12661_v6  ;;  %v10559_v51 = vsub.f32 %v12663_v59, %v12664_v35  ;;  %v1417_v24 = vsub.f32 %v10528_v50, %v12252_v38  ;;  %v12666_v33 = vld [vmem:[#allocation43_spill] sm:$0xff]  ;;  %v12672_v50 = vld [vmem:[#allocation46_spill] sm:$0xff] }
  0xeb   : > { %12665 = vst [vmem:[#allocation42_spill] sm:$0xff] %v10562_v28  ;;  %v12667_v4 = vand.u32 4294901760, %v12666_v33  ;;  %v12668_v56 = vand.u32 4294901760, %v10539_v5  ;;  %v12670_v41 = vand.u32 4294901760, %v12669_v11  ;;  %7544 = vmatpush1.bf16.msra.mxu0 %v10562_v28 }
  0xec   : > { %12659 = vst [vmem:[#allocation39_spill] sm:$0xff] %v10547_v1  ;;  %12662 = vst [vmem:[#allocation41_spill] sm:$0xff] %v10554_v30  ;;  %v12261_v12 = vand.u32 4294901760, %v10547_v1  ;;  %v1418_v38 = vand.u32 4294901760, %v1417_v24 }
  0xed   : > { %v10571_v6 = vsub.f32 %v12666_v33, %v12667_v4  ;;  %v568_v59 = vsub.f32 %v10539_v5, %v12668_v56  ;;  %v10581_v34 = vsub.f32 %v12669_v11, %v12670_v41  ;;  %v12673_v56 = vand.u32 4294901760, %v12672_v50 }
  0xee   : > { %v580_v4 = vsub.f32 %v10547_v1, %v12261_v12  ;;  %v12674_v5 = vand.u32 4294901760, %v10554_v30  ;;  %v12675_v11 = vand.u32 4294901760, %v10559_v51  ;;  %v10600_v62 = vpack.c.bf16 %v1418_v38, %v1406_v16 }
  0xef   : > { %12671 = vst [vmem:[#allocation43_spill] sm:$0xff] %v10581_v34  ;;  %v12268_v33 = vand.u32 4294901760, %v10571_v6  ;;  %v10591_v35 = vsub.f32 %v12672_v50, %v12673_v56  ;;  %v569_v22 = vand.u32 4294901760, %v568_v59  ;;  %v12269_v28 = vand.u32 4294901760, %v10581_v34 }
  0xf0   : > { %v1423_v41 = vsub.f32 %v10554_v30, %v12674_v5  ;;  %v1435_v24 = vsub.f32 %v10559_v51, %v12675_v11  ;;  %12676 = vst [vmem:[#allocation45_spill] sm:$0xff] %v10600_v62  ;;  %v581_v12 = vand.u32 4294901760, %v580_v4  ;;  %v12677_v30 = vld [vmem:[#allocation47_spill] sm:$0xff]  ;;  %7736 = vmatpush1.bf16.msra.mxu1 %v10600_v62 }
  0xf1   : > { %v574_v1 = vsub.f32 %v10571_v6, %v12268_v33  ;;  %v12272_v50 = vand.u32 4294901760, %v10591_v35  ;;  %v586_v5 = vsub.f32 %v10581_v34, %v12269_v28  ;;  %v12678_v0 = vand.u32 4294901760, %v12677_v30 }
  0xf2   : > { %v1424_v59 = vand.u32 4294901760, %v1423_v41  ;;  %v1436_v56 = vand.u32 4294901760, %v1435_v24  ;;  %v10615_v38 = vpack.c.bf16 %v581_v12, %v569_v22  ;;  %v12680_v41 = vld [vmem:[#allocation50_spill] sm:$0xff] }
  0xf3   : > { %v10612_v11 = vsub.f32 %v12677_v30, %v12678_v0  ;;  %v575_v16 = vand.u32 4294901760, %v574_v1  ;;  %v1429_v4 = vsub.f32 %v10591_v35, %v12272_v50  ;;  %v12681_v24 = vand.u32 4294901760, %v12680_v41 }
  0xf4   : > { %12679 = vst [vmem:[#allocation46_spill] sm:$0xff] %v10615_v38  ;;  %v10625_v28 = vpack.c.bf16 %v1436_v56, %v1424_v59  ;;  %v587_v34 = vand.u32 4294901760, %v586_v5  ;;  %v12683_v30 = vand.u32 4294901760, %v9971_v25  ;;  %7546 = vmatprep.subr.bf16.mxu0 %v10615_v38  ;;  %v12685_v50 = vand.u32 4294901760, %v9973_v8  ;;  %v12687_v59 = vld [vmem:[#allocation52_spill] sm:$0xff] }
  0xf5   : > { %v10623_v33 = vsub.f32 %v12680_v41, %v12681_v24  ;;  %v12275_v0 = vand.u32 4294901760, %v10612_v11  ;;  %v1430_v1 = vand.u32 4294901760, %v1429_v4  ;;  %v12688_v56 = vand.u32 4294901760, %v12687_v59 }
  0xf6   : > { %12682 = vst [vmem:[#allocation47_spill] sm:$0xff] %v10625_v28  ;;  %v10631_v12 = vsub.f32 %v9971_v25, %v12683_v30  ;;  %v10638_v41 = vsub.f32 %v9973_v8, %v12685_v50  ;;  %7738 = vmatprep.subr.bf16.mxu1 %v10625_v28  ;;  %v10646_v24 = vpack.c.bf16 %v587_v34, %v575_v16  ;;  %v12690_v30 = vand.u32 4294901760, %v9986_v32  ;;  %v12691_v16 = vld [vmem:[#allocation53_spill] sm:$0xff] }
  0xf7   : > { %v12276_v22 = vand.u32 4294901760, %v10623_v33  ;;  %v10643_v5 = vsub.f32 %v12687_v59, %v12688_v56  ;;  %v1441_v25 = vsub.f32 %v10612_v11, %v12275_v0  ;;  %v12692_v56 = vand.u32 4294901760, %v12691_v16 }
  0xf8   : > { %12684 = vst [vmem:[#allocation50_spill] sm:$0xff] %v10631_v12  ;;  %12686 = vst [vmem:[#allocation98_spill] sm:$0xff] %v10638_v41  ;;  %v12283_v4 = vand.u32 4294901760, %v10631_v12  ;;  %v10655_v8 = vsub.f32 %v9986_v32, %v12690_v30  ;;  %7548 = vmatpush1.bf16.msra.mxu0 %v10646_v24  ;;  %v12695_v38 = vand.u32 4294901760, %v10638_v41 }
  0xf9   : > { %12689 = vst [vmem:[#allocation52_spill] sm:$0xff] %v10646_v24  ;;  %v592_v50 = vsub.f32 %v10623_v33, %v12276_v22  ;;  %v10665_v28 = vsub.f32 %v12691_v16, %v12692_v56  ;;  %v1442_v0 = vand.u32 4294901760, %v1441_v25  ;;  %v12694_v22 = vand.u32 4294901760, %v10000_v18 }
  0xfa   : > { %v604_v32 = vsub.f32 %v10631_v12, %v12283_v4  ;;  %v12288_v30 = vand.u32 4294901760, %v10655_v8  ;;  %v1447_v16 = vsub.f32 %v10638_v41, %v12695_v38  ;;  %v12696_v56 = vand.u32 4294901760, %v10643_v5 }
  0xfb   : > { %12693 = vst [vmem:[#allocation53_spill] sm:$0xff] %v10665_v28  ;;  %v10675_v59 = vsub.f32 %v10000_v18, %v12694_v22  ;;  %v593_v34 = vand.u32 4294901760, %v592_v50  ;;  %v12289_v24 = vand.u32 4294901760, %v10665_v28  ;;  %v10684_v62 = vpack.c.bf16 %v1442_v0, %v1430_v1 }
  0xfc   : > { %v1459_v25 = vsub.f32 %v10643_v5, %v12696_v56  ;;  %v605_v4 = vand.u32 4294901760, %v604_v32  ;;  %v598_v12 = vsub.f32 %v10655_v8, %v12288_v30  ;;  %v1448_v22 = vand.u32 4294901760, %v1447_v16  ;;  %v12700_v16 = vld [vmem:[#allocation55_spill] sm:$0xff] }
  0xfd   : > { %12697 = vst [vmem:[#allocation99_spill] sm:$0xff] %v10684_v62  ;;  %v12292_v18 = vand.u32 4294901760, %v10675_v59  ;;  %v610_v38 = vsub.f32 %v10665_v28, %v12289_v24  ;;  %v12698_v41 = vand.u32 4294901760, %v10002_v14  ;;  %7740 = vmatpush1.bf16.msra.mxu1 %v10684_v62 }
  0xfe   : > { %v1460_v50 = vand.u32 4294901760, %v1459_v25  ;;  %v10699_v0 = vpack.c.bf16 %v605_v4, %v593_v34  ;;  %v599_v1 = vand.u32 4294901760, %v598_v12  ;;  %v12701_v25 = vand.u32 4294901760, %v12700_v16 }
  0xff   : > { %v10696_v56 = vsub.f32 %v10002_v14, %v12698_v41  ;;  %v1453_v32 = vsub.f32 %v10675_v59, %v12292_v18  ;;  %v611_v28 = vand.u32 4294901760, %v610_v38  ;;  %v12703_v41 = vand.u32 4294901760, %v10022_v27 }
 0x100   : > { %12699 = vst [vmem:[#allocation100_spill] sm:$0xff] %v10699_v0  ;;  %v10707_v30 = vsub.f32 %v12700_v16, %v12701_v25  ;;  %v10709_v24 = vpack.c.bf16 %v1460_v50, %v1448_v22  ;;  %7550 = vmatprep.subr.bf16.mxu0 %v10699_v0  ;;  %v12704_v18 = vand.u32 4294901760, %v10024_v40  ;;  %v12706_v22 = vand.u32 4294901760, %v10036_v20  ;;  %v12708_v25 = vld [vmem:[#allocation59_spill] sm:$0xff] }
 0x101   : > { %v12293_v14 = vand.u32 4294901760, %v10696_v56  ;;  %v10715_v4 = vsub.f32 %v10022_v27, %v12703_v41  ;;  %v1454_v12 = vand.u32 4294901760, %v1453_v32  ;;  %v10730_v38 = vpack.c.bf16 %v611_v28, %v599_v1 }
 0x102   : > { %12702 = vst [vmem:[#allocation55_spill] sm:$0xff] %v10709_v24  ;;  %v12294_v34 = vand.u32 4294901760, %v10707_v30  ;;  %v10722_v16 = vsub.f32 %v10024_v40, %v12704_v18  ;;  %v10727_v50 = vsub.f32 %v10036_v20, %v12706_v22  ;;  %7742 = vmatprep.subr.bf16.mxu1 %v10709_v24  ;;  %v12709_v41 = vand.u32 4294901760, %v12708_v25 }
 0x103   : > { %12707 = vst [vmem:[#allocation102_spill] sm:$0xff] %v10730_v38  ;;  %v1465_v27 = vsub.f32 %v10696_v56, %v12293_v14  ;;  %v12301_v32 = vand.u32 4294901760, %v10715_v4  ;;  %v12710_v1 = vand.u32 4294901760, %v10040_v53  ;;  %7552 = vmatpush1.bf16.msra.mxu0 %v10730_v38 }
 0x104   : > { %12705 = vst [vmem:[#allocation101_spill] sm:$0xff] %v10722_v16  ;;  %v10739_v40 = vsub.f32 %v12708_v25, %v12709_v41  ;;  %v616_v20 = vsub.f32 %v10707_v30, %v12294_v34  ;;  %v12711_v34 = vand.u32 4294901760, %v10051_v60  ;;  %v12712_v24 = vand.u32 4294901760, %v10722_v16 }
 0x105   : > { %v10749_v22 = vsub.f32 %v10040_v53, %v12710_v1  ;;  %v1466_v14 = vand.u32 4294901760, %v1465_v27  ;;  %v628_v25 = vsub.f32 %v10715_v4, %v12301_v32  ;;  %v12713_v1 = vand.u32 4294901760, %v10727_v50 }
 0x106   : > { %v12306_v41 = vand.u32 4294901760, %v10739_v40  ;;  %v10759_v18 = vsub.f32 %v10051_v60, %v12711_v34  ;;  %v617_v28 = vand.u32 4294901760, %v616_v20  ;;  %v1471_v53 = vsub.f32 %v10722_v16, %v12712_v24 }
 0x107   : > { %v1483_v27 = vsub.f32 %v10727_v50, %v12713_v1  ;;  %v12307_v38 = vand.u32 4294901760, %v10749_v22  ;;  %v10768_v0 = vpack.c.bf16 %v1466_v14, %v1454_v12  ;;  %v629_v32 = vand.u32 4294901760, %v628_v25 }
 0x108   : > { %v622_v62 = vsub.f32 %v10739_v40, %v12306_v41  ;;  %v12309_v60 = vand.u32 4294901760, %v10759_v18  ;;  %v1472_v34 = vand.u32 4294901760, %v1471_v53  ;;  %v12715_v16 = vand.u32 4294901760, %v10053_v55 }
 0x109   : > { %12714 = vst [vmem:[#allocation59_spill] sm:$0xff] %v10768_v0  ;;  %v1484_v20 = vand.u32 4294901760, %v1483_v27  ;;  %v634_v24 = vsub.f32 %v10749_v22, %v12307_v38  ;;  %7744 = vmatpush1.bf16.msra.mxu1 %v10768_v0  ;;  %v10783_v14 = vpack.c.bf16 %v629_v32, %v617_v28  ;;  %v10808_v28 = vpack.c.bf16 %v10227_v3, %v10218_v42 }
 0x10a   : > { %v10780_v1 = vsub.f32 %v10053_v55, %v12715_v16  ;;  %v623_v12 = vand.u32 4294901760, %v622_v62  ;;  %v1477_v25 = vsub.f32 %v10759_v18, %v12309_v60  ;;  %v10794_v55 = vpack.c.bf16 %v10110_v49, %v10093_v47 }
 0x10b   : > { %12716 = vst [vmem:[#allocation103_spill] sm:$0xff] %v10783_v14  ;;  %v10788_v53 = vpack.c.bf16 %v1484_v20, %v1472_v34  ;;  %v635_v27 = vand.u32 4294901760, %v634_v24  ;;  %7554 = vmatprep.subr.bf16.mxu0 %v10783_v14  ;;  %v10798_v16 = vpack.c.bf16 %v10213_v17, %v10199_v15  ;;  %12721 = vst [vmem:[#allocation108_spill] sm:$0xff] %v10808_v28  ;;  %v12730_v14 = vld [vmem:[#allocation69_spill] sm:$0xff]  ;;  %v12744_v3 = vand.u32 4294901760, %v10313_v48 }
 0x10c   : > { %v12308_v41 = vand.u32 4294901760, %v10780_v1  ;;  %v1478_v38 = vand.u32 4294901760, %v1477_v25  ;;  %12718 = vst [vmem:[#allocation105_spill] sm:$0xff] %v10794_v55  ;;  %v10812_v34 = vpack.c.bf16 %v10237_v23, %v10232_v21  ;;  %v10816_v20 = vpack.c.bf16 %v10279_v29, %v10247_v26  ;;  %v12733_v26 = vld [vmem:[#allocation70_spill] sm:$0xff] }
 0x10d   : > { %12717 = vst [vmem:[#allocation104_spill] sm:$0xff] %v10788_v53  ;;  %12719 = vst [vmem:[#allocation106_spill] sm:$0xff] %v10798_v16  ;;  %7746 = vmatprep.subr.bf16.mxu1 %v10788_v53  ;;  %v10801_v62 = vpack.c.bf16 %v635_v27, %v623_v12  ;;  %v10820_v24 = vpack.c.bf16 %v10293_v36, %v10285_v54  ;;  %v10824_v12 = vpack.c.bf16 %v10313_v48, %v10303_v37  ;;  %v12729_v53 = vld [vmem:[#allocation67_spill] sm:$0xff] }
 0x10e   : > { %v1489_v32 = vsub.f32 %v10780_v1, %v12308_v41  ;;  %12722 = vst [vmem:[#allocation109_spill] sm:$0xff] %v10812_v34  ;;  %12723 = vst [vmem:[#allocation110_spill] sm:$0xff] %v10816_v20  ;;  %v10828_v25 = vpack.c.bf16 %v10329_v44, %v10318_v61  ;;  %v10833_v41 = vpack.c.bf16 %v10144_v7, %v10139_v46  ;;  %v12755_v48 = vand.u32 4294901760, %v10386_v57 }
 0x10f   : > { %12720 = vst [vmem:[#allocation107_spill] sm:$0xff] %v10801_v62  ;;  %12724 = vst [vmem:[#allocation111_spill] sm:$0xff] %v10820_v24  ;;  %7556 = vmatpush1.bf16.msra.mxu0 %v10801_v62  ;;  %v10837_v60 = vpack.c.bf16 %v10363_v13, %v10334_v45  ;;  %v10842_v0 = vpack.c.bf16 %v12730_v14, %v12729_v53 }
 0x110   : > { %12725 = vst [vmem:[#allocation112_spill] sm:$0xff] %v10824_v12  ;;  %12726 = vst [vmem:[#allocation113_spill] sm:$0xff] %v10828_v25  ;;  %v1490_v27 = vand.u32 4294901760, %v1489_v32  ;;  %7558 = vmatprep.subr.bf16.mxu0 %v10794_v55  ;;  %v10851_v32 = vpack.c.bf16 %v10192_v10, %v10157_v9  ;;  %v10857_v55 = vpack.c.bf16 %v10780_v1, %v10759_v18 }
 0x111   : > { %12727 = vst [vmem:[#allocation114_spill] sm:$0xff] %v10833_v41  ;;  %12728 = vst [vmem:[#allocation115_spill] sm:$0xff] %v10837_v60 }
 0x112   : > { %12731 = vst [vmem:[#allocation67_spill] sm:$0xff] %v10842_v0  ;;  %v10844_v29 = vpack.c.bf16 %v1490_v27, %v1478_v38  ;;  %671 = vmatmul.mubr.f32.vlgmr.msra.gmra.mrb[0].mxu0 %v12733_v26  ;;  %12734 = vst [vmem:[#allocation116_spill] sm:$0xff] %v10851_v32  ;;  %v10863_v38 = vpack.c.bf16 %v10377_v52, %v10371_v39  ;;  %v10867_v27 = vpack.c.bf16 %v10391_v63, %v10386_v57 }
 0x113   : > { %7560 = vmatpush1.bf16.msra.mxu0 %v10833_v41  ;;  %12735 = vst [vmem:[#allocation117_spill] sm:$0xff] %v10857_v55  ;;  %805 = vmatprep.mubr.f32.mxu0 %v12595_v2  ;;  %v10871_v41 = vpack.c.bf16 %v10413_v31, %v10402_v43  ;;  %v12767_v57 = vand.u32 4294901760, %v10463_v19 }
 0x114   : > { %12732 = vst [vmem:[#allocation69_spill] sm:$0xff] %v10844_v29  ;;  %7748 = vmatpush1.bf16.msra.mxu1 %v10844_v29  ;;  %7562 = vmatprep.subr.bf16.mxu0 %v10798_v16  ;;  %12736 = vst [vmem:[#allocation118_spill] sm:$0xff] %v10863_v38  ;;  %v10877_v16 = vpack.c.bf16 %v10463_v19, %v10455_v58  ;;  %v12741_v29 = vand.u32 4294901760, %v10293_v36  ;;  %v12784_v19 = vld [vmem:[#allocation38_spill] sm:$0xff] }
 0x115   : > { %7750 = vmatprep.subr.bf16.mxu1 %v10842_v0  ;;  %12737 = vst [vmem:[#allocation119_spill] sm:$0xff] %v10867_v27  ;;  %12738 = vst [vmem:[#allocation120_spill] sm:$0xff] %v10871_v41  ;;  %v12740_v0 = vand.u32 4294901760, %v10285_v54  ;;  %v12749_v54 = vand.u32 4294901760, %v10334_v45  ;;  %v12758_v45 = vand.u32 4294901760, %v10402_v43 }
 0x116   : > { %12739 = vst [vmem:[#allocation121_spill] sm:$0xff] %v10877_v16 }
 0x117   : > { %1526 = vmatmul.mubr.f32.vlgmr.msra.gmra.mrb[0].mxu1 %v12733_v26  ;;  %7564 = vmatpush1.bf16.msra.mxu0 %v10812_v34  ;;  %v10883_v62 = vpack.c.bf16 %v12741_v29, %v12740_v0  ;;  %v12743_v26 = vand.u32 4294901760, %v10303_v37  ;;  %v12746_v34 = vand.u32 4294901760, %v10318_v61  ;;  %v12750_v29 = vand.u32 4294901760, %v10363_v13 }
 0x118   : > { %7752 = vmatpush1.bf16.msra.mxu1 %v10851_v32  ;;  %7566 = vmatprep.subr.bf16.mxu0 %v10820_v24  ;;  %v12747_v32 = vand.u32 4294901760, %v10329_v44  ;;  %v12752_v37 = vand.u32 4294901760, %v10371_v39  ;;  %v12756_v61 = vand.u32 4294901760, %v10391_v63  ;;  %v12759_v13 = vand.u32 4294901760, %v10413_v31  ;;  %v12769_v63 = vld [vmem:[#allocation29_spill] sm:$0xff]  ;;  %v12774_v31 = vld [vmem:[#allocation32_spill] sm:$0xff] }
 0x119   : > { %12742 = vst [vmem:[#allocation122_spill] sm:$0xff] %v10883_v62  ;;  %v10889_v42 = vpack.c.bf16 %v12744_v3, %v12743_v26  ;;  %7754 = vmatprep.subr.bf16.mxu1 %v10808_v28  ;;  %v10903_v36 = vpack.c.bf16 %v12750_v29, %v12749_v54  ;;  %v12753_v3 = vand.u32 4294901760, %v10377_v52  ;;  %1660 = vmatprep.mubr.f32.mxu1 %v12595_v2  ;;  %v12766_v29 = vand.u32 4294901760, %v10455_v58 }
 0x11a   : > { %v10897_v23 = vpack.c.bf16 %v12747_v32, %v12746_v34  ;;  %v10916_v44 = vpack.c.bf16 %v12756_v61, %v12755_v48  ;;  %v10922_v0 = vpack.c.bf16 %v12759_v13, %v12758_v45  ;;  %v12761_v34 = vld [vmem:[#allocation89_spill] sm:$0xff]  ;;  %v12763_v32 = vld [vmem:[#allocation91_spill] sm:$0xff]  ;;  %v12771_v48 = vld [vmem:[#allocation30_spill] sm:$0xff]  ;;  %v12775_v45 = vand.u32 4294901760, %v12774_v31 }
 0x11b   : > { %12745 = vst [vmem:[#allocation123_spill] sm:$0xff] %v10889_v42  ;;  %12751 = vst [vmem:[#allocation125_spill] sm:$0xff] %v10903_v36  ;;  %v10909_v26 = vpack.c.bf16 %v12753_v3, %v12752_v37  ;;  %v12762_v39 = vand.u32 4294901760, %v12761_v34  ;;  %v12764_v52 = vand.u32 4294901760, %v12763_v32  ;;  %v10934_v37 = vpack.c.bf16 %v12767_v57, %v12766_v29  ;;  %v12776_v13 = vld [vmem:[#allocation33_spill] sm:$0xff]  ;;  %v12786_v57 = vld [vmem:[#allocation39_spill] sm:$0xff]  ;;  %7568 = vmatpush1.bf16.msra.mxu0 %v10828_v25 }
 0x11c   : > { %12748 = vst [vmem:[#allocation124_spill] sm:$0xff] %v10897_v23  ;;  %12757 = vst [vmem:[#allocation127_spill] sm:$0xff] %v10916_v44  ;;  %v12770_v3 = vand.u32 4294901760, %v12769_v63  ;;  %v12772_v43 = vand.u32 4294901760, %v12771_v48  ;;  %v12777_v24 = vand.u32 4294901760, %v12776_v13  ;;  %v12785_v29 = vand.u32 4294901760, %v12784_v19  ;;  %7756 = vmatpush1.bf16.msra.mxu1 %v10816_v20  ;;  %7570 = vmatprep.subr.bf16.mxu0 %v10863_v38 }
 0x11d   : > { %12754 = vst [vmem:[#allocation126_spill] sm:$0xff] %v10909_v26  ;;  %12760 = vst [vmem:[#allocation128_spill] sm:$0xff] %v10922_v0  ;;  %v10928_v54 = vpack.c.bf16 %v12764_v52, %v12762_v39  ;;  %v12779_v39 = vld [vmem:[#allocation34_spill] sm:$0xff]  ;;  %7758 = vmatprep.subr.bf16.mxu1 %v10824_v12  ;;  %v12800_v25 = vand.u32 4294901760, %v10623_v33  ;;  %v12812_v38 = vand.u32 4294901760, %v10675_v59  ;;  %v12813_v12 = vand.u32 4294901760, %v10696_v56 }
 0x11e   : > { %12768 = vst [vmem:[#allocation91_spill] sm:$0xff] %v10934_v37  ;;  %v10940_v61 = vpack.c.bf16 %v12772_v43, %v12770_v3  ;;  %v10946_v28 = vpack.c.bf16 %v12777_v24, %v12775_v45  ;;  %v12780_v52 = vand.u32 4294901760, %v12779_v39  ;;  %v12787_v37 = vand.u32 4294901760, %v12786_v57  ;;  %v12789_v3 = vld [vmem:[#allocation41_spill] sm:$0xff] }
 0x11f   : > { %12765 = vst [vmem:[#allocation89_spill] sm:$0xff] %v10928_v54  ;;  %v12781_v54 = vld [vmem:[#allocation37_spill] sm:$0xff]  ;;  %v12790_v43 = vand.u32 4294901760, %v12789_v3  ;;  %v12791_v24 = vand.u32 4294901760, %v10559_v51  ;;  %v11004_v36 = vpack.c.bf16 %v12813_v12, %v12812_v38  ;;  %v12825_v12 = vand.u32 4294901760, %v10759_v18  ;;  %7572 = vmatpush1.bf16.msra.mxu0 %v10871_v41 }
 0x120   : > { %12773 = vst [vmem:[#allocation29_spill] sm:$0xff] %v10940_v61  ;;  %12778 = vst [vmem:[#allocation30_spill] sm:$0xff] %v10946_v28  ;;  %v12782_v58 = vand.u32 4294901760, %v12781_v54  ;;  %v10958_v0 = vpack.c.bf16 %v12787_v37, %v12785_v29  ;;  %v12793_v61 = vand.u32 4294901760, %v10571_v6  ;;  %v12797_v28 = vand.u32 4294901760, %v10591_v35  ;;  %7760 = vmatpush1.bf16.msra.mxu1 %v10837_v60  ;;  %7574 = vmatprep.subr.bf16.mxu0 %v10877_v16 }
 0x121   : > { %v10966_v45 = vpack.c.bf16 %v12791_v24, %v12790_v43  ;;  %v12798_v37 = vand.u32 4294901760, %v10612_v11  ;;  %v12801_v43 = vld [vmem:[#allocation50_spill] sm:$0xff]  ;;  %v12826_v38 = vand.u32 4294901760, %v10780_v1  ;;  %7762 = vmatprep.subr.bf16.mxu1 %v10867_v27  ;;  %v11044_v18 = vpack.c.bf16 %v12771_v48, %v12769_v63 }
 0x122   : > { %v10952_v44 = vpack.c.bf16 %v12782_v58, %v12780_v52  ;;  %12788 = vst [vmem:[#allocation33_spill] sm:$0xff] %v10958_v0  ;;  %v12794_v52 = vld [vmem:[#allocation43_spill] sm:$0xff]  ;;  %v12802_v24 = vand.u32 4294901760, %v12801_v43  ;;  %12814 = vst [vmem:[#allocation50_spill] sm:$0xff] %v11004_v36  ;;  %v11048_v1 = vpack.c.bf16 %v12786_v57, %v12784_v19  ;;  %v11064_v63 = vpack.c.bf16 %v10559_v51, %v12789_v3  ;;  %v12854_v19 = vld [vmem:[#allocation26_spill] sm:$0xff] }
 0x123   : > { %12792 = vst [vmem:[#allocation34_spill] sm:$0xff] %v10966_v45  ;;  %v12795_v58 = vand.u32 4294901760, %v12794_v52  ;;  %v10978_v29 = vpack.c.bf16 %v12798_v37, %v12797_v28  ;;  %v12804_v45 = vld [vmem:[#allocation98_spill] sm:$0xff]  ;;  %v12809_v28 = vld [vmem:[#allocation53_spill] sm:$0xff]  ;;  %v11028_v36 = vpack.c.bf16 %v12826_v38, %v12825_v12  ;;  %12830 = vst [vmem:[#allocation132_spill] sm:$0xff] %v11044_v18  ;;  %v11068_v48 = vpack.c.bf16 %v12801_v43, %v10623_v33 }
 0x124   : > { %12783 = vst [vmem:[#allocation32_spill] sm:$0xff] %v10952_v44  ;;  %v10986_v20 = vpack.c.bf16 %v12802_v24, %v12800_v25  ;;  %v12805_v0 = vand.u32 4294901760, %v12804_v45  ;;  %v12810_v37 = vand.u32 4294901760, %v12809_v28  ;;  %v12815_v25 = vand.u32 4294901760, %v10707_v30  ;;  %12831 = vst [vmem:[#allocation133_spill] sm:$0xff] %v11048_v1  ;;  %v12855_v57 = vld [vmem:[#allocation31_spill] sm:$0xff] }
 0x125   : > { %v10972_v44 = vpack.c.bf16 %v12795_v58, %v12793_v61  ;;  %12799 = vst [vmem:[#allocation38_spill] sm:$0xff] %v10978_v29  ;;  %v12806_v61 = vand.u32 4294901760, %v10643_v5  ;;  %v12816_v24 = vand.u32 4294901760, %v10715_v4  ;;  %12827 = vst [vmem:[#allocation129_spill] sm:$0xff] %v11028_v36  ;;  %v11084_v51 = vpack.c.bf16 %v10643_v5, %v12804_v45  ;;  %v12856_v3 = vld [vmem:[#allocation28_spill] sm:$0xff] }
 0x126   : > { %12803 = vst [vmem:[#allocation39_spill] sm:$0xff] %v10986_v20  ;;  %12834 = vst [vmem:[#allocation136_spill] sm:$0xff] %v11064_v63  ;;  %v11088_v33 = vpack.c.bf16 %v10715_v4, %v10707_v30  ;;  %v12845_v30 = vld [vmem:[#allocation19_spill] sm:$0xff]  ;;  %v12847_v4 = vld [vmem:[#allocation21_spill] sm:$0xff] }
 0x127   : > { %12796 = vst [vmem:[#allocation37_spill] sm:$0xff] %v10972_v44  ;;  %v10992_v58 = vpack.c.bf16 %v12806_v61, %v12805_v0  ;;  %v12808_v44 = vand.u32 4294901760, %v10655_v8  ;;  %v11010_v20 = vpack.c.bf16 %v12816_v24, %v12815_v25  ;;  %v12818_v0 = vld [vmem:[#allocation101_spill] sm:$0xff]  ;;  %v11038_v25 = vpack.c.bf16 %v12776_v13, %v12774_v31  ;;  %12835 = vst [vmem:[#allocation137_spill] sm:$0xff] %v11068_v48  ;;  %v12852_v13 = vld [vmem:[#allocation24_spill] sm:$0xff] }
 0x128   : > { %v12819_v61 = vand.u32 4294901760, %v12818_v0  ;;  %12838 = vst [vmem:[#allocation140_spill] sm:$0xff] %v11084_v51  ;;  %12839 = vst [vmem:[#allocation141_spill] sm:$0xff] %v11088_v33  ;;  %v11104_v5 = vpack.c.bf16 %v10727_v50, %v12818_v0  ;;  %v12851_v31 = vld [vmem:[#allocation25_spill] sm:$0xff]  ;;  %v12857_v45 = vld [vmem:[#allocation36_spill] sm:$0xff] }
 0x129   : > { %12807 = vst [vmem:[#allocation41_spill] sm:$0xff] %v10992_v58  ;;  %v10998_v29 = vpack.c.bf16 %v12810_v37, %v12808_v44  ;;  %12817 = vst [vmem:[#allocation98_spill] sm:$0xff] %v11010_v20  ;;  %v12820_v58 = vand.u32 4294901760, %v10727_v50  ;;  %v12822_v44 = vand.u32 4294901760, %v10739_v40  ;;  %v12823_v37 = vand.u32 4294901760, %v10749_v22  ;;  %7576 = vmatpush1.bf16.msra.mxu0 %v11038_v25  ;;  %v12848_v50 = vld [vmem:[#allocation20_spill] sm:$0xff] }
 0x12a   : > { %12829 = vst [vmem:[#allocation131_spill] sm:$0xff] %v11038_v25  ;;  %7578 = vmatprep.subr.bf16.mxu0 %v11048_v1  ;;  %12842 = vst [vmem:[#allocation144_spill] sm:$0xff] %v11104_v5  ;;  %v12859_v43 = vld [vmem:[#allocation44_spill] sm:$0xff]  ;;  %v12861_v24 = vld [vmem:[#allocation49_spill] sm:$0xff] }
 0x12b   : > { %12811 = vst [vmem:[#allocation43_spill] sm:$0xff] %v10998_v29  ;;  %v11016_v26 = vpack.c.bf16 %v12820_v58, %v12819_v61  ;;  %v11022_v29 = vpack.c.bf16 %v12823_v37, %v12822_v44  ;;  %v11034_v58 = vpack.c.bf16 %v12763_v32, %v12761_v34  ;;  %v11054_v34 = vpack.c.bf16 %v12781_v54, %v12779_v39  ;;  %v12853_v39 = vld [vmem:[#allocation27_spill] sm:$0xff]  ;;  %v12862_v0 = vld [vmem:[#allocation48_spill] sm:$0xff]  ;;  %v12863_v61 = vld [vmem:[#allocation54_spill] sm:$0xff] }
 0x12c   : > { %v11058_v32 = vpack.c.bf16 %v12794_v52, %v10571_v6  ;;  %v11074_v6 = vpack.c.bf16 %v10612_v11, %v10591_v35  ;;  %v11078_v54 = vpack.c.bf16 %v12809_v28, %v10655_v8  ;;  %v11094_v35 = vpack.c.bf16 %v10696_v56, %v10675_v59  ;;  %v12843_v8 = vld [vmem:[#allocation17_spill] sm:$0xff]  ;;  %v12844_v59 = vld [vmem:[#allocation71_spill] sm:$0xff]  ;;  %v12846_v56 = vld [vmem:[#allocation18_spill] sm:$0xff] }
 0x12d   : > { %12821 = vst [vmem:[#allocation53_spill] sm:$0xff] %v11016_v26  ;;  %12824 = vst [vmem:[#allocation101_spill] sm:$0xff] %v11022_v29  ;;  %7764 = vmatpush1.bf16.msra.mxu1 %v11034_v58  ;;  %v11098_v11 = vpack.c.bf16 %v10749_v22, %v10739_v40  ;;  %v12849_v40 = vld [vmem:[#allocation23_spill] sm:$0xff]  ;;  %v12850_v22 = vld [vmem:[#allocation22_spill] sm:$0xff] }
 0x12e   : > { %12828 = vst [vmem:[#allocation130_spill] sm:$0xff] %v11034_v58  ;;  %12832 = vst [vmem:[#allocation134_spill] sm:$0xff] %v11054_v34  ;;  %7766 = vmatprep.subr.bf16.mxu1 %v11044_v18  ;;  %7580 = vmatpush1.bf16.msra.mxu0 %v11058_v32  ;;  %v12858_v52 = vld [vmem:[#allocation35_spill] sm:$0xff]  ;;  %v12860_v28 = vld [vmem:[#allocation40_spill] sm:$0xff] }
 0x12f   : > { %12833 = vst [vmem:[#allocation135_spill] sm:$0xff] %v11058_v32  ;;  %12836 = vst [vmem:[#allocation138_spill] sm:$0xff] %v11074_v6  ;;  %7582 = vmatprep.subr.bf16.mxu0 %v11068_v48  ;;  %v12864_v44 = vld [vmem:[#allocation51_spill] sm:$0xff]  ;;  %v12865_v37 = vld [vmem:[#allocation57_spill] sm:$0xff]  ;;  %v12878_v32 = vand.u32 4294901760, %v10144_v7 }
 0x130   : > { %12837 = vst [vmem:[#allocation139_spill] sm:$0xff] %v11078_v54  ;;  %12840 = vst [vmem:[#allocation142_spill] sm:$0xff] %v11094_v35  ;;  %v12866_v12 = vld [vmem:[#allocation56_spill] sm:$0xff]  ;;  %v12876_v48 = vld [vmem:[#allocation66_spill] sm:$0xff] }
 0x131   : > { %7768 = vmatpush1.bf16.msra.mxu1 %v11054_v34  ;;  %12841 = vst [vmem:[#allocation143_spill] sm:$0xff] %v11098_v11  ;;  %v12867_v38 = vld [vmem:[#allocation60_spill] sm:$0xff]  ;;  %v12880_v1 = vld [vmem:[#allocation65_spill] sm:$0xff]  ;;  %v12885_v34 = vand.u32 4294901760, %v10213_v17 }
 0x132   : > { %7770 = vmatprep.subr.bf16.mxu1 %v11064_v63  ;;  %7584 = vmatpush1.bf16.msra.mxu0 %v11078_v54  ;;  %v12888_v7 = vld [vmem:[#allocation68_spill] sm:$0xff] }
 0x133   : > { %7586 = vmatprep.subr.bf16.mxu0 %v11088_v33  ;;  %v12872_v33 = vand.u32 4294901760, %v10093_v47  ;;  %v12881_v47 = vand.u32 4294901760, %v12729_v53  ;;  %v12890_v53 = vand.u32 4294901760, %v10192_v10  ;;  %v12896_v17 = vld [vmem:[#allocation76_spill] sm:$0xff] }
 0x135   : > { %7772 = vmatpush1.bf16.msra.mxu1 %v11074_v6  ;;  %v12877_v6 = vand.u32 4294901760, %v10139_v46  ;;  %v12887_v46 = vld [vmem:[#allocation72_spill] sm:$0xff] }
 0x136   : > { %7774 = vmatprep.subr.bf16.mxu1 %v11084_v51  ;;  %7588 = vmatpush1.bf16.msra.mxu0 %v11098_v11  ;;  %v12870_v11 = vld [vmem:[#allocation61_spill] sm:$0xff]  ;;  %v12875_v51 = vld [vmem:[#allocation63_spill] sm:$0xff] }
 0x137   : > { %7590 = vmatprep.subr.bf16.mxu0 %v12843_v8  ;;  %v11154_v63 = vpack.c.bf16 %v12878_v32, %v12877_v6  ;;  %v12889_v32 = vand.u32 4294901760, %v10157_v9  ;;  %v12901_v9 = vld [vmem:[#allocation79_spill] sm:$0xff] }
 0x138   : > { %v12902_v10 = vand.u32 4294901760, %v12901_v9  ;;  %v12914_v9 = vld [vmem:[#allocation33_spill] sm:$0xff] }
 0x139   : > { %7776 = vmatpush1.bf16.msra.mxu1 %v11094_v35  ;;  %808 = vmatmul.mubr.f32.vlgmr.msra.gmra.mrb[0].mxu0 %v12844_v59  ;;  %v12873_v35 = vand.u32 4294901760, %v10110_v49  ;;  %12879 = vst [vmem:[#allocation71_spill] sm:$0xff] %v11154_v63  ;;  %v12882_v49 = vand.u32 4294901760, %v12730_v14  ;;  %v11177_v6 = vpack.c.bf16 %v12890_v53, %v12889_v32  ;;  %v12892_v14 = vand.u32 4294901760, %v10232_v21  ;;  %v12903_v21 = vld [vmem:[#allocation81_spill] sm:$0xff] }
 0x13a   : > { %7778 = vmatprep.subr.bf16.mxu1 %v11104_v5  ;;  %7592 = vmatpush1.bf16.msra.mxu0 %v12845_v30  ;;  %v12871_v5 = vld [vmem:[#allocation64_spill] sm:$0xff]  ;;  %v12904_v32 = vand.u32 4294901760, %v12903_v21  ;;  %v12916_v21 = vld [vmem:[#allocation37_spill] sm:$0xff] }
 0x13b   : > { %7594 = vmatprep.subr.bf16.mxu0 %v12847_v4  ;;  %910 = vmatprep.mubr.f32.mxu0 %v12595_v2  ;;  %v11146_v54 = vpack.c.bf16 %v12873_v35, %v12872_v33  ;;  %v11162_v33 = vpack.c.bf16 %v12882_v49, %v12881_v47  ;;  %v12884_v35 = vand.u32 4294901760, %v10199_v15  ;;  %12891 = vst [vmem:[#allocation21_spill] sm:$0xff] %v11177_v6  ;;  %v12893_v47 = vld [vmem:[#allocation78_spill] sm:$0xff] }
 0x13c   : > { %v12894_v15 = vand.u32 4294901760, %v12893_v47  ;;  %v11201_v53 = vpack.c.bf16 %v12904_v32, %v12902_v10  ;;  %v12909_v47 = vld [vmem:[#allocation127_spill] sm:$0xff]  ;;  %v12915_v10 = vld [vmem:[#allocation32_spill] sm:$0xff]  ;;  %v12917_v32 = vld [vmem:[#allocation34_spill] sm:$0xff] }
 0x13d   : > { %7780 = vmatpush1.bf16.msra.mxu1 %v10857_v55  ;;  %v12869_v55 = vld [vmem:[#allocation62_spill] sm:$0xff]  ;;  %12874 = vst [vmem:[#allocation17_spill] sm:$0xff] %v11146_v54  ;;  %12883 = vst [vmem:[#allocation19_spill] sm:$0xff] %v11162_v33  ;;  %v11168_v25 = vpack.c.bf16 %v12885_v34, %v12884_v35  ;;  %v12897_v34 = vand.u32 4294901760, %v12896_v17  ;;  %v12898_v35 = vld [vmem:[#allocation77_spill] sm:$0xff] }
 0x13e   : > { %7782 = vmatprep.subr.bf16.mxu1 %v12846_v56  ;;  %7596 = vmatpush1.bf16.msra.mxu0 %v12849_v40  ;;  %v11183_v49 = vpack.c.bf16 %v12894_v15, %v12892_v14  ;;  %12905 = vst [vmem:[#allocation22_spill] sm:$0xff] %v11201_v53  ;;  %v12908_v14 = vld [vmem:[#allocation128_spill] sm:$0xff]  ;;  %v12910_v15 = vld [vmem:[#allocation91_spill] sm:$0xff]  ;;  %v12911_v17 = vld [vmem:[#allocation89_spill] sm:$0xff] }
 0x13f   : > { %7598 = vmatprep.subr.bf16.mxu0 %v12851_v31  ;;  %12886 = vst [vmem:[#allocation18_spill] sm:$0xff] %v11168_v25 }
 0x140   : > { %1663 = vmatmul.mubr.f32.vlgmr.msra.gmra.mrb[0].mxu1 %v12844_v59  ;;  %v12868_v59 = vld [vmem:[#allocation58_spill] sm:$0xff]  ;;  %12895 = vst [vmem:[#allocation20_spill] sm:$0xff] %v11183_v49 }
 0x141   : > { %7784 = vmatpush1.bf16.msra.mxu1 %v12848_v50  ;;  %1765 = vmatprep.mubr.f32.mxu1 %v12595_v2 }
 0x142   : > { %7786 = vmatprep.subr.bf16.mxu1 %v12850_v22  ;;  %7600 = vmatpush1.bf16.msra.mxu0 %v12853_v39 }
 0x143   : > { %7602 = vmatprep.subr.bf16.mxu0 %v12855_v57 }
 0x145   : > { %7788 = vmatpush1.bf16.msra.mxu1 %v12852_v13 }
 0x146   : > { %7790 = vmatprep.subr.bf16.mxu1 %v12854_v19  ;;  %7604 = vmatpush1.bf16.msra.mxu0 %v12857_v45 }
 0x147   : > { %7606 = vmatprep.subr.bf16.mxu0 %v12859_v43 }
 0x149   : > { %7792 = vmatpush1.bf16.msra.mxu1 %v12856_v3 }
 0x14a   : > { %7794 = vmatprep.subr.bf16.mxu1 %v12858_v52  ;;  %7608 = vmatpush1.bf16.msra.mxu0 %v12861_v24 }
 0x14b   : > { %7610 = vmatprep.subr.bf16.mxu0 %v12863_v61 }
 0x14d   : > { %7796 = vmatpush1.bf16.msra.mxu1 %v12860_v28 }
 0x14e   : > { %7798 = vmatprep.subr.bf16.mxu1 %v12862_v0  ;;  %7612 = vmatpush1.bf16.msra.mxu0 %v12865_v37 }
 0x14f   : > { %7614 = vmatprep.subr.bf16.mxu0 %v12867_v38 }
 0x151   : > { %7800 = vmatpush1.bf16.msra.mxu1 %v12864_v44 }
 0x152   : > { %7802 = vmatprep.subr.bf16.mxu1 %v12866_v12  ;;  %7616 = vmatpush1.bf16.msra.mxu0 %v12869_v55 }
 0x153   : > { %7618 = vmatprep.subr.bf16.mxu0 %v12871_v5 }
 0x155   : > { %7804 = vmatpush1.bf16.msra.mxu1 %v12868_v59 }
 0x156   : > { %7806 = vmatprep.subr.bf16.mxu1 %v12870_v11  ;;  %7620 = vmatpush1.bf16.msra.mxu0 %v12876_v48 }
 0x157   : > { %7622 = vmatprep.subr.bf16.mxu0 %v11146_v54 }
 0x159   : > { %7808 = vmatpush1.bf16.msra.mxu1 %v12875_v51  ;;  %914 = vmatmul.mubr.f32.vlgmr.msra.gmra.mrb[0].mxu0 %v12887_v46 }
 0x15a   : > { %7810 = vmatprep.subr.bf16.mxu1 %v12880_v1  ;;  %7624 = vmatpush1.bf16.msra.mxu0 %v11154_v63  ;;  %v12899_v63 = vand.u32 4294901760, %v12898_v35  ;;  %v12913_v35 = vld [vmem:[#allocation29_spill] sm:$0xff] }
 0x15b   : > { %7626 = vmatprep.subr.bf16.mxu0 %v11168_v25  ;;  %1080 = vmatprep.mubr.f32.mxu0 %v12595_v2 }
 0x15c   : > { %v11191_v54 = vpack.c.bf16 %v12899_v63, %v12897_v34  ;;  %v12906_v63 = vld [vmem:[#allocation126_spill] sm:$0xff] }
 0x15d   : > { %7812 = vmatpush1.bf16.msra.mxu1 %v12888_v7  ;;  %v12912_v34 = vld [vmem:[#allocation30_spill] sm:$0xff] }
 0x15e   : > { %7814 = vmatprep.subr.bf16.mxu1 %v11162_v33  ;;  %12900 = vst [vmem:[#allocation23_spill] sm:$0xff] %v11191_v54  ;;  %7628 = vmatpush1.bf16.msra.mxu0 %v11183_v49 }
 0x15f   : > { %7630 = vmatprep.subr.bf16.mxu0 %v10883_v62 }
 0x160   : > { %1769 = vmatmul.mubr.f32.vlgmr.msra.gmra.mrb[0].mxu1 %v12887_v46  ;;  %v12907_v46 = vld [vmem:[#allocation125_spill] sm:$0xff] }
 0x161   : > { %7816 = vmatpush1.bf16.msra.mxu1 %v11177_v6  ;;  %1935 = vmatprep.mubr.f32.mxu1 %v12595_v2 }
 0x162   : > { %7818 = vmatprep.subr.bf16.mxu1 %v11191_v54  ;;  %7632 = vmatpush1.bf16.msra.mxu0 %v10897_v23 }
 0x163   : > { %7634 = vmatprep.subr.bf16.mxu0 %v12906_v63  ;;  %v12918_v63 = vld [vmem:[#allocation39_spill] sm:$0xff] }
 0x165   : > { %7820 = vmatpush1.bf16.msra.mxu1 %v11201_v53 }
 0x166   : > { %7822 = vmatprep.subr.bf16.mxu1 %v10889_v42  ;;  %7636 = vmatpush1.bf16.msra.mxu0 %v12908_v14  ;;  %v12919_v14 = vld [vmem:[#allocation38_spill] sm:$0xff] }
 0x167   : > { %7638 = vmatprep.subr.bf16.mxu0 %v12910_v15  ;;  %v12921_v15 = vld [vmem:[#allocation41_spill] sm:$0xff] }
 0x169   : > { %7824 = vmatpush1.bf16.msra.mxu1 %v12907_v46 }
 0x16a   : > { %7826 = vmatprep.subr.bf16.mxu1 %v12909_v47  ;;  %7640 = vmatpush1.bf16.msra.mxu0 %v12912_v34  ;;  %v12920_v47 = vld [vmem:[#allocation43_spill] sm:$0xff]  ;;  %v12922_v34 = vld [vmem:[#allocation50_spill] sm:$0xff] }
 0x16b   : > { %7642 = vmatprep.subr.bf16.mxu0 %v12914_v9  ;;  %v336_v9 = vld [vmem:[%s9681_s30 + $0x18] sm:$0xff] }
 0x16d   : > { %7828 = vmatpush1.bf16.msra.mxu1 %v12911_v17 }
 0x16e   : > { %7830 = vmatprep.subr.bf16.mxu1 %v12913_v35  ;;  %7644 = vmatpush1.bf16.msra.mxu0 %v12916_v21  ;;  %v12923_v21 = vld [vmem:[#allocation70_spill] sm:$0xff] }
 0x16f   : > { %7646 = vmatprep.subr.bf16.mxu0 %v12918_v63 }
 0x171   : > { %7832 = vmatpush1.bf16.msra.mxu1 %v12915_v10 }
 0x172   : > { %7834 = vmatprep.subr.bf16.mxu1 %v12917_v32  ;;  %7648 = vmatpush1.bf16.msra.mxu0 %v12920_v47 }
 0x173   : > { %7650 = vmatprep.subr.bf16.mxu0 %v11010_v20 }
 0x175   : > { %7836 = vmatpush1.bf16.msra.mxu1 %v12919_v14 }
 0x176   : > { %7838 = vmatprep.subr.bf16.mxu1 %v12921_v15  ;;  %7652 = vmatpush1.bf16.msra.mxu0 %v11022_v29  ;;  %v333_v29 = vld [vmem:[%s9681_s30] sm:$0xff] }
 0x177   : > { %7654 = vmatprep.subr.bf16.mxu0 %v12843_v8 }
 0x179   : > { %7840 = vmatpush1.bf16.msra.mxu1 %v12922_v34  ;;  %1082 = vmatmul.mubr.f32.vlgmr.msra.gmra.mrb[0].mxu0 %v12923_v21 }
 0x17a   : > { %7842 = vmatprep.subr.bf16.mxu1 %v11016_v26  ;;  %7656 = vmatpush1.bf16.msra.mxu0 %v12845_v30  ;;  %v334_v26 = vld [vmem:[%s9681_s30 + $0x8] sm:$0xff] }
 0x17b   : > { %7658 = vmatprep.subr.bf16.mxu0 %v12847_v4  ;;  %1184 = vmatprep.mubr.f32.mxu0 %v12595_v2 }
 0x17d   : > { %7844 = vmatpush1.bf16.msra.mxu1 %v11028_v36  ;;  %v12925_v36 = vld [vmem:[#allocation74_spill] sm:$0xff] }
 0x17e   : > { %7846 = vmatprep.subr.bf16.mxu1 %v12846_v56  ;;  %7660 = vmatpush1.bf16.msra.mxu0 %v12849_v40 }
 0x17f   : > { %7662 = vmatprep.subr.bf16.mxu0 %v12851_v31 }
 0x180   : > { %1937 = vmatmul.mubr.f32.vlgmr.msra.gmra.mrb[0].mxu1 %v12923_v21 }
 0x181   : > { %7848 = vmatpush1.bf16.msra.mxu1 %v12848_v50  ;;  %2039 = vmatprep.mubr.f32.mxu1 %v12595_v2 }
 0x182   : > { %7850 = vmatprep.subr.bf16.mxu1 %v12850_v22  ;;  %7664 = vmatpush1.bf16.msra.mxu0 %v12853_v39 }
 0x183   : > { %7666 = vmatprep.subr.bf16.mxu0 %v12855_v57 }
 0x185   : > { %7852 = vmatpush1.bf16.msra.mxu1 %v12852_v13 }
 0x186   : > { %7854 = vmatprep.subr.bf16.mxu1 %v12854_v19  ;;  %7668 = vmatpush1.bf16.msra.mxu0 %v12857_v45 }
 0x187   : > { %7670 = vmatprep.subr.bf16.mxu0 %v12859_v43 }
 0x189   : > { %7856 = vmatpush1.bf16.msra.mxu1 %v12856_v3 }
 0x18a   : > { %7858 = vmatprep.subr.bf16.mxu1 %v12858_v52  ;;  %7672 = vmatpush1.bf16.msra.mxu0 %v12861_v24 }
 0x18b   : > { %7674 = vmatprep.subr.bf16.mxu0 %v12863_v61 }
 0x18d   : > { %7860 = vmatpush1.bf16.msra.mxu1 %v12860_v28 }
 0x18e   : > { %7862 = vmatprep.subr.bf16.mxu1 %v12862_v0  ;;  %7676 = vmatpush1.bf16.msra.mxu0 %v12865_v37 }
 0x18f   : > { %7678 = vmatprep.subr.bf16.mxu0 %v12867_v38 }
 0x191   : > { %7864 = vmatpush1.bf16.msra.mxu1 %v12864_v44 }
 0x192   : > { %7866 = vmatprep.subr.bf16.mxu1 %v12866_v12  ;;  %7680 = vmatpush1.bf16.msra.mxu0 %v12869_v55 }
 0x193   : > { %7682 = vmatprep.subr.bf16.mxu0 %v12871_v5 }
 0x195   : > { %7868 = vmatpush1.bf16.msra.mxu1 %v12868_v59 }
 0x196   : > { %7870 = vmatprep.subr.bf16.mxu1 %v12870_v11  ;;  %7684 = vmatpush1.bf16.msra.mxu0 %v12876_v48 }
 0x197   : > { %7878 = vmatprep.subr.bf16.mxu0 %v12843_v8 }
 0x199   : > { %7872 = vmatpush1.bf16.msra.mxu1 %v12875_v51  ;;  %1186 = vmatmul.mubr.f32.vlgmr.msra.gmra.mrb[0].mxu0 %v12923_v21 }
 0x19a   : > { %7874 = vmatprep.subr.bf16.mxu1 %v12880_v1  ;;  %7880 = vmatpush1.bf16.msra.mxu0 %v12845_v30 }
 0x19b   : > { %7882 = vmatprep.subr.bf16.mxu0 %v12847_v4  ;;  %2181 = vmatprep.mubr.f32.mxu0 %v12595_v2 }
 0x19d   : > { %7876 = vmatpush1.bf16.msra.mxu1 %v12888_v7 }
 0x19e   : > { %8070 = vmatprep.subr.bf16.mxu1 %v12846_v56  ;;  %7884 = vmatpush1.bf16.msra.mxu0 %v12849_v40 }
 0x19f   : > { %7886 = vmatprep.subr.bf16.mxu0 %v12851_v31 }
 0x1a0   : > { %2041 = vmatmul.mubr.f32.vlgmr.msra.gmra.mrb[0].mxu1 %v12923_v21  ;;  %v12924_v21 = vld [vmem:[#allocation73_spill] sm:$0xff] }
 0x1a1   : > { %8072 = vmatpush1.bf16.msra.mxu1 %v12848_v50  ;;  %3036 = vmatprep.mubr.f32.mxu1 %v12595_v2 }
 0x1a2   : > { %8074 = vmatprep.subr.bf16.mxu1 %v12850_v22  ;;  %7888 = vmatpush1.bf16.msra.mxu0 %v12853_v39 }
 0x1a3   : > { %7890 = vmatprep.subr.bf16.mxu0 %v12855_v57 }
 0x1a5   : > { %8076 = vmatpush1.bf16.msra.mxu1 %v12852_v13 }
 0x1a6   : > { %8078 = vmatprep.subr.bf16.mxu1 %v12854_v19  ;;  %7892 = vmatpush1.bf16.msra.mxu0 %v12857_v45 }
 0x1a7   : > { %7894 = vmatprep.subr.bf16.mxu0 %v12859_v43 }
 0x1a9   : > { %8080 = vmatpush1.bf16.msra.mxu1 %v12856_v3 }
 0x1aa   : > { %8082 = vmatprep.subr.bf16.mxu1 %v12858_v52  ;;  %7896 = vmatpush1.bf16.msra.mxu0 %v12861_v24 }
 0x1ab   : > { %7898 = vmatprep.subr.bf16.mxu0 %v12863_v61 }
 0x1ad   : > { %8084 = vmatpush1.bf16.msra.mxu1 %v12860_v28 }
 0x1ae   : > { %8086 = vmatprep.subr.bf16.mxu1 %v12862_v0  ;;  %7900 = vmatpush1.bf16.msra.mxu0 %v12865_v37 }
 0x1af   : > { %7902 = vmatprep.subr.bf16.mxu0 %v12867_v38 }
 0x1b1   : > { %8088 = vmatpush1.bf16.msra.mxu1 %v12864_v44 }
 0x1b2   : > { %8090 = vmatprep.subr.bf16.mxu1 %v12866_v12  ;;  %7904 = vmatpush1.bf16.msra.mxu0 %v12869_v55 }
 0x1b3   : > { %7906 = vmatprep.subr.bf16.mxu0 %v12871_v5 }
 0x1b5   : > { %8092 = vmatpush1.bf16.msra.mxu1 %v12868_v59 }
 0x1b6   : > { %8094 = vmatprep.subr.bf16.mxu1 %v12870_v11  ;;  %7908 = vmatpush1.bf16.msra.mxu0 %v12876_v48 }
 0x1b7   : > { %7910 = vmatprep.subr.bf16.mxu0 %v12924_v21  ;;  %v335_v21 = vld [vmem:[%s9681_s30 + $0x10] sm:$0xff] }
 0x1b9   : > { %8096 = vmatpush1.bf16.msra.mxu1 %v12875_v51 }
 0x1ba   : > { %8098 = vmatprep.subr.bf16.mxu1 %v12880_v1 }
 0x1bd   : > { %8100 = vmatpush1.bf16.msra.mxu1 %v12888_v7 }
 0x1be   : > { %8102 = vmatprep.subr.bf16.mxu1 %v12925_v36 }
 0x26c   : > { %v1187_v20 = vpop.f32.mrb[0].mxu0 }
 0x26d   : > { %v2047_v34 = vadd.f32 %v1187_v20, %v333_v29  ;;  %v1189_v47 = vpop.f32.mrb[1].mxu0  ;;  %v332_v29 = vld [vmem:[#allocation3] sm:$0xff] }
 0x26e   : > { %v2048_v15 = vadd.f32 %v1189_v47, %v334_v26 }
 0x26f   : > { %v7458_v63 = vmul.f32 -1.442695, %v2047_v34 }
 0x270   : > { %v7459_v32 = vmul.f32 -1.442695, %v2048_v15 }
 0x271   : > { %9191 = vpow2.f32 %v7458_v63 }
 0x272   : > { %9193 = vpow2.f32 %v7459_v32  ;;  %v12926_v32 = vld [vmem:[#allocation75_spill] sm:$0xff] }
 0x273   : > { %v2042_v14 = vpop.f32.mrb[0].mxu1 }
 0x274   : > { %v2044_v10 = vpop.f32.mrb[1].mxu1  ;;  %v2049_v46 = vadd.f32 %v2042_v14, %v335_v21  ;;  %v12927_v21 = vld [vmem:[#allocation80_spill] sm:$0xff] }
 0x275   : > { %v2050_v35 = vadd.f32 %v2044_v10, %v336_v9 }
 0x277   : > { %v7460_v17 = vmul.f32 -1.442695, %v2050_v35 }
 0x279   : > { %9195 = vpow2.f32 %v7460_v17 }
 0x27a   : > { %9197 = vtanh.f32 %v2049_v46 }
 0x27b   : > { %v9192_v23 = vpop.eup %9191 }
 0x27c   : > { %v9194_v42 = vpop.eup %9193  ;;  %v2054_v36 = vadd.f32 1.0, %v9192_v23 }
 0x27d   : > { %v2060_v62 = vadd.f32 1.0, %v9194_v42 }
 0x27e   : > { %9199 = vrcp.f32 %v2054_v36 }
 0x27f   : > { %9201 = vrcp.f32 %v2060_v62 }
 0x283   : > { %v9196_v20 = vpop.eup %9195 }
 0x284   : > { %v9198_v26 = vpop.eup %9197  ;;  %v2067_v34 = vadd.f32 1.0, %v9196_v20  ;;  %v12928_v20 = vld [vmem:[#allocation82_spill] sm:$0xff] }
 0x286   : > { %9203 = vrcp.f32 %v2067_v34  ;;  %v12934_v34 = vld [vmem:[#allocation88_spill] sm:$0xff] }
 0x288   : > { %v9200_v63 = vpop.eup %9199 }
 0x289   : > { %v9202_v47 = vpop.eup %9201  ;;  %v2071_v15 = vmul.f32 %v9200_v63, %v9198_v26  ;;  %v12929_v26 = vld [vmem:[#allocation83_spill] sm:$0xff]  ;;  %v12931_v63 = vld [vmem:[#allocation85_spill] sm:$0xff] }
 0x28a   : > { %v2070_v9 = vmul.f32 %v9202_v47, %v332_v29  ;;  %v12930_v29 = vld [vmem:[#allocation84_spill] sm:$0xff]  ;;  %v12932_v47 = vld [vmem:[#allocation86_spill] sm:$0xff] }
 0x28c   : > { %v11308_v10 = vadd.f32 %v2071_v15, %v2070_v9  ;;  %v12933_v15 = vld [vmem:[#allocation87_spill] sm:$0xff]  ;;  %v12935_v9 = vld [vmem:[#allocation90_spill] sm:$0xff] }
 0x28e   : > { %9205 = vtanh.f32 %v11308_v10 }
 0x290   : > { %v9204_v23 = vpop.eup %9203 }
 0x298   : > { %v9206_v14 = vpop.eup %9205 }
 0x299   : > { %v2074_v46 = vmul.f32 %v9206_v14, %v9204_v23  ;;  %v12936_v23 = vld [vmem:[#allocation92_spill] sm:$0xff]  ;;  %v12937_v14 = vld [vmem:[#allocation93_spill] sm:$0xff] }
 0x29b   : > { %2075 = vst [vmem:[%s9696_s5] sm:$0xff] %v2074_v46  ;;  %v11312_v42 = vand.u32 4294901760, %v2074_v46 }
 0x29d   : > { %v11315_v62 = vsub.f32 %v2074_v46, %v11312_v42  ;;  %v12938_v46 = vld [vmem:[#allocation94_spill] sm:$0xff] }
 0x29f   : > { %v11318_v36 = vand.u32 4294901760, %v11315_v62 }
 0x2a1   : > { %v2185_v17 = vsub.f32 %v11315_v62, %v11318_v36 }
 0x2a3   : > { %v2186_v35 = vand.u32 4294901760, %v2185_v17  ;;  %v12939_v17 = vld [vmem:[#allocation95_spill] sm:$0xff] }
 0x2a5   : > { %2187 = vmatmul.mubr.f32.vlgmr.msra.gmra.mrb[2].mxu0 %v2186_v35  ;;  %3042 = vmatmul.mubr.f32.vlgmr.msra.gmra.mrb[2].mxu1 %v2186_v35  ;;  %v12940_v35 = vld [vmem:[#allocation96_spill] sm:$0xff] }
 0x2a6   : > { %7912 = vmatpush1.bf16.msra.mxu0 %v12926_v32  ;;  %8104 = vmatpush1.bf16.msra.mxu1 %v12927_v21 }
 0x2a7   : > { %7914 = vmatprep.subr.bf16.mxu0 %v12928_v20  ;;  %8106 = vmatprep.subr.bf16.mxu1 %v12929_v26 }
 0x2a8   : > { %2417 = vmatprep.mubr.f32.mxu0 %v12595_v2  ;;  %3272 = vmatprep.mubr.f32.mxu1 %v12595_v2 }
 0x2aa   : > { %7916 = vmatpush1.bf16.msra.mxu0 %v12930_v29  ;;  %8108 = vmatpush1.bf16.msra.mxu1 %v12931_v63  ;;  %v12941_v29 = vld [vmem:[#allocation97_spill] sm:$0xff]  ;;  %v12942_v63 = vld [vmem:[#allocation42_spill] sm:$0xff] }
 0x2ab   : > { %7918 = vmatprep.subr.bf16.mxu0 %v12932_v47  ;;  %8110 = vmatprep.subr.bf16.mxu1 %v12933_v15  ;;  %v12943_v47 = vld [vmem:[#allocation45_spill] sm:$0xff]  ;;  %v12944_v15 = vld [vmem:[#allocation46_spill] sm:$0xff] }
 0x2ae   : > { %7920 = vmatpush1.bf16.msra.mxu0 %v12934_v34  ;;  %8112 = vmatpush1.bf16.msra.mxu1 %v12935_v9  ;;  %v12945_v34 = vld [vmem:[#allocation47_spill] sm:$0xff]  ;;  %v12946_v9 = vld [vmem:[#allocation52_spill] sm:$0xff] }
 0x2af   : > { %7922 = vmatprep.subr.bf16.mxu0 %v12936_v23  ;;  %8114 = vmatprep.subr.bf16.mxu1 %v12937_v14  ;;  %v12947_v23 = vld [vmem:[#allocation99_spill] sm:$0xff]  ;;  %v12948_v14 = vld [vmem:[#allocation100_spill] sm:$0xff] }
 0x2b2   : > { %7924 = vmatpush1.bf16.msra.mxu0 %v12938_v46  ;;  %8116 = vmatpush1.bf16.msra.mxu1 %v12939_v17  ;;  %v12949_v46 = vld [vmem:[#allocation55_spill] sm:$0xff]  ;;  %v12950_v17 = vld [vmem:[#allocation102_spill] sm:$0xff] }
 0x2b3   : > { %7926 = vmatprep.subr.bf16.mxu0 %v12940_v35  ;;  %8118 = vmatprep.subr.bf16.mxu1 %v12941_v29  ;;  %v12951_v35 = vld [vmem:[#allocation59_spill] sm:$0xff] }
 0x2b4   : > { %v12952_v29 = vld [vmem:[#allocation103_spill] sm:$0xff] }
 0x2b6   : > { %7928 = vmatpush1.bf16.msra.mxu0 %v12942_v63  ;;  %8120 = vmatpush1.bf16.msra.mxu1 %v12943_v47  ;;  %v12953_v63 = vld [vmem:[#allocation104_spill] sm:$0xff]  ;;  %v12954_v47 = vld [vmem:[#allocation107_spill] sm:$0xff] }
 0x2b7   : > { %7930 = vmatprep.subr.bf16.mxu0 %v12944_v15  ;;  %8122 = vmatprep.subr.bf16.mxu1 %v12945_v34  ;;  %v12955_v15 = vld [vmem:[#allocation69_spill] sm:$0xff] }
 0x2b8   : > { %v12956_v34 = vld [vmem:[#allocation105_spill] sm:$0xff] }
 0x2ba   : > { %7932 = vmatpush1.bf16.msra.mxu0 %v12946_v9  ;;  %8124 = vmatpush1.bf16.msra.mxu1 %v12947_v23  ;;  %v12957_v9 = vld [vmem:[#allocation67_spill] sm:$0xff] }
 0x2bb   : > { %7934 = vmatprep.subr.bf16.mxu0 %v12948_v14  ;;  %8126 = vmatprep.subr.bf16.mxu1 %v12949_v46  ;;  %v12958_v46 = vld [vmem:[#allocation114_spill] sm:$0xff] }
 0x2be   : > { %7936 = vmatpush1.bf16.msra.mxu0 %v12950_v17  ;;  %8128 = vmatpush1.bf16.msra.mxu1 %v12951_v35  ;;  %v12959_v17 = vld [vmem:[#allocation116_spill] sm:$0xff]  ;;  %v12960_v35 = vld [vmem:[#allocation106_spill] sm:$0xff] }
 0x2bf   : > { %7938 = vmatprep.subr.bf16.mxu0 %v12952_v29  ;;  %8130 = vmatprep.subr.bf16.mxu1 %v12953_v63  ;;  %v12961_v29 = vld [vmem:[#allocation108_spill] sm:$0xff]  ;;  %v12966_v63 = vld [vmem:[#allocation113_spill] sm:$0xff] }
 0x2c2   : > { %7940 = vmatpush1.bf16.msra.mxu0 %v12954_v47  ;;  %8132 = vmatpush1.bf16.msra.mxu1 %v12955_v15  ;;  %v12962_v15 = vld [vmem:[#allocation109_spill] sm:$0xff]  ;;  %v12965_v47 = vld [vmem:[#allocation112_spill] sm:$0xff] }
 0x2c3   : > { %7942 = vmatprep.subr.bf16.mxu0 %v12956_v34  ;;  %8134 = vmatprep.subr.bf16.mxu1 %v12957_v9  ;;  %v12963_v34 = vld [vmem:[#allocation110_spill] sm:$0xff]  ;;  %v12964_v9 = vld [vmem:[#allocation111_spill] sm:$0xff] }
 0x2c5   : > { %2419 = vmatmul.mubr.f32.vlgmr.msra.gmra.mrb[2].mxu0 %v11312_v42  ;;  %3274 = vmatmul.mubr.f32.vlgmr.msra.gmra.mrb[2].mxu1 %v11312_v42 }
 0x2c6   : > { %7944 = vmatpush1.bf16.msra.mxu0 %v12958_v46  ;;  %8136 = vmatpush1.bf16.msra.mxu1 %v12959_v17  ;;  %v12967_v17 = vld [vmem:[#allocation118_spill] sm:$0xff] }
 0x2c7   : > { %7946 = vmatprep.subr.bf16.mxu0 %v12960_v35  ;;  %8138 = vmatprep.subr.bf16.mxu1 %v12961_v29 }
 0x2c8   : > { %2553 = vmatprep.mubr.f32.mxu0 %v12595_v2  ;;  %3408 = vmatprep.mubr.f32.mxu1 %v12595_v2 }
 0x2ca   : > { %7948 = vmatpush1.bf16.msra.mxu0 %v12962_v15  ;;  %8140 = vmatpush1.bf16.msra.mxu1 %v12963_v34  ;;  %v12968_v34 = vld [vmem:[#allocation131_spill] sm:$0xff] }
 0x2cb   : > { %7950 = vmatprep.subr.bf16.mxu0 %v12964_v9  ;;  %8142 = vmatprep.subr.bf16.mxu1 %v12965_v47  ;;  %v12969_v9 = vld [vmem:[#allocation134_spill] sm:$0xff]  ;;  %v12970_v47 = vld [vmem:[#allocation133_spill] sm:$0xff] }
 0x2ce   : > { %7952 = vmatpush1.bf16.msra.mxu0 %v12966_v63  ;;  %8144 = vmatpush1.bf16.msra.mxu1 %v10837_v60  ;;  %v12971_v63 = vld [vmem:[#allocation136_spill] sm:$0xff]  ;;  %v12972_v60 = vld [vmem:[#allocation135_spill] sm:$0xff] }
 0x2cf   : > { %7954 = vmatprep.subr.bf16.mxu0 %v12967_v17  ;;  %8146 = vmatprep.subr.bf16.mxu1 %v10867_v27  ;;  %v12973_v17 = vld [vmem:[#allocation138_spill] sm:$0xff]  ;;  %v12974_v27 = vld [vmem:[#allocation137_spill] sm:$0xff] }
 0x2d2   : > { %7956 = vmatpush1.bf16.msra.mxu0 %v10871_v41  ;;  %8148 = vmatpush1.bf16.msra.mxu1 %v11034_v58  ;;  %v12975_v41 = vld [vmem:[#allocation140_spill] sm:$0xff]  ;;  %v12976_v58 = vld [vmem:[#allocation139_spill] sm:$0xff] }
 0x2d3   : > { %7958 = vmatprep.subr.bf16.mxu0 %v10877_v16  ;;  %8150 = vmatprep.subr.bf16.mxu1 %v11044_v18  ;;  %v12977_v16 = vld [vmem:[#allocation142_spill] sm:$0xff]  ;;  %v12978_v18 = vld [vmem:[#allocation141_spill] sm:$0xff] }
 0x2d6   : > { %7960 = vmatpush1.bf16.msra.mxu0 %v12968_v34  ;;  %8152 = vmatpush1.bf16.msra.mxu1 %v12969_v9  ;;  %v12979_v34 = vld [vmem:[#allocation144_spill] sm:$0xff]  ;;  %v12980_v9 = vld [vmem:[#allocation143_spill] sm:$0xff] }
 0x2d7   : > { %7962 = vmatprep.subr.bf16.mxu0 %v12970_v47  ;;  %8154 = vmatprep.subr.bf16.mxu1 %v12971_v63  ;;  %v12981_v47 = vld [vmem:[#allocation117_spill] sm:$0xff] }
 0x2da   : > { %7964 = vmatpush1.bf16.msra.mxu0 %v12972_v60  ;;  %8156 = vmatpush1.bf16.msra.mxu1 %v12973_v17 }
 0x2db   : > { %7966 = vmatprep.subr.bf16.mxu0 %v12974_v27  ;;  %8158 = vmatprep.subr.bf16.mxu1 %v12975_v41 }
 0x2de   : > { %7968 = vmatpush1.bf16.msra.mxu0 %v12976_v58  ;;  %8160 = vmatpush1.bf16.msra.mxu1 %v12977_v16 }
 0x2df   : > { %7970 = vmatprep.subr.bf16.mxu0 %v12978_v18  ;;  %8162 = vmatprep.subr.bf16.mxu1 %v12979_v34  ;;  %v12992_v34 = vld [vmem:[#allocation91_spill] sm:$0xff] }
 0x2e2   : > { %7972 = vmatpush1.bf16.msra.mxu0 %v12980_v9  ;;  %8164 = vmatpush1.bf16.msra.mxu1 %v12981_v47  ;;  %v12983_v47 = vld [vmem:[#allocation71_spill] sm:$0xff]  ;;  %v12991_v9 = vld [vmem:[#allocation89_spill] sm:$0xff] }
 0x2e3   : > { %7974 = vmatprep.subr.bf16.mxu0 %v12843_v8  ;;  %8166 = vmatprep.subr.bf16.mxu1 %v12846_v56 }
 0x2e5   : > { %2556 = vmatmul.mubr.f32.vlgmr.msra.gmra.mrb[2].mxu0 %v11315_v62  ;;  %3411 = vmatmul.mubr.f32.vlgmr.msra.gmra.mrb[2].mxu1 %v11315_v62  ;;  %v12982_v62 = vld [vmem:[#allocation17_spill] sm:$0xff] }
 0x2e6   : > { %7976 = vmatpush1.bf16.msra.mxu0 %v12845_v30  ;;  %8168 = vmatpush1.bf16.msra.mxu1 %v12848_v50 }
 0x2e7   : > { %7978 = vmatprep.subr.bf16.mxu0 %v12847_v4  ;;  %8170 = vmatprep.subr.bf16.mxu1 %v12850_v22 }
 0x2e8   : > { %2658 = vmatprep.mubr.f32.mxu0 %v12595_v2  ;;  %3513 = vmatprep.mubr.f32.mxu1 %v12595_v2 }
 0x2ea   : > { %7980 = vmatpush1.bf16.msra.mxu0 %v12849_v40  ;;  %8172 = vmatpush1.bf16.msra.mxu1 %v12852_v13 }
 0x2eb   : > { %7982 = vmatprep.subr.bf16.mxu0 %v12851_v31  ;;  %8174 = vmatprep.subr.bf16.mxu1 %v12854_v19 }
 0x2ee   : > { %7984 = vmatpush1.bf16.msra.mxu0 %v12853_v39  ;;  %8176 = vmatpush1.bf16.msra.mxu1 %v12856_v3 }
 0x2ef   : > { %7986 = vmatprep.subr.bf16.mxu0 %v12855_v57  ;;  %8178 = vmatprep.subr.bf16.mxu1 %v12858_v52 }
 0x2f2   : > { %7988 = vmatpush1.bf16.msra.mxu0 %v12857_v45  ;;  %8180 = vmatpush1.bf16.msra.mxu1 %v12860_v28 }
 0x2f3   : > { %7990 = vmatprep.subr.bf16.mxu0 %v12859_v43  ;;  %8182 = vmatprep.subr.bf16.mxu1 %v12862_v0 }
 0x2f6   : > { %7992 = vmatpush1.bf16.msra.mxu0 %v12861_v24  ;;  %8184 = vmatpush1.bf16.msra.mxu1 %v12864_v44 }
 0x2f7   : > { %7994 = vmatprep.subr.bf16.mxu0 %v12863_v61  ;;  %8186 = vmatprep.subr.bf16.mxu1 %v12866_v12 }
 0x2fa   : > { %7996 = vmatpush1.bf16.msra.mxu0 %v12865_v37  ;;  %8188 = vmatpush1.bf16.msra.mxu1 %v12868_v59 }
 0x2fb   : > { %7998 = vmatprep.subr.bf16.mxu0 %v12867_v38  ;;  %8190 = vmatprep.subr.bf16.mxu1 %v12870_v11 }
 0x2fe   : > { %8000 = vmatpush1.bf16.msra.mxu0 %v12869_v55  ;;  %8192 = vmatpush1.bf16.msra.mxu1 %v12875_v51 }
 0x2ff   : > { %8002 = vmatprep.subr.bf16.mxu0 %v12871_v5  ;;  %8194 = vmatprep.subr.bf16.mxu1 %v12880_v1 }
 0x302   : > { %8004 = vmatpush1.bf16.msra.mxu0 %v12876_v48  ;;  %8196 = vmatpush1.bf16.msra.mxu1 %v12888_v7 }
 0x303   : > { %8006 = vmatprep.subr.bf16.mxu0 %v12982_v62  ;;  %8198 = vmatprep.subr.bf16.mxu1 %v11162_v33  ;;  %v12984_v33 = vld [vmem:[#allocation122_spill] sm:$0xff]  ;;  %v12985_v62 = vld [vmem:[#allocation123_spill] sm:$0xff] }
 0x305   : > { %2662 = vmatmul.mubr.f32.vlgmr.msra.gmra.mrb[2].mxu0 %v11318_v36  ;;  %3517 = vmatmul.mubr.f32.vlgmr.msra.gmra.mrb[2].mxu1 %v11318_v36  ;;  %v12986_v36 = vld [vmem:[#allocation124_spill] sm:$0xff] }
 0x306   : > { %8008 = vmatpush1.bf16.msra.mxu0 %v12983_v47  ;;  %8200 = vmatpush1.bf16.msra.mxu1 %v11177_v6  ;;  %v12987_v47 = vld [vmem:[#allocation125_spill] sm:$0xff]  ;;  %v12988_v6 = vld [vmem:[#allocation126_spill] sm:$0xff] }
 0x307   : > { %8010 = vmatprep.subr.bf16.mxu0 %v11168_v25  ;;  %8202 = vmatprep.subr.bf16.mxu1 %v11191_v54  ;;  %v12989_v25 = vld [vmem:[#allocation127_spill] sm:$0xff]  ;;  %v12990_v54 = vld [vmem:[#allocation128_spill] sm:$0xff] }
 0x308   : > { %2828 = vmatprep.mubr.f32.mxu0 %v12595_v2  ;;  %3683 = vmatprep.mubr.f32.mxu1 %v12595_v2 }
 0x30a   : > { %8012 = vmatpush1.bf16.msra.mxu0 %v11183_v49  ;;  %8204 = vmatpush1.bf16.msra.mxu1 %v11201_v53  ;;  %v12993_v49 = vld [vmem:[#allocation29_spill] sm:$0xff]  ;;  %v12994_v53 = vld [vmem:[#allocation30_spill] sm:$0xff] }
 0x30b   : > { %8014 = vmatprep.subr.bf16.mxu0 %v12984_v33  ;;  %8206 = vmatprep.subr.bf16.mxu1 %v12985_v62  ;;  %v12995_v33 = vld [vmem:[#allocation32_spill] sm:$0xff]  ;;  %v12996_v62 = vld [vmem:[#allocation33_spill] sm:$0xff] }
 0x30e   : > { %8016 = vmatpush1.bf16.msra.mxu0 %v12986_v36  ;;  %8208 = vmatpush1.bf16.msra.mxu1 %v12987_v47  ;;  %v12997_v36 = vld [vmem:[#allocation34_spill] sm:$0xff]  ;;  %v12998_v47 = vld [vmem:[#allocation37_spill] sm:$0xff] }
 0x30f   : > { %8018 = vmatprep.subr.bf16.mxu0 %v12988_v6  ;;  %8210 = vmatprep.subr.bf16.mxu1 %v12989_v25  ;;  %v12999_v6 = vld [vmem:[#allocation38_spill] sm:$0xff]  ;;  %v13000_v25 = vld [vmem:[#allocation39_spill] sm:$0xff] }
 0x312   : > { %8020 = vmatpush1.bf16.msra.mxu0 %v12990_v54  ;;  %8212 = vmatpush1.bf16.msra.mxu1 %v12991_v9  ;;  %v13001_v54 = vld [vmem:[#allocation41_spill] sm:$0xff]  ;;  %v13002_v9 = vld [vmem:[#allocation43_spill] sm:$0xff] }
 0x313   : > { %8022 = vmatprep.subr.bf16.mxu0 %v12992_v34  ;;  %8214 = vmatprep.subr.bf16.mxu1 %v12993_v49  ;;  %v13003_v34 = vld [vmem:[#allocation50_spill] sm:$0xff] }
 0x314   : > { %v13004_v49 = vld [vmem:[#allocation98_spill] sm:$0xff] }
 0x316   : > { %8024 = vmatpush1.bf16.msra.mxu0 %v12994_v53  ;;  %8216 = vmatpush1.bf16.msra.mxu1 %v12995_v33  ;;  %v13005_v53 = vld [vmem:[#allocation53_spill] sm:$0xff] }
 0x317   : > { %8026 = vmatprep.subr.bf16.mxu0 %v12996_v62  ;;  %8218 = vmatprep.subr.bf16.mxu1 %v12997_v36  ;;  %v13006_v33 = vld [vmem:[#allocation101_spill] sm:$0xff] }
 0x318   : > { %v13007_v62 = vld [vmem:[#allocation129_spill] sm:$0xff] }
 0x31a   : > { %8028 = vmatpush1.bf16.msra.mxu0 %v12998_v47  ;;  %8220 = vmatpush1.bf16.msra.mxu1 %v12999_v6 }
 0x31b   : > { %8030 = vmatprep.subr.bf16.mxu0 %v13000_v25  ;;  %8222 = vmatprep.subr.bf16.mxu1 %v13001_v54 }
 0x31e   : > { %8032 = vmatpush1.bf16.msra.mxu0 %v13002_v9  ;;  %8224 = vmatpush1.bf16.msra.mxu1 %v13003_v34 }
 0x31f   : > { %8034 = vmatprep.subr.bf16.mxu0 %v13004_v49  ;;  %8226 = vmatprep.subr.bf16.mxu1 %v13005_v53  ;;  %v7462_v53 = vld [vmem:[%s9681_s30 + $0x28] sm:$0xff] }
 0x322   : > { %8036 = vmatpush1.bf16.msra.mxu0 %v13006_v33  ;;  %8228 = vmatpush1.bf16.msra.mxu1 %v13007_v62  ;;  %v13009_v62 = vld [vmem:[#allocation74_spill] sm:$0xff]  ;;  %v7461_v33 = vld [vmem:[%s9681_s30 + $0x20] sm:$0xff] }
 0x323   : > { %8038 = vmatprep.subr.bf16.mxu0 %v12843_v8  ;;  %8230 = vmatprep.subr.bf16.mxu1 %v12846_v56 }
 0x325   : > { %2830 = vmatmul.mubr.f32.vlgmr.msra.gmra.mrb[2].mxu0 %v11312_v42  ;;  %3685 = vmatmul.mubr.f32.vlgmr.msra.gmra.mrb[2].mxu1 %v11312_v42 }
 0x326   : > { %8040 = vmatpush1.bf16.msra.mxu0 %v12845_v30  ;;  %8232 = vmatpush1.bf16.msra.mxu1 %v12848_v50 }
 0x327   : > { %8042 = vmatprep.subr.bf16.mxu0 %v12847_v4  ;;  %8234 = vmatprep.subr.bf16.mxu1 %v12850_v22 }
 0x328   : > { %2932 = vmatprep.mubr.f32.mxu0 %v12595_v2  ;;  %3787 = vmatprep.mubr.f32.mxu1 %v12595_v2 }
 0x32a   : > { %8044 = vmatpush1.bf16.msra.mxu0 %v12849_v40  ;;  %8236 = vmatpush1.bf16.msra.mxu1 %v12852_v13 }
 0x32b   : > { %8046 = vmatprep.subr.bf16.mxu0 %v12851_v31  ;;  %8238 = vmatprep.subr.bf16.mxu1 %v12854_v19 }
 0x32e   : > { %8048 = vmatpush1.bf16.msra.mxu0 %v12853_v39  ;;  %8240 = vmatpush1.bf16.msra.mxu1 %v12856_v3 }
 0x32f   : > { %8050 = vmatprep.subr.bf16.mxu0 %v12855_v57  ;;  %8242 = vmatprep.subr.bf16.mxu1 %v12858_v52 }
 0x332   : > { %8052 = vmatpush1.bf16.msra.mxu0 %v12857_v45  ;;  %8244 = vmatpush1.bf16.msra.mxu1 %v12860_v28 }
 0x333   : > { %8054 = vmatprep.subr.bf16.mxu0 %v12859_v43  ;;  %8246 = vmatprep.subr.bf16.mxu1 %v12862_v0 }
 0x336   : > { %8056 = vmatpush1.bf16.msra.mxu0 %v12861_v24  ;;  %8248 = vmatpush1.bf16.msra.mxu1 %v12864_v44 }
 0x337   : > { %8058 = vmatprep.subr.bf16.mxu0 %v12863_v61  ;;  %8250 = vmatprep.subr.bf16.mxu1 %v12866_v12 }
 0x33a   : > { %8060 = vmatpush1.bf16.msra.mxu0 %v12865_v37  ;;  %8252 = vmatpush1.bf16.msra.mxu1 %v12868_v59 }
 0x33b   : > { %8062 = vmatprep.subr.bf16.mxu0 %v12867_v38  ;;  %8254 = vmatprep.subr.bf16.mxu1 %v12870_v11 }
 0x33e   : > { %8064 = vmatpush1.bf16.msra.mxu0 %v12869_v55  ;;  %8256 = vmatpush1.bf16.msra.mxu1 %v12875_v51 }
 0x33f   : > { %8066 = vmatprep.subr.bf16.mxu0 %v12871_v5  ;;  %8258 = vmatprep.subr.bf16.mxu1 %v12880_v1 }
 0x342   : > { %8068 = vmatpush1.bf16.msra.mxu0 %v12876_v48  ;;  %8260 = vmatpush1.bf16.msra.mxu1 %v12888_v7 }
 0x343   : > { %8262 = vmatprep.subr.bf16.mxu0 %v12843_v8  ;;  %8454 = vmatprep.subr.bf16.mxu1 %v12846_v56 }
 0x345   : > { %2934 = vmatmul.mubr.f32.vlgmr.msra.gmra.mrb[2].mxu0 %v11312_v42  ;;  %3789 = vmatmul.mubr.f32.vlgmr.msra.gmra.mrb[2].mxu1 %v11312_v42  ;;  %v13008_v42 = vld [vmem:[#allocation73_spill] sm:$0xff] }
 0x346   : > { %8264 = vmatpush1.bf16.msra.mxu0 %v12845_v30  ;;  %8456 = vmatpush1.bf16.msra.mxu1 %v12848_v50 }
 0x347   : > { %8266 = vmatprep.subr.bf16.mxu0 %v12847_v4  ;;  %8458 = vmatprep.subr.bf16.mxu1 %v12850_v22 }
 0x348   : > { %3930 = vmatprep.mubr.f32.mxu0 %v12595_v2  ;;  %4785 = vmatprep.mubr.f32.mxu1 %v12595_v2 }
 0x34a   : > { %8268 = vmatpush1.bf16.msra.mxu0 %v12849_v40  ;;  %8460 = vmatpush1.bf16.msra.mxu1 %v12852_v13 }
 0x34b   : > { %8270 = vmatprep.subr.bf16.mxu0 %v12851_v31  ;;  %8462 = vmatprep.subr.bf16.mxu1 %v12854_v19 }
 0x34e   : > { %8272 = vmatpush1.bf16.msra.mxu0 %v12853_v39  ;;  %8464 = vmatpush1.bf16.msra.mxu1 %v12856_v3 }
 0x34f   : > { %8274 = vmatprep.subr.bf16.mxu0 %v12855_v57  ;;  %8466 = vmatprep.subr.bf16.mxu1 %v12858_v52 }
 0x352   : > { %8276 = vmatpush1.bf16.msra.mxu0 %v12857_v45  ;;  %8468 = vmatpush1.bf16.msra.mxu1 %v12860_v28 }
 0x353   : > { %8278 = vmatprep.subr.bf16.mxu0 %v12859_v43  ;;  %8470 = vmatprep.subr.bf16.mxu1 %v12862_v0 }
 0x356   : > { %8280 = vmatpush1.bf16.msra.mxu0 %v12861_v24  ;;  %8472 = vmatpush1.bf16.msra.mxu1 %v12864_v44 }
 0x357   : > { %8282 = vmatprep.subr.bf16.mxu0 %v12863_v61  ;;  %8474 = vmatprep.subr.bf16.mxu1 %v12866_v12 }
 0x35a   : > { %8284 = vmatpush1.bf16.msra.mxu0 %v12865_v37  ;;  %8476 = vmatpush1.bf16.msra.mxu1 %v12868_v59 }
 0x35b   : > { %8286 = vmatprep.subr.bf16.mxu0 %v12867_v38  ;;  %8478 = vmatprep.subr.bf16.mxu1 %v12870_v11 }
 0x35e   : > { %8288 = vmatpush1.bf16.msra.mxu0 %v12869_v55  ;;  %8480 = vmatpush1.bf16.msra.mxu1 %v12875_v51 }
 0x35f   : > { %8290 = vmatprep.subr.bf16.mxu0 %v12871_v5  ;;  %8482 = vmatprep.subr.bf16.mxu1 %v12880_v1  ;;  %v7464_v1 = vld [vmem:[%s9681_s30 + $0x38] sm:$0xff] }
 0x362   : > { %8292 = vmatpush1.bf16.msra.mxu0 %v12876_v48  ;;  %8484 = vmatpush1.bf16.msra.mxu1 %v12888_v7  ;;  %v7463_v7 = vld [vmem:[%s9681_s30 + $0x30] sm:$0xff] }
 0x363   : > { %8294 = vmatprep.subr.bf16.mxu0 %v13008_v42  ;;  %8486 = vmatprep.subr.bf16.mxu1 %v13009_v62 }
 0x418   : > { %v2935_v49 = vpop.f32.mrb[2].mxu0  ;;  %v3790_v34 = vpop.f32.mrb[2].mxu1 }
 0x419   : > { %v3795_v9 = vadd.f32 %v7461_v33, %v2935_v49  ;;  %v2937_v54 = vpop.f32.mrb[3].mxu0  ;;  %v3792_v25 = vpop.f32.mrb[3].mxu1  ;;  %v3797_v42 = vadd.f32 %v7463_v7, %v3790_v34 }
 0x41a   : > { %v3796_v6 = vadd.f32 %v7462_v53, %v2937_v54  ;;  %v3798_v48 = vadd.f32 %v7464_v1, %v3792_v25 }
 0x41b   : > { %v7465_v47 = vmul.f32 -1.442695, %v3795_v9  ;;  %v13010_v9 = vld [vmem:[#allocation84_spill] sm:$0xff] }
 0x41c   : > { %v7466_v36 = vmul.f32 -1.442695, %v3796_v6  ;;  %v7467_v5 = vmul.f32 -1.442695, %v3798_v48 }
 0x41d   : > { %9207 = vpow2.f32 %v7465_v47 }
 0x41e   : > { %9209 = vpow2.f32 %v7466_v36  ;;  %v13012_v36 = vld [vmem:[#allocation86_spill] sm:$0xff] }
 0x41f   : > { %9211 = vpow2.f32 %v7467_v5 }
 0x420   : > { %9213 = vtanh.f32 %v3797_v42  ;;  %v13013_v42 = vld [vmem:[#allocation87_spill] sm:$0xff] }
 0x427   : > { %v9208_v51 = vpop.eup %9207 }
 0x428   : > { %v9210_v55 = vpop.eup %9209  ;;  %v3802_v62 = vadd.f32 1.0, %v9208_v51 }
 0x429   : > { %v3808_v11 = vadd.f32 1.0, %v9210_v55  ;;  %v9212_v33 = vpop.eup %9211 }
 0x42a   : > { %9215 = vrcp.f32 %v3802_v62  ;;  %v9214_v54 = vpop.eup %9213  ;;  %v3815_v47 = vadd.f32 1.0, %v9212_v33  ;;  %v13011_v62 = vld [vmem:[#allocation85_spill] sm:$0xff]  ;;  %v13014_v33 = vld [vmem:[#allocation88_spill] sm:$0xff] }
 0x42b   : > { %9217 = vrcp.f32 %v3808_v11 }
 0x42c   : > { %9219 = vrcp.f32 %v3815_v47  ;;  %v13019_v47 = vld [vmem:[#allocation95_spill] sm:$0xff] }
 0x434   : > { %v9216_v49 = vpop.eup %9215 }
 0x435   : > { %v9218_v6 = vpop.eup %9217  ;;  %v3819_v53 = vmul.f32 %v9216_v49, %v9214_v54  ;;  %v13015_v54 = vld [vmem:[#allocation90_spill] sm:$0xff]  ;;  %v13016_v49 = vld [vmem:[#allocation92_spill] sm:$0xff] }
 0x436   : > { %v3818_v25 = vmul.f32 %v9218_v6, %v11308_v10  ;;  %v9220_v48 = vpop.eup %9219  ;;  %v13017_v6 = vld [vmem:[#allocation93_spill] sm:$0xff] }
 0x438   : > { %v11541_v1 = vadd.f32 %v3819_v53, %v3818_v25  ;;  %v13018_v53 = vld [vmem:[#allocation94_spill] sm:$0xff]  ;;  %v13020_v25 = vld [vmem:[#allocation96_spill] sm:$0xff] }
 0x43a   : > { %9221 = vtanh.f32 %v11541_v1 }
 0x444   : > { %v9222_v51 = vpop.eup %9221 }
 0x445   : > { %v3822_v5 = vmul.f32 %v9222_v51, %v9220_v48  ;;  %v13021_v48 = vld [vmem:[#allocation97_spill] sm:$0xff]  ;;  %v13022_v51 = vld [vmem:[#allocation42_spill] sm:$0xff] }
 0x447   : > { %7468 = vst [vmem:[%s9696_s5 + $0x8] sm:$0xff] %v3822_v5  ;;  %v11545_v55 = vand.u32 4294901760, %v3822_v5 }
 0x449   : > { %v11548_v11 = vsub.f32 %v3822_v5, %v11545_v55  ;;  %v13023_v5 = vld [vmem:[#allocation45_spill] sm:$0xff] }
 0x44b   : > { %v11551_v7 = vand.u32 4294901760, %v11548_v11 }
 0x44d   : > { %v3934_v10 = vsub.f32 %v11548_v11, %v11551_v7 }
 0x44f   : > { %v3935_v34 = vand.u32 4294901760, %v3934_v10  ;;  %v13024_v10 = vld [vmem:[#allocation46_spill] sm:$0xff] }
 0x451   : > { %3936 = vmatmul.mubr.f32.vlgmr.msra.gmra.mrb[4].mxu0 %v3935_v34  ;;  %4791 = vmatmul.mubr.f32.vlgmr.msra.gmra.mrb[4].mxu1 %v3935_v34  ;;  %v13025_v34 = vld [vmem:[#allocation47_spill] sm:$0xff] }
 0x452   : > { %8296 = vmatpush1.bf16.msra.mxu0 %v12926_v32  ;;  %8488 = vmatpush1.bf16.msra.mxu1 %v12927_v21 }
 0x453   : > { %8298 = vmatprep.subr.bf16.mxu0 %v12928_v20  ;;  %8490 = vmatprep.subr.bf16.mxu1 %v12929_v26 }
 0x454   : > { %4166 = vmatprep.mubr.f32.mxu0 %v12595_v2  ;;  %5021 = vmatprep.mubr.f32.mxu1 %v12595_v2 }
 0x456   : > { %8300 = vmatpush1.bf16.msra.mxu0 %v13010_v9  ;;  %8492 = vmatpush1.bf16.msra.mxu1 %v13011_v62 }
 0x457   : > { %8302 = vmatprep.subr.bf16.mxu0 %v13012_v36  ;;  %8494 = vmatprep.subr.bf16.mxu1 %v13013_v42 }
 0x45a   : > { %8304 = vmatpush1.bf16.msra.mxu0 %v13014_v33  ;;  %8496 = vmatpush1.bf16.msra.mxu1 %v13015_v54  ;;  %v13026_v54 = vld [vmem:[#allocation52_spill] sm:$0xff] }
 0x45b   : > { %8306 = vmatprep.subr.bf16.mxu0 %v13016_v49  ;;  %8498 = vmatprep.subr.bf16.mxu1 %v13017_v6 }
 0x45e   : > { %8308 = vmatpush1.bf16.msra.mxu0 %v13018_v53  ;;  %8500 = vmatpush1.bf16.msra.mxu1 %v13019_v47  ;;  %v13027_v53 = vld [vmem:[#allocation55_spill] sm:$0xff]  ;;  %v13028_v47 = vld [vmem:[#allocation102_spill] sm:$0xff] }
 0x45f   : > { %8310 = vmatprep.subr.bf16.mxu0 %v13020_v25  ;;  %8502 = vmatprep.subr.bf16.mxu1 %v13021_v48  ;;  %v13029_v25 = vld [vmem:[#allocation59_spill] sm:$0xff] }
 0x460   : > { %v13030_v48 = vld [vmem:[#allocation103_spill] sm:$0xff] }
 0x462   : > { %8312 = vmatpush1.bf16.msra.mxu0 %v13022_v51  ;;  %8504 = vmatpush1.bf16.msra.mxu1 %v13023_v5  ;;  %v13031_v51 = vld [vmem:[#allocation104_spill] sm:$0xff]  ;;  %v13032_v5 = vld [vmem:[#allocation107_spill] sm:$0xff] }
 0x463   : > { %8314 = vmatprep.subr.bf16.mxu0 %v13024_v10  ;;  %8506 = vmatprep.subr.bf16.mxu1 %v13025_v34  ;;  %v13033_v10 = vld [vmem:[#allocation69_spill] sm:$0xff] }
 0x464   : > { %v13034_v34 = vld [vmem:[#allocation105_spill] sm:$0xff] }
 0x466   : > { %8316 = vmatpush1.bf16.msra.mxu0 %v13026_v54  ;;  %8508 = vmatpush1.bf16.msra.mxu1 %v12947_v23  ;;  %v13035_v54 = vld [vmem:[#allocation67_spill] sm:$0xff] }
 0x467   : > { %8318 = vmatprep.subr.bf16.mxu0 %v12948_v14  ;;  %8510 = vmatprep.subr.bf16.mxu1 %v13027_v53 }
 0x46a   : > { %8320 = vmatpush1.bf16.msra.mxu0 %v13028_v47  ;;  %8512 = vmatpush1.bf16.msra.mxu1 %v13029_v25  ;;  %v13036_v47 = vld [vmem:[#allocation116_spill] sm:$0xff] }
 0x46b   : > { %8322 = vmatprep.subr.bf16.mxu0 %v13030_v48  ;;  %8514 = vmatprep.subr.bf16.mxu1 %v13031_v51  ;;  %v13045_v51 = vld [vmem:[#allocation130_spill] sm:$0xff]  ;;  %v13046_v48 = vld [vmem:[#allocation121_spill] sm:$0xff] }
 0x46e   : > { %8324 = vmatpush1.bf16.msra.mxu0 %v13032_v5  ;;  %8516 = vmatpush1.bf16.msra.mxu1 %v13033_v10  ;;  %v13039_v10 = vld [vmem:[#allocation112_spill] sm:$0xff]  ;;  %v13040_v5 = vld [vmem:[#allocation113_spill] sm:$0xff] }
 0x46f   : > { %8326 = vmatprep.subr.bf16.mxu0 %v13034_v34  ;;  %8518 = vmatprep.subr.bf16.mxu1 %v13035_v54  ;;  %v13037_v34 = vld [vmem:[#allocation110_spill] sm:$0xff]  ;;  %v13038_v54 = vld [vmem:[#allocation111_spill] sm:$0xff] }
 0x471   : > { %4168 = vmatmul.mubr.f32.vlgmr.msra.gmra.mrb[4].mxu0 %v11545_v55  ;;  %5023 = vmatmul.mubr.f32.vlgmr.msra.gmra.mrb[4].mxu1 %v11545_v55 }
 0x472   : > { %8328 = vmatpush1.bf16.msra.mxu0 %v12958_v46  ;;  %8520 = vmatpush1.bf16.msra.mxu1 %v13036_v47  ;;  %v13041_v46 = vld [vmem:[#allocation115_spill] sm:$0xff]  ;;  %v13042_v47 = vld [vmem:[#allocation118_spill] sm:$0xff] }
 0x473   : > { %8330 = vmatprep.subr.bf16.mxu0 %v12960_v35  ;;  %8522 = vmatprep.subr.bf16.mxu1 %v12961_v29  ;;  %v13043_v35 = vld [vmem:[#allocation119_spill] sm:$0xff]  ;;  %v13044_v29 = vld [vmem:[#allocation120_spill] sm:$0xff] }
 0x474   : > { %4302 = vmatprep.mubr.f32.mxu0 %v12595_v2  ;;  %5157 = vmatprep.mubr.f32.mxu1 %v12595_v2 }
 0x476   : > { %8332 = vmatpush1.bf16.msra.mxu0 %v12962_v15  ;;  %8524 = vmatpush1.bf16.msra.mxu1 %v13037_v34  ;;  %v13047_v15 = vld [vmem:[#allocation132_spill] sm:$0xff]  ;;  %v13048_v34 = vld [vmem:[#allocation131_spill] sm:$0xff] }
 0x477   : > { %8334 = vmatprep.subr.bf16.mxu0 %v13038_v54  ;;  %8526 = vmatprep.subr.bf16.mxu1 %v13039_v10  ;;  %v13049_v54 = vld [vmem:[#allocation134_spill] sm:$0xff]  ;;  %v13050_v10 = vld [vmem:[#allocation133_spill] sm:$0xff] }
 0x47a   : > { %8336 = vmatpush1.bf16.msra.mxu0 %v13040_v5  ;;  %8528 = vmatpush1.bf16.msra.mxu1 %v13041_v46 }
 0x47b   : > { %8338 = vmatprep.subr.bf16.mxu0 %v13042_v47  ;;  %8530 = vmatprep.subr.bf16.mxu1 %v13043_v35  ;;  %v13077_v35 = vld [vmem:[#allocation91_spill] sm:$0xff] }
 0x47e   : > { %8340 = vmatpush1.bf16.msra.mxu0 %v13044_v29  ;;  %8532 = vmatpush1.bf16.msra.mxu1 %v13045_v51  ;;  %v13070_v51 = vld [vmem:[#allocation123_spill] sm:$0xff]  ;;  %v13076_v29 = vld [vmem:[#allocation89_spill] sm:$0xff] }
 0x47f   : > { %8342 = vmatprep.subr.bf16.mxu0 %v13046_v48  ;;  %8534 = vmatprep.subr.bf16.mxu1 %v13047_v15  ;;  %v13066_v15 = vld [vmem:[#allocation23_spill] sm:$0xff]  ;;  %v13067_v48 = vld [vmem:[#allocation20_spill] sm:$0xff] }
 0x482   : > { %8344 = vmatpush1.bf16.msra.mxu0 %v13048_v34  ;;  %8536 = vmatpush1.bf16.msra.mxu1 %v13049_v54  ;;  %v13051_v34 = vld [vmem:[#allocation144_spill] sm:$0xff]  ;;  %v13052_v54 = vld [vmem:[#allocation143_spill] sm:$0xff] }
 0x483   : > { %8346 = vmatprep.subr.bf16.mxu0 %v13050_v10  ;;  %8538 = vmatprep.subr.bf16.mxu1 %v12971_v63  ;;  %v13053_v10 = vld [vmem:[#allocation117_spill] sm:$0xff]  ;;  %v13065_v63 = vld [vmem:[#allocation18_spill] sm:$0xff] }
 0x486   : > { %8348 = vmatpush1.bf16.msra.mxu0 %v12972_v60  ;;  %8540 = vmatpush1.bf16.msra.mxu1 %v12973_v17  ;;  %v13063_v17 = vld [vmem:[#allocation71_spill] sm:$0xff]  ;;  %v13064_v60 = vld [vmem:[#allocation21_spill] sm:$0xff] }
 0x487   : > { %8350 = vmatprep.subr.bf16.mxu0 %v12974_v27  ;;  %8542 = vmatprep.subr.bf16.mxu1 %v12975_v41  ;;  %v13061_v41 = vld [vmem:[#allocation17_spill] sm:$0xff]  ;;  %v13062_v27 = vld [vmem:[#allocation19_spill] sm:$0xff] }
 0x48a   : > { %8352 = vmatpush1.bf16.msra.mxu0 %v12976_v58  ;;  %8544 = vmatpush1.bf16.msra.mxu1 %v12977_v16  ;;  %v13059_v16 = vld [vmem:[#allocation66_spill] sm:$0xff]  ;;  %v13060_v58 = vld [vmem:[#allocation68_spill] sm:$0xff] }
 0x48b   : > { %8354 = vmatprep.subr.bf16.mxu0 %v12978_v18  ;;  %8546 = vmatprep.subr.bf16.mxu1 %v13051_v34  ;;  %v13057_v34 = vld [vmem:[#allocation64_spill] sm:$0xff]  ;;  %v13058_v18 = vld [vmem:[#allocation65_spill] sm:$0xff] }
 0x48e   : > { %8356 = vmatpush1.bf16.msra.mxu0 %v13052_v54  ;;  %8548 = vmatpush1.bf16.msra.mxu1 %v13053_v10  ;;  %v13055_v10 = vld [vmem:[#allocation62_spill] sm:$0xff]  ;;  %v13056_v54 = vld [vmem:[#allocation63_spill] sm:$0xff] }
 0x48f   : > { %8358 = vmatprep.subr.bf16.mxu0 %v12843_v8  ;;  %8550 = vmatprep.subr.bf16.mxu1 %v12846_v56 }
 0x491   : > { %4305 = vmatmul.mubr.f32.vlgmr.msra.gmra.mrb[4].mxu0 %v11548_v11  ;;  %5160 = vmatmul.mubr.f32.vlgmr.msra.gmra.mrb[4].mxu1 %v11548_v11  ;;  %v13054_v11 = vld [vmem:[#allocation61_spill] sm:$0xff] }
 0x492   : > { %8360 = vmatpush1.bf16.msra.mxu0 %v12845_v30  ;;  %8552 = vmatpush1.bf16.msra.mxu1 %v12848_v50 }
 0x493   : > { %8362 = vmatprep.subr.bf16.mxu0 %v12847_v4  ;;  %8554 = vmatprep.subr.bf16.mxu1 %v12850_v22 }
 0x494   : > { %4407 = vmatprep.mubr.f32.mxu0 %v12595_v2  ;;  %5262 = vmatprep.mubr.f32.mxu1 %v12595_v2 }
 0x496   : > { %8364 = vmatpush1.bf16.msra.mxu0 %v12849_v40  ;;  %8556 = vmatpush1.bf16.msra.mxu1 %v12852_v13 }
 0x497   : > { %8366 = vmatprep.subr.bf16.mxu0 %v12851_v31  ;;  %8558 = vmatprep.subr.bf16.mxu1 %v12854_v19 }
 0x49a   : > { %8368 = vmatpush1.bf16.msra.mxu0 %v12853_v39  ;;  %8560 = vmatpush1.bf16.msra.mxu1 %v12856_v3 }
 0x49b   : > { %8370 = vmatprep.subr.bf16.mxu0 %v12855_v57  ;;  %8562 = vmatprep.subr.bf16.mxu1 %v12858_v52 }
 0x49e   : > { %8372 = vmatpush1.bf16.msra.mxu0 %v12857_v45  ;;  %8564 = vmatpush1.bf16.msra.mxu1 %v12860_v28 }
 0x49f   : > { %8374 = vmatprep.subr.bf16.mxu0 %v12859_v43  ;;  %8566 = vmatprep.subr.bf16.mxu1 %v12862_v0 }
 0x4a2   : > { %8376 = vmatpush1.bf16.msra.mxu0 %v12861_v24  ;;  %8568 = vmatpush1.bf16.msra.mxu1 %v12864_v44 }
 0x4a3   : > { %8378 = vmatprep.subr.bf16.mxu0 %v12863_v61  ;;  %8570 = vmatprep.subr.bf16.mxu1 %v12866_v12 }
 0x4a6   : > { %8380 = vmatpush1.bf16.msra.mxu0 %v12865_v37  ;;  %8572 = vmatpush1.bf16.msra.mxu1 %v12868_v59 }
 0x4a7   : > { %8382 = vmatprep.subr.bf16.mxu0 %v12867_v38  ;;  %8574 = vmatprep.subr.bf16.mxu1 %v13054_v11 }
 0x4aa   : > { %8384 = vmatpush1.bf16.msra.mxu0 %v13055_v10  ;;  %8576 = vmatpush1.bf16.msra.mxu1 %v13056_v54 }
 0x4ab   : > { %8386 = vmatprep.subr.bf16.mxu0 %v13057_v34  ;;  %8578 = vmatprep.subr.bf16.mxu1 %v13058_v18 }
 0x4ae   : > { %8388 = vmatpush1.bf16.msra.mxu0 %v13059_v16  ;;  %8580 = vmatpush1.bf16.msra.mxu1 %v13060_v58 }
 0x4af   : > { %8390 = vmatprep.subr.bf16.mxu0 %v13061_v41  ;;  %8582 = vmatprep.subr.bf16.mxu1 %v13062_v27  ;;  %v13068_v41 = vld [vmem:[#allocation22_spill] sm:$0xff] }
 0x4b0   : > { %v13069_v27 = vld [vmem:[#allocation122_spill] sm:$0xff] }
 0x4b1   : > { %4411 = vmatmul.mubr.f32.vlgmr.msra.gmra.mrb[4].mxu0 %v11551_v7  ;;  %5266 = vmatmul.mubr.f32.vlgmr.msra.gmra.mrb[4].mxu1 %v11551_v7  ;;  %v13071_v7 = vld [vmem:[#allocation124_spill] sm:$0xff] }
 0x4b2   : > { %8392 = vmatpush1.bf16.msra.mxu0 %v13063_v17  ;;  %8584 = vmatpush1.bf16.msra.mxu1 %v13064_v60  ;;  %v13072_v17 = vld [vmem:[#allocation125_spill] sm:$0xff]  ;;  %v13073_v60 = vld [vmem:[#allocation126_spill] sm:$0xff] }
 0x4b3   : > { %8394 = vmatprep.subr.bf16.mxu0 %v13065_v63  ;;  %8586 = vmatprep.subr.bf16.mxu1 %v13066_v15  ;;  %v13074_v63 = vld [vmem:[#allocation127_spill] sm:$0xff]  ;;  %v13075_v15 = vld [vmem:[#allocation128_spill] sm:$0xff] }
 0x4b4   : > { %4577 = vmatprep.mubr.f32.mxu0 %v12595_v2  ;;  %5432 = vmatprep.mubr.f32.mxu1 %v12595_v2 }
 0x4b6   : > { %8396 = vmatpush1.bf16.msra.mxu0 %v13067_v48  ;;  %8588 = vmatpush1.bf16.msra.mxu1 %v13068_v41  ;;  %v13078_v48 = vld [vmem:[#allocation29_spill] sm:$0xff]  ;;  %v13079_v41 = vld [vmem:[#allocation30_spill] sm:$0xff] }
 0x4b7   : > { %8398 = vmatprep.subr.bf16.mxu0 %v13069_v27  ;;  %8590 = vmatprep.subr.bf16.mxu1 %v13070_v51  ;;  %v13080_v27 = vld [vmem:[#allocation32_spill] sm:$0xff]  ;;  %v13081_v51 = vld [vmem:[#allocation33_spill] sm:$0xff] }
 0x4ba   : > { %8400 = vmatpush1.bf16.msra.mxu0 %v13071_v7  ;;  %8592 = vmatpush1.bf16.msra.mxu1 %v13072_v17  ;;  %v13082_v7 = vld [vmem:[#allocation34_spill] sm:$0xff]  ;;  %v13083_v17 = vld [vmem:[#allocation37_spill] sm:$0xff] }
 0x4bb   : > { %8402 = vmatprep.subr.bf16.mxu0 %v13073_v60  ;;  %8594 = vmatprep.subr.bf16.mxu1 %v13074_v63  ;;  %v13084_v60 = vld [vmem:[#allocation38_spill] sm:$0xff]  ;;  %v13085_v63 = vld [vmem:[#allocation39_spill] sm:$0xff] }
 0x4be   : > { %8404 = vmatpush1.bf16.msra.mxu0 %v13075_v15  ;;  %8596 = vmatpush1.bf16.msra.mxu1 %v13076_v29  ;;  %v13086_v15 = vld [vmem:[#allocation41_spill] sm:$0xff]  ;;  %v13087_v29 = vld [vmem:[#allocation43_spill] sm:$0xff] }
 0x4bf   : > { %8406 = vmatprep.subr.bf16.mxu0 %v13077_v35  ;;  %8598 = vmatprep.subr.bf16.mxu1 %v13078_v48  ;;  %v13088_v35 = vld [vmem:[#allocation50_spill] sm:$0xff] }
 0x4c0   : > { %v13089_v48 = vld [vmem:[#allocation98_spill] sm:$0xff] }
 0x4c2   : > { %8408 = vmatpush1.bf16.msra.mxu0 %v13079_v41  ;;  %8600 = vmatpush1.bf16.msra.mxu1 %v13080_v27  ;;  %v13090_v41 = vld [vmem:[#allocation53_spill] sm:$0xff] }
 0x4c3   : > { %8410 = vmatprep.subr.bf16.mxu0 %v13081_v51  ;;  %8602 = vmatprep.subr.bf16.mxu1 %v13082_v7  ;;  %v13091_v27 = vld [vmem:[#allocation101_spill] sm:$0xff] }
 0x4c4   : > { %v13092_v51 = vld [vmem:[#allocation129_spill] sm:$0xff] }
 0x4c6   : > { %8412 = vmatpush1.bf16.msra.mxu0 %v13083_v17  ;;  %8604 = vmatpush1.bf16.msra.mxu1 %v13084_v60 }
 0x4c7   : > { %8414 = vmatprep.subr.bf16.mxu0 %v13085_v63  ;;  %8606 = vmatprep.subr.bf16.mxu1 %v13086_v15 }
 0x4ca   : > { %8416 = vmatpush1.bf16.msra.mxu0 %v13087_v29  ;;  %8608 = vmatpush1.bf16.msra.mxu1 %v13088_v35 }
 0x4cb   : > { %8418 = vmatprep.subr.bf16.mxu0 %v13089_v48  ;;  %8610 = vmatprep.subr.bf16.mxu1 %v13090_v41  ;;  %v7470_v41 = vld [vmem:[%s9681_s30 + $0x48] sm:$0xff] }
 0x4ce   : > { %8420 = vmatpush1.bf16.msra.mxu0 %v13091_v27  ;;  %8612 = vmatpush1.bf16.msra.mxu1 %v13092_v51  ;;  %v13094_v51 = vld [vmem:[#allocation74_spill] sm:$0xff]  ;;  %v7469_v27 = vld [vmem:[%s9681_s30 + $0x40] sm:$0xff] }
 0x4cf   : > { %8422 = vmatprep.subr.bf16.mxu0 %v12843_v8  ;;  %8614 = vmatprep.subr.bf16.mxu1 %v12846_v56 }
 0x4d1   : > { %4579 = vmatmul.mubr.f32.vlgmr.msra.gmra.mrb[4].mxu0 %v11545_v55  ;;  %5434 = vmatmul.mubr.f32.vlgmr.msra.gmra.mrb[4].mxu1 %v11545_v55 }
 0x4d2   : > { %8424 = vmatpush1.bf16.msra.mxu0 %v12845_v30  ;;  %8616 = vmatpush1.bf16.msra.mxu1 %v12848_v50 }
 0x4d3   : > { %8426 = vmatprep.subr.bf16.mxu0 %v12847_v4  ;;  %8618 = vmatprep.subr.bf16.mxu1 %v12850_v22 }
 0x4d4   : > { %4681 = vmatprep.mubr.f32.mxu0 %v12595_v2  ;;  %5536 = vmatprep.mubr.f32.mxu1 %v12595_v2 }
 0x4d6   : > { %8428 = vmatpush1.bf16.msra.mxu0 %v12849_v40  ;;  %8620 = vmatpush1.bf16.msra.mxu1 %v12852_v13 }
 0x4d7   : > { %8430 = vmatprep.subr.bf16.mxu0 %v12851_v31  ;;  %8622 = vmatprep.subr.bf16.mxu1 %v12854_v19 }
 0x4da   : > { %8432 = vmatpush1.bf16.msra.mxu0 %v12853_v39  ;;  %8624 = vmatpush1.bf16.msra.mxu1 %v12856_v3 }
 0x4db   : > { %8434 = vmatprep.subr.bf16.mxu0 %v12855_v57  ;;  %8626 = vmatprep.subr.bf16.mxu1 %v12858_v52 }
 0x4de   : > { %8436 = vmatpush1.bf16.msra.mxu0 %v12857_v45  ;;  %8628 = vmatpush1.bf16.msra.mxu1 %v12860_v28 }
 0x4df   : > { %8438 = vmatprep.subr.bf16.mxu0 %v12859_v43  ;;  %8630 = vmatprep.subr.bf16.mxu1 %v12862_v0 }
 0x4e2   : > { %8440 = vmatpush1.bf16.msra.mxu0 %v12861_v24  ;;  %8632 = vmatpush1.bf16.msra.mxu1 %v12864_v44 }
 0x4e3   : > { %8442 = vmatprep.subr.bf16.mxu0 %v12863_v61  ;;  %8634 = vmatprep.subr.bf16.mxu1 %v12866_v12 }
 0x4e6   : > { %8444 = vmatpush1.bf16.msra.mxu0 %v12865_v37  ;;  %8636 = vmatpush1.bf16.msra.mxu1 %v12868_v59 }
 0x4e7   : > { %8446 = vmatprep.subr.bf16.mxu0 %v12867_v38  ;;  %8638 = vmatprep.subr.bf16.mxu1 %v13054_v11 }
 0x4ea   : > { %8448 = vmatpush1.bf16.msra.mxu0 %v13055_v10  ;;  %8640 = vmatpush1.bf16.msra.mxu1 %v13056_v54 }
 0x4eb   : > { %8450 = vmatprep.subr.bf16.mxu0 %v13057_v34  ;;  %8642 = vmatprep.subr.bf16.mxu1 %v13058_v18 }
 0x4ee   : > { %8452 = vmatpush1.bf16.msra.mxu0 %v13059_v16  ;;  %8644 = vmatpush1.bf16.msra.mxu1 %v13060_v58 }
 0x4ef   : > { %8646 = vmatprep.subr.bf16.mxu0 %v12843_v8  ;;  %8838 = vmatprep.subr.bf16.mxu1 %v12846_v56 }
 0x4f1   : > { %4683 = vmatmul.mubr.f32.vlgmr.msra.gmra.mrb[4].mxu0 %v11545_v55  ;;  %5538 = vmatmul.mubr.f32.vlgmr.msra.gmra.mrb[4].mxu1 %v11545_v55  ;;  %v13093_v55 = vld [vmem:[#allocation73_spill] sm:$0xff] }
 0x4f2   : > { %8648 = vmatpush1.bf16.msra.mxu0 %v12845_v30  ;;  %8840 = vmatpush1.bf16.msra.mxu1 %v12848_v50 }
 0x4f3   : > { %8650 = vmatprep.subr.bf16.mxu0 %v12847_v4  ;;  %8842 = vmatprep.subr.bf16.mxu1 %v12850_v22 }
 0x4f4   : > { %5679 = vmatprep.mubr.f32.mxu0 %v12595_v2  ;;  %6534 = vmatprep.mubr.f32.mxu1 %v12595_v2 }
 0x4f6   : > { %8652 = vmatpush1.bf16.msra.mxu0 %v12849_v40  ;;  %8844 = vmatpush1.bf16.msra.mxu1 %v12852_v13 }
 0x4f7   : > { %8654 = vmatprep.subr.bf16.mxu0 %v12851_v31  ;;  %8846 = vmatprep.subr.bf16.mxu1 %v12854_v19 }
 0x4fa   : > { %8656 = vmatpush1.bf16.msra.mxu0 %v12853_v39  ;;  %8848 = vmatpush1.bf16.msra.mxu1 %v12856_v3 }
 0x4fb   : > { %8658 = vmatprep.subr.bf16.mxu0 %v12855_v57  ;;  %8850 = vmatprep.subr.bf16.mxu1 %v12858_v52 }
 0x4fe   : > { %8660 = vmatpush1.bf16.msra.mxu0 %v12857_v45  ;;  %8852 = vmatpush1.bf16.msra.mxu1 %v12860_v28 }
 0x4ff   : > { %8662 = vmatprep.subr.bf16.mxu0 %v12859_v43  ;;  %8854 = vmatprep.subr.bf16.mxu1 %v12862_v0 }
 0x502   : > { %8664 = vmatpush1.bf16.msra.mxu0 %v12861_v24  ;;  %8856 = vmatpush1.bf16.msra.mxu1 %v12864_v44 }
 0x503   : > { %8666 = vmatprep.subr.bf16.mxu0 %v12863_v61  ;;  %8858 = vmatprep.subr.bf16.mxu1 %v12866_v12 }
 0x506   : > { %8668 = vmatpush1.bf16.msra.mxu0 %v12865_v37  ;;  %8860 = vmatpush1.bf16.msra.mxu1 %v12868_v59 }
 0x507   : > { %8670 = vmatprep.subr.bf16.mxu0 %v12867_v38  ;;  %8862 = vmatprep.subr.bf16.mxu1 %v13054_v11 }
 0x50a   : > { %8672 = vmatpush1.bf16.msra.mxu0 %v13055_v10  ;;  %8864 = vmatpush1.bf16.msra.mxu1 %v13056_v54 }
 0x50b   : > { %8674 = vmatprep.subr.bf16.mxu0 %v13057_v34  ;;  %8866 = vmatprep.subr.bf16.mxu1 %v13058_v18  ;;  %v7472_v18 = vld [vmem:[%s9681_s30 + $0x58] sm:$0xff] }
 0x50e   : > { %8676 = vmatpush1.bf16.msra.mxu0 %v13059_v16  ;;  %8868 = vmatpush1.bf16.msra.mxu1 %v13060_v58  ;;  %v7471_v58 = vld [vmem:[%s9681_s30 + $0x50] sm:$0xff] }
 0x50f   : > { %8678 = vmatprep.subr.bf16.mxu0 %v13093_v55  ;;  %8870 = vmatprep.subr.bf16.mxu1 %v13094_v51 }
 0x5c4   : > { %v4684_v48 = vpop.f32.mrb[4].mxu0  ;;  %v5539_v35 = vpop.f32.mrb[4].mxu1 }
 0x5c5   : > { %v5544_v29 = vadd.f32 %v7469_v27, %v4684_v48  ;;  %v4686_v15 = vpop.f32.mrb[5].mxu0  ;;  %v5541_v63 = vpop.f32.mrb[5].mxu1  ;;  %v5546_v55 = vadd.f32 %v7471_v58, %v5539_v35 }
 0x5c6   : > { %v5545_v60 = vadd.f32 %v7470_v41, %v4686_v15  ;;  %v5547_v16 = vadd.f32 %v7472_v18, %v5541_v63 }
 0x5c7   : > { %v7473_v17 = vmul.f32 -1.442695, %v5544_v29 }
 0x5c8   : > { %v7474_v7 = vmul.f32 -1.442695, %v5545_v60  ;;  %v7475_v34 = vmul.f32 -1.442695, %v5547_v16 }
 0x5c9   : > { %9223 = vpow2.f32 %v7473_v17 }
 0x5ca   : > { %9225 = vpow2.f32 %v7474_v7  ;;  %v13107_v7 = vld [vmem:[#allocation104_spill] sm:$0xff] }
 0x5cb   : > { %9227 = vpow2.f32 %v7475_v34 }
 0x5cc   : > { %9229 = vtanh.f32 %v5546_v55  ;;  %v13108_v55 = vld [vmem:[#allocation107_spill] sm:$0xff] }
 0x5d3   : > { %v9224_v54 = vpop.eup %9223 }
 0x5d4   : > { %v9226_v10 = vpop.eup %9225  ;;  %v5551_v51 = vadd.f32 1.0, %v9224_v54 }
 0x5d5   : > { %v5557_v11 = vadd.f32 1.0, %v9226_v10  ;;  %v9228_v27 = vpop.eup %9227 }
 0x5d6   : > { %9231 = vrcp.f32 %v5551_v51  ;;  %v9230_v41 = vpop.eup %9229  ;;  %v5564_v17 = vadd.f32 1.0, %v9228_v27  ;;  %v13109_v51 = vld [vmem:[#allocation69_spill] sm:$0xff] }
 0x5d7   : > { %9233 = vrcp.f32 %v5557_v11  ;;  %v13104_v11 = vld [vmem:[#allocation52_spill] sm:$0xff]  ;;  %v13110_v27 = vld [vmem:[#allocation105_spill] sm:$0xff] }
 0x5d8   : > { %9235 = vrcp.f32 %v5564_v17  ;;  %v13119_v17 = vld [vmem:[#allocation112_spill] sm:$0xff] }
 0x5e0   : > { %v9232_v29 = vpop.eup %9231 }
 0x5e1   : > { %v9234_v60 = vpop.eup %9233  ;;  %v5568_v15 = vmul.f32 %v9232_v29, %v9230_v41  ;;  %v13111_v41 = vld [vmem:[#allocation67_spill] sm:$0xff]  ;;  %v13116_v29 = vld [vmem:[#allocation109_spill] sm:$0xff] }
 0x5e2   : > { %v5567_v18 = vmul.f32 %v9234_v60, %v11541_v1  ;;  %v9236_v16 = vpop.eup %9235  ;;  %v13117_v60 = vld [vmem:[#allocation110_spill] sm:$0xff] }
 0x5e4   : > { %v11774_v63 = vadd.f32 %v5568_v15, %v5567_v18  ;;  %v13118_v15 = vld [vmem:[#allocation111_spill] sm:$0xff] }
 0x5e5   : > { %v13120_v18 = vld [vmem:[#allocation119_spill] sm:$0xff] }
 0x5e6   : > { %9237 = vtanh.f32 %v11774_v63 }
 0x5f0   : > { %v9238_v58 = vpop.eup %9237 }
 0x5f1   : > { %v5571_v35 = vmul.f32 %v9238_v58, %v9236_v16  ;;  %v13121_v16 = vld [vmem:[#allocation120_spill] sm:$0xff]  ;;  %v13122_v58 = vld [vmem:[#allocation130_spill] sm:$0xff] }
 0x5f3   : > { %7476 = vst [vmem:[%s9696_s5 + $0x10] sm:$0xff] %v5571_v35  ;;  %v11778_v54 = vand.u32 4294901760, %v5571_v35 }
 0x5f5   : > { %v11781_v48 = vsub.f32 %v5571_v35, %v11778_v54  ;;  %v13123_v35 = vld [vmem:[#allocation121_spill] sm:$0xff] }
 0x5f7   : > { %v11784_v10 = vand.u32 4294901760, %v11781_v48 }
 0x5f9   : > { %v5683_v1 = vsub.f32 %v11781_v48, %v11784_v10 }
 0x5fb   : > { %v5684_v34 = vand.u32 4294901760, %v5683_v1  ;;  %v13124_v1 = vld [vmem:[#allocation132_spill] sm:$0xff] }
 0x5fd   : > { %5685 = vmatmul.mubr.f32.vlgmr.msra.gmra.mrb[6].mxu0 %v5684_v34  ;;  %6540 = vmatmul.mubr.f32.vlgmr.msra.gmra.mrb[6].mxu1 %v5684_v34  ;;  %v13125_v34 = vld [vmem:[#allocation131_spill] sm:$0xff] }
 0x5fe   : > { %8680 = vmatpush1.bf16.msra.mxu0 %v12926_v32  ;;  %8872 = vmatpush1.bf16.msra.mxu1 %v12927_v21  ;;  %v13095_v32 = vld [vmem:[#allocation90_spill] sm:$0xff] }
 0x5ff   : > { %8682 = vmatprep.subr.bf16.mxu0 %v12928_v20  ;;  %8874 = vmatprep.subr.bf16.mxu1 %v12929_v26  ;;  %v13096_v21 = vld [vmem:[#allocation94_spill] sm:$0xff]  ;;  %v13097_v20 = vld [vmem:[#allocation95_spill] sm:$0xff]  ;;  %v13098_v26 = vld [vmem:[#allocation96_spill] sm:$0xff] }
 0x600   : > { %5915 = vmatprep.mubr.f32.mxu0 %v12595_v2  ;;  %6770 = vmatprep.mubr.f32.mxu1 %v12595_v2 }
 0x602   : > { %8684 = vmatpush1.bf16.msra.mxu0 %v13010_v9  ;;  %8876 = vmatpush1.bf16.msra.mxu1 %v13011_v62  ;;  %v13099_v9 = vld [vmem:[#allocation97_spill] sm:$0xff]  ;;  %v13100_v62 = vld [vmem:[#allocation42_spill] sm:$0xff] }
 0x603   : > { %8686 = vmatprep.subr.bf16.mxu0 %v13012_v36  ;;  %8878 = vmatprep.subr.bf16.mxu1 %v13013_v42  ;;  %v13101_v36 = vld [vmem:[#allocation45_spill] sm:$0xff]  ;;  %v13102_v42 = vld [vmem:[#allocation46_spill] sm:$0xff] }
 0x606   : > { %8688 = vmatpush1.bf16.msra.mxu0 %v13014_v33  ;;  %8880 = vmatpush1.bf16.msra.mxu1 %v13095_v32  ;;  %v13103_v33 = vld [vmem:[#allocation47_spill] sm:$0xff]  ;;  %v13126_v32 = vld [vmem:[#allocation134_spill] sm:$0xff] }
 0x607   : > { %8690 = vmatprep.subr.bf16.mxu0 %v13016_v49  ;;  %8882 = vmatprep.subr.bf16.mxu1 %v13017_v6  ;;  %v13105_v49 = vld [vmem:[#allocation102_spill] sm:$0xff]  ;;  %v13106_v6 = vld [vmem:[#allocation103_spill] sm:$0xff] }
 0x60a   : > { %8692 = vmatpush1.bf16.msra.mxu0 %v13096_v21  ;;  %8884 = vmatpush1.bf16.msra.mxu1 %v13097_v20  ;;  %v13127_v21 = vld [vmem:[#allocation133_spill] sm:$0xff] }
 0x60b   : > { %8694 = vmatprep.subr.bf16.mxu0 %v13098_v26  ;;  %8886 = vmatprep.subr.bf16.mxu1 %v13099_v9  ;;  %v13131_v20 = vld [vmem:[#allocation137_spill] sm:$0xff]  ;;  %v13132_v26 = vld [vmem:[#allocation140_spill] sm:$0xff]  ;;  %v13133_v9 = vld [vmem:[#allocation139_spill] sm:$0xff] }
 0x60e   : > { %8696 = vmatpush1.bf16.msra.mxu0 %v13100_v62  ;;  %8888 = vmatpush1.bf16.msra.mxu1 %v13101_v36  ;;  %v13134_v62 = vld [vmem:[#allocation142_spill] sm:$0xff]  ;;  %v13135_v36 = vld [vmem:[#allocation141_spill] sm:$0xff] }
 0x60f   : > { %8698 = vmatprep.subr.bf16.mxu0 %v13102_v42  ;;  %8890 = vmatprep.subr.bf16.mxu1 %v13103_v33  ;;  %v13136_v42 = vld [vmem:[#allocation144_spill] sm:$0xff]  ;;  %v13137_v33 = vld [vmem:[#allocation143_spill] sm:$0xff] }
 0x612   : > { %8700 = vmatpush1.bf16.msra.mxu0 %v13104_v11  ;;  %8892 = vmatpush1.bf16.msra.mxu1 %v12947_v23  ;;  %v13112_v23 = vld [vmem:[#allocation114_spill] sm:$0xff]  ;;  %v13138_v11 = vld [vmem:[#allocation117_spill] sm:$0xff] }
 0x613   : > { %8702 = vmatprep.subr.bf16.mxu0 %v12948_v14  ;;  %8894 = vmatprep.subr.bf16.mxu1 %v13027_v53  ;;  %v13113_v14 = vld [vmem:[#allocation116_spill] sm:$0xff]  ;;  %v13114_v53 = vld [vmem:[#allocation106_spill] sm:$0xff] }
 0x616   : > { %8704 = vmatpush1.bf16.msra.mxu0 %v13105_v49  ;;  %8896 = vmatpush1.bf16.msra.mxu1 %v13029_v25  ;;  %v13115_v25 = vld [vmem:[#allocation108_spill] sm:$0xff]  ;;  %v13140_v49 = vld [vmem:[#allocation62_spill] sm:$0xff] }
 0x617   : > { %8706 = vmatprep.subr.bf16.mxu0 %v13106_v6  ;;  %8898 = vmatprep.subr.bf16.mxu1 %v13107_v7  ;;  %v13141_v6 = vld [vmem:[#allocation63_spill] sm:$0xff]  ;;  %v13142_v7 = vld [vmem:[#allocation64_spill] sm:$0xff] }
 0x61a   : > { %8708 = vmatpush1.bf16.msra.mxu0 %v13108_v55  ;;  %8900 = vmatpush1.bf16.msra.mxu1 %v13109_v51  ;;  %v13143_v55 = vld [vmem:[#allocation65_spill] sm:$0xff]  ;;  %v13144_v51 = vld [vmem:[#allocation66_spill] sm:$0xff] }
 0x61b   : > { %8710 = vmatprep.subr.bf16.mxu0 %v13110_v27  ;;  %8902 = vmatprep.subr.bf16.mxu1 %v13111_v41  ;;  %v13145_v27 = vld [vmem:[#allocation68_spill] sm:$0xff]  ;;  %v13146_v41 = vld [vmem:[#allocation17_spill] sm:$0xff] }
 0x61d   : > { %5917 = vmatmul.mubr.f32.vlgmr.msra.gmra.mrb[6].mxu0 %v11778_v54  ;;  %6772 = vmatmul.mubr.f32.vlgmr.msra.gmra.mrb[6].mxu1 %v11778_v54 }
 0x61e   : > { %8712 = vmatpush1.bf16.msra.mxu0 %v13112_v23  ;;  %8904 = vmatpush1.bf16.msra.mxu1 %v13113_v14  ;;  %v13147_v23 = vld [vmem:[#allocation19_spill] sm:$0xff] }
 0x61f   : > { %8714 = vmatprep.subr.bf16.mxu0 %v13114_v53  ;;  %8906 = vmatprep.subr.bf16.mxu1 %v13115_v25  ;;  %v13148_v14 = vld [vmem:[#allocation71_spill] sm:$0xff]  ;;  %v13149_v53 = vld [vmem:[#allocation21_spill] sm:$0xff]  ;;  %v13150_v25 = vld [vmem:[#allocation18_spill] sm:$0xff] }
 0x620   : > { %6051 = vmatprep.mubr.f32.mxu0 %v12595_v2  ;;  %6906 = vmatprep.mubr.f32.mxu1 %v12595_v2 }
 0x622   : > { %8716 = vmatpush1.bf16.msra.mxu0 %v13116_v29  ;;  %8908 = vmatpush1.bf16.msra.mxu1 %v13117_v60  ;;  %v13151_v29 = vld [vmem:[#allocation23_spill] sm:$0xff]  ;;  %v13152_v60 = vld [vmem:[#allocation20_spill] sm:$0xff] }
 0x623   : > { %8718 = vmatprep.subr.bf16.mxu0 %v13118_v15  ;;  %8910 = vmatprep.subr.bf16.mxu1 %v13119_v17  ;;  %v13153_v15 = vld [vmem:[#allocation22_spill] sm:$0xff] }
 0x624   : > { %v13154_v17 = vld [vmem:[#allocation122_spill] sm:$0xff] }
 0x626   : > { %8720 = vmatpush1.bf16.msra.mxu0 %v13040_v5  ;;  %8912 = vmatpush1.bf16.msra.mxu1 %v13041_v46  ;;  %v13128_v5 = vld [vmem:[#allocation136_spill] sm:$0xff]  ;;  %v13129_v46 = vld [vmem:[#allocation135_spill] sm:$0xff] }
 0x627   : > { %8722 = vmatprep.subr.bf16.mxu0 %v13042_v47  ;;  %8914 = vmatprep.subr.bf16.mxu1 %v13120_v18  ;;  %v13130_v47 = vld [vmem:[#allocation138_spill] sm:$0xff]  ;;  %v13155_v18 = vld [vmem:[#allocation123_spill] sm:$0xff] }
 0x62a   : > { %8724 = vmatpush1.bf16.msra.mxu0 %v13121_v16  ;;  %8916 = vmatpush1.bf16.msra.mxu1 %v13122_v58  ;;  %v13157_v16 = vld [vmem:[#allocation125_spill] sm:$0xff]  ;;  %v13158_v58 = vld [vmem:[#allocation126_spill] sm:$0xff] }
 0x62b   : > { %8726 = vmatprep.subr.bf16.mxu0 %v13123_v35  ;;  %8918 = vmatprep.subr.bf16.mxu1 %v13124_v1  ;;  %v13159_v35 = vld [vmem:[#allocation127_spill] sm:$0xff]  ;;  %v13160_v1 = vld [vmem:[#allocation128_spill] sm:$0xff] }
 0x62e   : > { %8728 = vmatpush1.bf16.msra.mxu0 %v13125_v34  ;;  %8920 = vmatpush1.bf16.msra.mxu1 %v13126_v32  ;;  %v13161_v34 = vld [vmem:[#allocation89_spill] sm:$0xff]  ;;  %v13162_v32 = vld [vmem:[#allocation91_spill] sm:$0xff] }
 0x62f   : > { %8730 = vmatprep.subr.bf16.mxu0 %v13127_v21  ;;  %8922 = vmatprep.subr.bf16.mxu1 %v13128_v5  ;;  %v13163_v21 = vld [vmem:[#allocation29_spill] sm:$0xff]  ;;  %v13164_v5 = vld [vmem:[#allocation30_spill] sm:$0xff] }
 0x632   : > { %8732 = vmatpush1.bf16.msra.mxu0 %v13129_v46  ;;  %8924 = vmatpush1.bf16.msra.mxu1 %v13130_v47  ;;  %v13165_v46 = vld [vmem:[#allocation32_spill] sm:$0xff]  ;;  %v13166_v47 = vld [vmem:[#allocation33_spill] sm:$0xff] }
 0x633   : > { %8734 = vmatprep.subr.bf16.mxu0 %v13131_v20  ;;  %8926 = vmatprep.subr.bf16.mxu1 %v13132_v26  ;;  %v13167_v20 = vld [vmem:[#allocation34_spill] sm:$0xff]  ;;  %v13168_v26 = vld [vmem:[#allocation37_spill] sm:$0xff] }
 0x636   : > { %8736 = vmatpush1.bf16.msra.mxu0 %v13133_v9  ;;  %8928 = vmatpush1.bf16.msra.mxu1 %v13134_v62  ;;  %v13169_v9 = vld [vmem:[#allocation38_spill] sm:$0xff]  ;;  %v13170_v62 = vld [vmem:[#allocation39_spill] sm:$0xff] }
 0x637   : > { %8738 = vmatprep.subr.bf16.mxu0 %v13135_v36  ;;  %8930 = vmatprep.subr.bf16.mxu1 %v13136_v42  ;;  %v13171_v36 = vld [vmem:[#allocation41_spill] sm:$0xff]  ;;  %v13172_v42 = vld [vmem:[#allocation43_spill] sm:$0xff] }
 0x63a   : > { %8740 = vmatpush1.bf16.msra.mxu0 %v13137_v33  ;;  %8932 = vmatpush1.bf16.msra.mxu1 %v13138_v11  ;;  %v13173_v33 = vld [vmem:[#allocation50_spill] sm:$0xff] }
 0x63b   : > { %8742 = vmatprep.subr.bf16.mxu0 %v12843_v8  ;;  %8934 = vmatprep.subr.bf16.mxu1 %v12846_v56  ;;  %v13174_v11 = vld [vmem:[#allocation98_spill] sm:$0xff] }
 0x63d   : > { %6054 = vmatmul.mubr.f32.vlgmr.msra.gmra.mrb[6].mxu0 %v11781_v48  ;;  %6909 = vmatmul.mubr.f32.vlgmr.msra.gmra.mrb[6].mxu1 %v11781_v48  ;;  %v13139_v48 = vld [vmem:[#allocation61_spill] sm:$0xff] }
 0x63e   : > { %8744 = vmatpush1.bf16.msra.mxu0 %v12845_v30  ;;  %8936 = vmatpush1.bf16.msra.mxu1 %v12848_v50 }
 0x63f   : > { %8746 = vmatprep.subr.bf16.mxu0 %v12847_v4  ;;  %8938 = vmatprep.subr.bf16.mxu1 %v12850_v22 }
 0x640   : > { %6156 = vmatprep.mubr.f32.mxu0 %v12595_v2  ;;  %7011 = vmatprep.mubr.f32.mxu1 %v12595_v2 }
 0x642   : > { %8748 = vmatpush1.bf16.msra.mxu0 %v12849_v40  ;;  %8940 = vmatpush1.bf16.msra.mxu1 %v12852_v13 }
 0x643   : > { %8750 = vmatprep.subr.bf16.mxu0 %v12851_v31  ;;  %8942 = vmatprep.subr.bf16.mxu1 %v12854_v19 }
 0x646   : > { %8752 = vmatpush1.bf16.msra.mxu0 %v12853_v39  ;;  %8944 = vmatpush1.bf16.msra.mxu1 %v12856_v3 }
 0x647   : > { %8754 = vmatprep.subr.bf16.mxu0 %v12855_v57  ;;  %8946 = vmatprep.subr.bf16.mxu1 %v12858_v52 }
 0x64a   : > { %8756 = vmatpush1.bf16.msra.mxu0 %v12857_v45  ;;  %8948 = vmatpush1.bf16.msra.mxu1 %v12860_v28 }
 0x64b   : > { %8758 = vmatprep.subr.bf16.mxu0 %v12859_v43  ;;  %8950 = vmatprep.subr.bf16.mxu1 %v12862_v0 }
 0x64e   : > { %8760 = vmatpush1.bf16.msra.mxu0 %v12861_v24  ;;  %8952 = vmatpush1.bf16.msra.mxu1 %v12864_v44 }
 0x64f   : > { %8762 = vmatprep.subr.bf16.mxu0 %v12863_v61  ;;  %8954 = vmatprep.subr.bf16.mxu1 %v12866_v12 }
 0x652   : > { %8764 = vmatpush1.bf16.msra.mxu0 %v12865_v37  ;;  %8956 = vmatpush1.bf16.msra.mxu1 %v12868_v59 }
 0x653   : > { %8766 = vmatprep.subr.bf16.mxu0 %v12867_v38  ;;  %8958 = vmatprep.subr.bf16.mxu1 %v13139_v48 }
 0x656   : > { %8768 = vmatpush1.bf16.msra.mxu0 %v13140_v49  ;;  %8960 = vmatpush1.bf16.msra.mxu1 %v13141_v6 }
 0x657   : > { %8770 = vmatprep.subr.bf16.mxu0 %v13142_v7  ;;  %8962 = vmatprep.subr.bf16.mxu1 %v13143_v55 }
 0x65a   : > { %8772 = vmatpush1.bf16.msra.mxu0 %v13144_v51  ;;  %8964 = vmatpush1.bf16.msra.mxu1 %v13145_v27 }
 0x65b   : > { %8774 = vmatprep.subr.bf16.mxu0 %v13146_v41  ;;  %8966 = vmatprep.subr.bf16.mxu1 %v13147_v23  ;;  %v13175_v41 = vld [vmem:[#allocation53_spill] sm:$0xff] }
 0x65c   : > { %v13176_v23 = vld [vmem:[#allocation101_spill] sm:$0xff] }
 0x65d   : > { %6160 = vmatmul.mubr.f32.vlgmr.msra.gmra.mrb[6].mxu0 %v11784_v10  ;;  %7015 = vmatmul.mubr.f32.vlgmr.msra.gmra.mrb[6].mxu1 %v11784_v10  ;;  %v13156_v10 = vld [vmem:[#allocation124_spill] sm:$0xff] }
 0x65e   : > { %8776 = vmatpush1.bf16.msra.mxu0 %v13148_v14  ;;  %8968 = vmatpush1.bf16.msra.mxu1 %v13149_v53  ;;  %v13177_v14 = vld [vmem:[#allocation129_spill] sm:$0xff] }
 0x65f   : > { %8778 = vmatprep.subr.bf16.mxu0 %v13150_v25  ;;  %8970 = vmatprep.subr.bf16.mxu1 %v13151_v29 }
 0x660   : > { %6326 = vmatprep.mubr.f32.mxu0 %v12595_v2  ;;  %7181 = vmatprep.mubr.f32.mxu1 %v12595_v2 }
 0x662   : > { %8780 = vmatpush1.bf16.msra.mxu0 %v13152_v60  ;;  %8972 = vmatpush1.bf16.msra.mxu1 %v13153_v15 }
 0x663   : > { %8782 = vmatprep.subr.bf16.mxu0 %v13154_v17  ;;  %8974 = vmatprep.subr.bf16.mxu1 %v13155_v18 }
 0x666   : > { %8784 = vmatpush1.bf16.msra.mxu0 %v13156_v10  ;;  %8976 = vmatpush1.bf16.msra.mxu1 %v13157_v16 }
 0x667   : > { %8786 = vmatprep.subr.bf16.mxu0 %v13158_v58  ;;  %8978 = vmatprep.subr.bf16.mxu1 %v13159_v35 }
 0x66a   : > { %8788 = vmatpush1.bf16.msra.mxu0 %v13160_v1  ;;  %8980 = vmatpush1.bf16.msra.mxu1 %v13161_v34 }
 0x66b   : > { %8790 = vmatprep.subr.bf16.mxu0 %v13162_v32  ;;  %8982 = vmatprep.subr.bf16.mxu1 %v13163_v21 }
 0x66e   : > { %8792 = vmatpush1.bf16.msra.mxu0 %v13164_v5  ;;  %8984 = vmatpush1.bf16.msra.mxu1 %v13165_v46 }
 0x66f   : > { %8794 = vmatprep.subr.bf16.mxu0 %v13166_v47  ;;  %8986 = vmatprep.subr.bf16.mxu1 %v13167_v20 }
 0x672   : > { %8796 = vmatpush1.bf16.msra.mxu0 %v13168_v26  ;;  %8988 = vmatpush1.bf16.msra.mxu1 %v13169_v9 }
 0x673   : > { %8798 = vmatprep.subr.bf16.mxu0 %v13170_v62  ;;  %8990 = vmatprep.subr.bf16.mxu1 %v13171_v36 }
 0x676   : > { %8800 = vmatpush1.bf16.msra.mxu0 %v13172_v42  ;;  %8992 = vmatpush1.bf16.msra.mxu1 %v13173_v33 }
 0x677   : > { %8802 = vmatprep.subr.bf16.mxu0 %v13174_v11  ;;  %8994 = vmatprep.subr.bf16.mxu1 %v13175_v41 }
 0x67a   : > { %8804 = vmatpush1.bf16.msra.mxu0 %v13176_v23  ;;  %8996 = vmatpush1.bf16.msra.mxu1 %v13177_v14 }
 0x67b   : > { %8806 = vmatprep.subr.bf16.mxu0 %v12843_v8  ;;  %8998 = vmatprep.subr.bf16.mxu1 %v12846_v56  ;;  %v7478_v8 = vld [vmem:[%s9681_s30 + $0x68] sm:$0xff] }
 0x67d   : > { %6328 = vmatmul.mubr.f32.vlgmr.msra.gmra.mrb[6].mxu0 %v11778_v54  ;;  %7183 = vmatmul.mubr.f32.vlgmr.msra.gmra.mrb[6].mxu1 %v11778_v54 }
 0x67e   : > { %8808 = vmatpush1.bf16.msra.mxu0 %v12845_v30  ;;  %9000 = vmatpush1.bf16.msra.mxu1 %v12848_v50 }
 0x67f   : > { %8810 = vmatprep.subr.bf16.mxu0 %v12847_v4  ;;  %9002 = vmatprep.subr.bf16.mxu1 %v12850_v22 }
 0x680   : > { %6430 = vmatprep.mubr.f32.mxu0 %v12595_v2  ;;  %7285 = vmatprep.mubr.f32.mxu1 %v12595_v2  ;;  %v7477_v2 = vld [vmem:[%s9681_s30 + $0x60] sm:$0xff] }
 0x682   : > { %8812 = vmatpush1.bf16.msra.mxu0 %v12849_v40  ;;  %9004 = vmatpush1.bf16.msra.mxu1 %v12852_v13 }
 0x683   : > { %8814 = vmatprep.subr.bf16.mxu0 %v12851_v31  ;;  %9006 = vmatprep.subr.bf16.mxu1 %v12854_v19 }
 0x686   : > { %8816 = vmatpush1.bf16.msra.mxu0 %v12853_v39  ;;  %9008 = vmatpush1.bf16.msra.mxu1 %v12856_v3  ;;  %v7480_v39 = vld [vmem:[%s9681_s30 + $0x78] sm:$0xff] }
 0x687   : > { %8818 = vmatprep.subr.bf16.mxu0 %v12855_v57  ;;  %9010 = vmatprep.subr.bf16.mxu1 %v12858_v52  ;;  %v7479_v57 = vld [vmem:[%s9681_s30 + $0x70] sm:$0xff] }
 0x68a   : > { %8820 = vmatpush1.bf16.msra.mxu0 %v12857_v45  ;;  %9012 = vmatpush1.bf16.msra.mxu1 %v12860_v28 }
 0x68b   : > { %8822 = vmatprep.subr.bf16.mxu0 %v12859_v43  ;;  %9014 = vmatprep.subr.bf16.mxu1 %v12862_v0 }
 0x68e   : > { %8824 = vmatpush1.bf16.msra.mxu0 %v12861_v24  ;;  %9016 = vmatpush1.bf16.msra.mxu1 %v12864_v44 }
 0x68f   : > { %8826 = vmatprep.subr.bf16.mxu0 %v12863_v61  ;;  %9018 = vmatprep.subr.bf16.mxu1 %v12866_v12 }
 0x692   : > { %8828 = vmatpush1.bf16.msra.mxu0 %v12865_v37  ;;  %9020 = vmatpush1.bf16.msra.mxu1 %v12868_v59 }
 0x693   : > { %8830 = vmatprep.subr.bf16.mxu0 %v12867_v38  ;;  %9022 = vmatprep.subr.bf16.mxu1 %v13139_v48 }
 0x696   : > { %8832 = vmatpush1.bf16.msra.mxu0 %v13140_v49  ;;  %9024 = vmatpush1.bf16.msra.mxu1 %v13141_v6 }
 0x697   : > { %8834 = vmatprep.subr.bf16.mxu0 %v13142_v7  ;;  %9026 = vmatprep.subr.bf16.mxu1 %v13143_v55 }
 0x69a   : > { %8836 = vmatpush1.bf16.msra.mxu0 %v13144_v51  ;;  %9028 = vmatpush1.bf16.msra.mxu1 %v13145_v27 }
 0x69d   : > { %6432 = vmatmul.mubr.f32.vlgmr.msra.gmra.mrb[6].mxu0 %v11778_v54  ;;  %7287 = vmatmul.mubr.f32.vlgmr.msra.gmra.mrb[6].mxu1 %v11778_v54 }
 0x770   : > { %v6433_v30 = vpop.f32.mrb[6].mxu0  ;;  %v7288_v56 = vpop.f32.mrb[6].mxu1 }
 0x771   : > { %v7293_v4 = vadd.f32 %v7477_v2, %v6433_v30  ;;  %v6435_v50 = vpop.f32.mrb[7].mxu0  ;;  %v7290_v40 = vpop.f32.mrb[7].mxu1  ;;  %v7295_v45 = vadd.f32 %v7479_v57, %v7288_v56 }
 0x772   : > { %v7294_v22 = vadd.f32 %v7478_v8, %v6435_v50  ;;  %v7296_v19 = vadd.f32 %v7480_v39, %v7290_v40 }
 0x773   : > { %v7481_v31 = vmul.f32 -1.442695, %v7293_v4 }
 0x774   : > { %v7482_v13 = vmul.f32 -1.442695, %v7294_v22  ;;  %v7483_v3 = vmul.f32 -1.442695, %v7296_v19 }
 0x775   : > { %9239 = vpow2.f32 %v7481_v31 }
 0x776   : > { %9241 = vpow2.f32 %v7482_v13 }
 0x777   : > { %9243 = vpow2.f32 %v7483_v3 }
 0x778   : > { %9245 = vtanh.f32 %v7295_v45 }
 0x77f   : > { %v9240_v52 = vpop.eup %9239 }
 0x780   : > { %v9242_v43 = vpop.eup %9241  ;;  %v7300_v28 = vadd.f32 1.0, %v9240_v52 }
 0x781   : > { %v7306_v24 = vadd.f32 1.0, %v9242_v43  ;;  %v9244_v0 = vpop.eup %9243 }
 0x782   : > { %9247 = vrcp.f32 %v7300_v28  ;;  %v9246_v61 = vpop.eup %9245  ;;  %v7313_v38 = vadd.f32 1.0, %v9244_v0 }
 0x783   : > { %9249 = vrcp.f32 %v7306_v24 }
 0x784   : > { %9251 = vrcp.f32 %v7313_v38 }
 0x78c   : > { %v9248_v44 = vpop.eup %9247 }
 0x78d   : > { %v9250_v37 = vpop.eup %9249  ;;  %v7317_v12 = vmul.f32 %v9248_v44, %v9246_v61 }
 0x78e   : > { %v7316_v59 = vmul.f32 %v9250_v37, %v11774_v63  ;;  %v9252_v48 = vpop.eup %9251 }
 0x790   : > { %v7318_v54 = vadd.f32 %v7317_v12, %v7316_v59 }
 0x792   : > { %9253 = vtanh.f32 %v7318_v54  ;;  %7324 = vst [vmem:[#allocation3] sm:$0xff] %v7318_v54 }
 0x79c   : > { %v9254_v49 = vpop.eup %9253 }
 0x79d   : > { %v7320_v63 = vmul.f32 %v9254_v49, %v9252_v48 }
 0x79f   : > { %7484 = vst [vmem:[%s9696_s5 + $0x18] sm:$0xff] %v7320_v63  ;;  %7323 = vst [vmem:[#allocation2] sm:$0xff] %v7320_v63 }
 0x7a0   : > { %9382 = shalt.err (!%p9379_p13)
}
 0x7a1   : > { %s9383_s26 = scalar_lea.hbm %s11976_s27, 512  ;;  %s9387_s13 = scalar_lea.hbm %s12027_s4, 1024 }
 0x7a2   : > { %p9384_p5 = scmp.ne.s32.totalorder %s11976_s27, %s9383_s26  ;;  %p9388_p10 = scmp.lt.u32.totalorder %s11976_s27, %s12027_s4 }
 0x7a3   : > { %p9389_p2 = scmp.lt.u32.totalorder %s9387_s13, %s9383_s26  ;;  %p9391_p4 = scmp.lt.u32.totalorder %s9383_s26, %s11976_s27 }
 0x7a4   : > { %p9385_p12 = pnand %p9384_p5, %p9626_p6 }
 0x7a5   : > { %p9390_p1 = por %p9389_p2, %p9388_p10 }
 0x7a6   : > { %p9386_p8 = pneg %p9385_p12 }
 0x7a7   : > { %p9392_p9 = por %p9391_p4, %p9390_p1 }
 0x7a9   : > { %p9393_p3 = pnand %p9392_p9, %p9386_p8 }
 0x7ab   : > { %9396 = shalt.err (!%p9393_p3)
}
 0x7ac   : > { %s9453_s5 = smov 128   ;;  %s9454_s21 = smov 8  }
 0x7ad   : > { %9123 = dma.vmem_to_hbm [thread:$0]  (%p9626_p6), %s11978_s10, 512, %s11976_s27, %s7326_s6, %s9453_s5, %s9453_s5, %s9454_s21  }
 0x7ae PF: > { %s7354_s24 = sand.u32 1, %s9431_s15   ;;  %p13178_p7 = scmp.ne.s32.totalorder %s12464_s22, 0 }
 0x7af   : > { %p13179_p11 = scmp.ge.s32.totalorder %s9443_s18, 2  ;;  %s7355_s29 = scalar_lea.sflag [#allocation6], %s7354_s24 }
 0x7b1   : > { %p9140_p0 = pnand %p13179_p11, %p13178_p7 }
 0x7b3   : > { %9426 = dma.done.wait (!%p9140_p0), %s7355_s29, 512  }
 0x7b4   : > { %9428 = vsyncadd (!%p9140_p0), %s7355_s29, 4294966784  ;;  %p19_p13 = scmp.ge.s32.totalorder %s9612_s8, 4   ;;  %s13180_s15 = smov %s9435_s16 }
 0x7b5   : > { %s13181_s16 = smov %s9439_s17  ;;  %s13182_s17 = smov %s9622_s11 }
 0x7b6   : > { %s13183_s18 = smov %s9612_s8  ;;  %21 = sbr.rel (!%p19_p13) target bundleno = 7 (0x7), region = 103 }
 0x7bd   :  { %7360 = vsyncpa [#allocation5], 1 }
 0x7be   :  { %7362 = vsyncpa [#allocation5 + $0x1], 1 }
 0x7bf   :  { %7363 = vsyncpa [#allocation8], 1 }
 0x7c0   :  { %7364 = vsyncpa [#allocation11], 1 }
 0x7c1   :  { %7365 = vsyncpa [#allocation6], 1 }
 0x7c2   :  { %7367 = vsyncpa [#allocation6 + $0x1], 1 }

</bundles_post_ra>
